<compile_context>
chip_gen: v7x
topology: tpu7x:2x2x1
jax: 0.10.0
libtpu: 0.0.40
codegen_flags: <defaults>
</compile_context>

<pallas_src>
import jax
import jax.numpy as jnp
from jax.experimental import pallas as pl
from jax.experimental.pallas import tpu as pltpu

LEAKY_SLOPE = 0.01   # nn.LeakyReLU default
BN_EPS = 1e-5        # nn.BatchNorm2d default
LANE = 128


def _conv_lrelu(x_ref, w_ref, k, th, w, cin, cout_p):
    """k*k conv on the resident halo'd tile as k*k accumulated MXU matmuls,
    then LeakyReLU.  Returns (th*w, cout_p) f32."""
    acc = jnp.zeros((th * w, cout_p), jnp.float32)
    for dh in range(k):
        for dw in range(k):
            win = x_ref[dh:dh + th, dw:dw + w, :].reshape(th * w, cin)   # bf16
            acc = acc + jnp.dot(win, w_ref[dh * k + dw, :, :],
                                preferred_element_type=jnp.float32)
    return jnp.where(acc >= 0, acc, LEAKY_SLOPE * acc)


def _make_stats_kernel(k, th, w, cin, cout_p):
    def kernel(x_ref, w_ref, stats_ref):
        # stats_ref block is resident across the H-tile axis (accumulator),
        # distinct per batch index -> batch axis can run 'parallel'.
        @pl.when(pl.program_id(1) == 0)
        def _():
            stats_ref[...] = jnp.zeros_like(stats_ref)

        y = _conv_lrelu(x_ref, w_ref, k, th, w, cin, cout_p)
        upd = jnp.concatenate(
            [jnp.sum(y, axis=0, keepdims=True),          # per-channel sum
             jnp.sum(y * y, axis=0, keepdims=True)],     # per-channel sum of squares
            axis=0)
        stats_ref[...] += upd
    return kernel


def _make_finalize_kernel(k, th, w, cin, cout_p, use_skip):
    c = k // 2  # center tap offset (= n_pad for odd k)
    if use_skip:
        def kernel(x_ref, w_ref, sproj_ref, scale_ref, shift_ref, out_ref):
            y = _conv_lrelu(x_ref, w_ref, k, th, w, cin, cout_p)
            y = y * scale_ref[...] + shift_ref[...]
            # Residual skip = center tap of the resident tile, lifted to the
            # padded channel space via a tiny identity matmul (exact for bf16).
            center = x_ref[c:c + th, c:c + w, :].reshape(th * w, cin)
            y = y + jnp.dot(center, sproj_ref[...],
                            preferred_element_type=jnp.float32)
            out_ref[...] = y
    else:
        def kernel(x_ref, w_ref, scale_ref, shift_ref, out_ref):
            y = _conv_lrelu(x_ref, w_ref, k, th, w, cin, cout_p)
            out_ref[...] = y * scale_ref[...] + shift_ref[...]
    return kernel


def _pick_tile_h(h, max_th=64):
    for t in range(min(h, max_th), 0, -1):
        if h % t == 0:
            return t
    return h


def resblock_forward(x, weight, gamma, beta, filter_size=3, add_skip=True):
    """x: (N, Cin, H, W) NCHW f32; weight: (Cout, Cin, k, k) OIHW; gamma/beta: (Cout,)."""
    k = int(filter_size)
    assert k % 2 == 1, "only odd filter sizes supported"
    n_pad = (k - 1) // 2
    n, cin, h, w = x.shape
    cout = weight.shape[0]
    use_skip = bool(add_skip) and (cin == cout)

    cout_p = max(LANE, ((cout + LANE - 1) // LANE) * LANE)   # lane-dense channels
    th = _pick_tile_h(h)
    nh = h // th
    wp = w + 2 * n_pad
    thp = th + 2 * n_pad

    # ---- wrapper-side layout & padding (single cheap pass over x) ----------
    x_nhwc = jnp.transpose(x, (0, 2, 3, 1))
    xw = jnp.concatenate(
        [x_nhwc[:, :, w - n_pad:, :], x_nhwc, x_nhwc[:, :, :n_pad, :]], axis=2)
    x_pad = jnp.pad(xw, ((0, 0), (n_pad, n_pad), (0, 0), (0, 0)))
    x_pad = x_pad.astype(jnp.bfloat16)                        # bf16 MXU inputs
    if nh == 1:
        x_tiles = x_pad[:, None]
    else:  # overlapping H-halo tiles (only 2*n_pad duplicated rows per tile)
        x_tiles = jnp.stack(
            [x_pad[:, i * th:i * th + thp] for i in range(nh)], axis=1)
    # x_tiles: (N, nH, TH+2p, W+2p, Cin) bf16

    # per-tap weights (k*k, Cin, Cout_p) bf16, channels zero-padded
    w_taps = jnp.transpose(weight, (2, 3, 1, 0)).reshape(k * k, cin, cout)
    w_taps = jnp.pad(w_taps, ((0, 0), (0, 0), (0, cout_p - cout))).astype(jnp.bfloat16)

    x_spec = pl.BlockSpec((None, None, thp, wp, cin), lambda i, j: (i, j, 0, 0, 0))
    w_spec = pl.BlockSpec((k * k, cin, cout_p), lambda i, j: (0, 0, 0))
    vec_spec = pl.BlockSpec((1, cout_p), lambda i, j: (0, 0))

    # ---- pass 1: per-channel sum / sum-of-squares of LeakyReLU(conv(x)) ----
    # Per-batch partial stats so the batch axis is 'parallel' (v7x: both TCs);
    # the H-tile axis stays 'arbitrary' (resident accumulator).
    partial_stats = pl.pallas_call(
        _make_stats_kernel(k, th, w, cin, cout_p),
        out_shape=jax.ShapeDtypeStruct((n, 2, cout_p), jnp.float32),
        grid=(n, nh),
        in_specs=[x_spec, w_spec],
        out_specs=pl.BlockSpec((None, 2, cout_p), lambda i, j: (i, 0, 0)),
        compiler_params=pltpu.CompilerParams(
            dimension_semantics=("parallel", "arbitrary"),
            vmem_limit_bytes=64 * 1024 * 1024),
    )(x_tiles, w_taps)
    stats = jnp.sum(partial_stats, axis=0)                    # (2, Cout_p), tiny

    # Fold BN (training-mode, biased variance) + affine into scale/shift (tiny).
    m_total = float(n * h * w)
    mean = stats[0] / m_total
    var = jnp.maximum(stats[1] / m_total - mean * mean, 0.0)
    gamma_p = jnp.pad(gamma.astype(jnp.float32), (0, cout_p - cout))
    beta_p = jnp.pad(beta.astype(jnp.float32), (0, cout_p - cout))
    s = gamma_p * jax.lax.rsqrt(var + BN_EPS)
    scale = s.reshape(1, cout_p)
    shift = (beta_p - mean * s).reshape(1, cout_p)

    # ---- pass 2: recompute conv, scale/shift, fused residual, lane-dense out
    fin_kernel = _make_finalize_kernel(k, th, w, cin, cout_p, use_skip)
    in_specs = [x_spec, w_spec]
    args = [x_tiles, w_taps]
    if use_skip:
        sproj = jnp.pad(jnp.eye(cin, dtype=jnp.float32),
                        ((0, 0), (0, cout_p - cin))).astype(jnp.bfloat16)
        in_specs.append(pl.BlockSpec((cin, cout_p), lambda i, j: (0, 0)))
        args.append(sproj)
    in_specs += [vec_spec, vec_spec]
    args += [scale, shift]

    out_flat = pl.pallas_call(
        fin_kernel,
        out_shape=jax.ShapeDtypeStruct((n, nh, th * w, cout_p), jnp.float32),
        grid=(n, nh),
        in_specs=in_specs,
        out_specs=pl.BlockSpec((None, None, th * w, cout_p),
                               lambda i, j: (i, j, 0, 0)),
        compiler_params=pltpu.CompilerParams(
            dimension_semantics=("parallel", "parallel"),
            vmem_limit_bytes=64 * 1024 * 1024),
    )(*args)

    out = out_flat.reshape(n, h, w, cout_p)[..., :cout]
    return jnp.transpose(out, (0, 3, 1, 2))                   # back to NCHW


def resblock_reference(x, weight, gamma, beta, filter_size=3, add_skip=True):
    # Pure-JAX reference (independent conv path) for correctness check.
    n_pad = (filter_size - 1) // 2
    xw = jnp.concatenate([x[..., -n_pad:], x, x[..., :n_pad]], axis=-1)
    xp = jnp.pad(xw, ((0, 0), (0, 0), (n_pad, n_pad), (0, 0)))
    y = jax.lax.conv_general_dilated(
        xp, weight, window_strides=(1, 1), padding='VALID',
        dimension_numbers=('NCHW', 'OIHW', 'NCHW'),
        precision=jax.lax.Precision.HIGHEST)
    y = jnp.where(y >= 0, y, LEAKY_SLOPE * y)
    mean = jnp.mean(y, axis=(0, 2, 3), keepdims=True)
    var = jnp.mean((y - mean) ** 2, axis=(0, 2, 3), keepdims=True)
    y = (y - mean) * jax.lax.rsqrt(var + BN_EPS)
    y = y * gamma.reshape(1, -1, 1, 1) + beta.reshape(1, -1, 1, 1)
    if add_skip and x.shape == y.shape:
        y = y + x
    return y


if __name__ == "__main__":
    # Small shapes consistent with the module: n_in == embed_dim so the skip applies.
    N, Cin, H, W = 2, 8, 16, 16
    Cout, k = 8, 3

    key = jax.random.PRNGKey(0)
    kx, kw = jax.random.split(key)
    x = jax.random.normal(kx, (N, Cin, H, W), jnp.float32)
    weight = jax.random.normal(kw, (Cout, Cin, k, k), jnp.float32) * 0.1  # bias=False (norm='batch')
    gamma = jnp.ones((Cout,), jnp.float32)   # BatchNorm2d default affine init
    beta = jnp.zeros((Cout,), jnp.float32)
    # TODO(synk): group/instance norm and the bias-when-norm-is-None branch are
    # not exercised (module defaults: norm='batch' -> bias=False); BN uses
    # training-mode batch statistics (no running stats), as in the original.

    out = resblock_forward(x, weight, gamma, beta, filter_size=k, add_skip=True)
    out = jax.block_until_ready(out)
    assert out.shape == (N, Cout, H, W)

    # Tight check against a reference fed the same bf16-quantized inputs the kernel uses.
    xq = x.astype(jnp.bfloat16).astype(jnp.float32)
    wq = weight.astype(jnp.bfloat16).astype(jnp.float32)
    ref_q = resblock_reference(xq, wq, gamma, beta, filter_size=k, add_skip=True)
    err_q = float(jnp.max(jnp.abs(out - ref_q)))
    assert jnp.allclose(out, ref_q, rtol=2e-3, atol=2e-3), err_q

    # Sanity check against the exact-f32 module semantics (bf16 MXU inputs loosen this).
    ref_f = resblock_reference(x, weight, gamma, beta, filter_size=k, add_skip=True)
    err_f = float(jnp.max(jnp.abs(out - ref_f)))
    assert err_f < 0.1, err_f

    print("KERNEL_OK")
</pallas_src>

<mosaic_0001>
module attributes {stable_mosaic.version = 11 : i64} {
  func.func @kernel(%arg0: i32, %arg1: i32, %arg2: memref<1x1x18x18x8xbf16, #tpu.memory_space<vmem>>, %arg3: memref<9x8x128xbf16, #tpu.memory_space<vmem>>, %arg4: memref<1x2x128xf32, #tpu.memory_space<vmem>>) attributes {dimension_semantics = [#tpu.dimension_semantics<parallel>, #tpu.dimension_semantics<arbitrary>], iteration_bounds = array<i64: 2, 1>, scalar_prefetch = 0 : i64, scratch_operands = 0 : i64, tpu.core_type = #tpu.core_type<tc>, window_params = [{transform_indices = @transform_0, window_bounds = array<i64: 1, 1, 18, 18, 8>}, {pipeline_mode = #tpu.pipeline_mode<synchronous>, transform_indices = @transform_1, window_bounds = array<i64: 9, 8, 128>}, {transform_indices = @transform_2, window_bounds = array<i64: 1, 2, 128>}]} {
    %c0_i32 = arith.constant 0 : i32
    %0 = arith.cmpi eq, %arg1, %c0_i32 : i32
    %1 = arith.extui %0 : i1 to i32
    %c0_i32_0 = arith.constant 0 : i32
    %2 = arith.cmpi ne, %1, %c0_i32_0 : i32
    scf.if %2 {
      %cst_83 = arith.constant 0.000000e+00 : f32
      %84 = vector.broadcast %cst_83 : f32 to vector<2x128xf32>
      %c0_84 = arith.constant 0 : index
      %c0_85 = arith.constant 0 : index
      %c0_86 = arith.constant 0 : index
      %85 = vector.load %arg4[%c0_84, %c0_85, %c0_86] : memref<1x2x128xf32, #tpu.memory_space<vmem>>, vector<1x2x128xf32>
      %86 = vector.shape_cast %85 : vector<1x2x128xf32> to vector<2x128xf32>
      %87 = vector.shape_cast %84 : vector<2x128xf32> to vector<1x2x128xf32>
      tpu.vector_store %arg4[%c0_84, %c0_85, %c0_86], %87 {strides = array<i32>} : memref<1x2x128xf32, #tpu.memory_space<vmem>>, vector<1x2x128xf32>,
    } else {
    }
    %cst = arith.constant 0.000000e+00 : f32
    %3 = vector.broadcast %cst : f32 to vector<256x128xf32>
    %c0 = arith.constant 0 : index
    %c0_1 = arith.constant 0 : index
    %c0_2 = arith.constant 0 : index
    %c0_3 = arith.constant 0 : index
    %c0_4 = arith.constant 0 : index
    %4 = vector.load %arg2[%c0, %c0_1, %c0_2, %c0_3, %c0_4] : memref<1x1x18x18x8xbf16, #tpu.memory_space<vmem>>, vector<1x1x16x16x8xbf16>
    %5 = vector.shape_cast %4 : vector<1x1x16x16x8xbf16> to vector<16x16x8xbf16>
    %6 = vector.shape_cast %5 : vector<16x16x8xbf16> to vector<256x8xbf16>
    %c0_5 = arith.constant 0 : index
    %c0_6 = arith.constant 0 : index
    %c0_7 = arith.constant 0 : index
    %7 = vector.load %arg3[%c0_5, %c0_6, %c0_7] : memref<9x8x128xbf16, #tpu.memory_space<vmem>>, vector<1x8x128xbf16>
    %8 = vector.shape_cast %7 : vector<1x8x128xbf16> to vector<8x128xbf16>
    %cst_8 = arith.constant dense<0.000000e+00> : vector<256x128xf32>
    %9 = tpu.matmul %6, %8, %cst_8 {dimension_numbers = #tpu.dot_dimension_numbers<[1], [0], [0], [1], [0, 0, 1, 1], [], []>} : vector<256x8xbf16>, vector<8x128xbf16>, vector<256x128xf32> -> vector<256x128xf32>
    %10 = arith.addf %3, %9 : vector<256x128xf32>
    %c0_9 = arith.constant 0 : index
    %c0_10 = arith.constant 0 : index
    %c0_11 = arith.constant 0 : index
    %c1 = arith.constant 1 : index
    %c0_12 = arith.constant 0 : index
    %11 = vector.load %arg2[%c0_9, %c0_10, %c0_11, %c1, %c0_12] : memref<1x1x18x18x8xbf16, #tpu.memory_space<vmem>>, vector<1x1x16x16x8xbf16>
    %12 = vector.shape_cast %11 : vector<1x1x16x16x8xbf16> to vector<16x16x8xbf16>
    %13 = vector.shape_cast %12 : vector<16x16x8xbf16> to vector<256x8xbf16>
    %c1_13 = arith.constant 1 : index
    %c0_14 = arith.constant 0 : index
    %c0_15 = arith.constant 0 : index
    %14 = vector.load %arg3[%c1_13, %c0_14, %c0_15] : memref<9x8x128xbf16, #tpu.memory_space<vmem>>, vector<1x8x128xbf16>
    %15 = vector.shape_cast %14 : vector<1x8x128xbf16> to vector<8x128xbf16>
    %cst_16 = arith.constant dense<0.000000e+00> : vector<256x128xf32>
    %16 = tpu.matmul %13, %15, %cst_16 {dimension_numbers = #tpu.dot_dimension_numbers<[1], [0], [0], [1], [0, 0, 1, 1], [], []>} : vector<256x8xbf16>, vector<8x128xbf16>, vector<256x128xf32> -> vector<256x128xf32>
    %17 = arith.addf %10, %16 : vector<256x128xf32>
    %c0_17 = arith.constant 0 : index
    %c0_18 = arith.constant 0 : index
    %c0_19 = arith.constant 0 : index
    %c2 = arith.constant 2 : index
    %c0_20 = arith.constant 0 : index
    %18 = vector.load %arg2[%c0_17, %c0_18, %c0_19, %c2, %c0_20] : memref<1x1x18x18x8xbf16, #tpu.memory_space<vmem>>, vector<1x1x16x16x8xbf16>
    %19 = vector.shape_cast %18 : vector<1x1x16x16x8xbf16> to vector<16x16x8xbf16>
    %20 = vector.shape_cast %19 : vector<16x16x8xbf16> to vector<256x8xbf16>
    %c2_21 = arith.constant 2 : index
    %c0_22 = arith.constant 0 : index
    %c0_23 = arith.constant 0 : index
    %21 = vector.load %arg3[%c2_21, %c0_22, %c0_23] : memref<9x8x128xbf16, #tpu.memory_space<vmem>>, vector<1x8x128xbf16>
    %22 = vector.shape_cast %21 : vector<1x8x128xbf16> to vector<8x128xbf16>
    %cst_24 = arith.constant dense<0.000000e+00> : vector<256x128xf32>
    %23 = tpu.matmul %20, %22, %cst_24 {dimension_numbers = #tpu.dot_dimension_numbers<[1], [0], [0], [1], [0, 0, 1, 1], [], []>} : vector<256x8xbf16>, vector<8x128xbf16>, vector<256x128xf32> -> vector<256x128xf32>
    %24 = arith.addf %17, %23 : vector<256x128xf32>
    %c0_25 = arith.constant 0 : index
    %c0_26 = arith.constant 0 : index
    %c1_27 = arith.constant 1 : index
    %c0_28 = arith.constant 0 : index
    %c0_29 = arith.constant 0 : index
    %25 = vector.load %arg2[%c0_25, %c0_26, %c1_27, %c0_28, %c0_29] : memref<1x1x18x18x8xbf16, #tpu.memory_space<vmem>>, vector<1x1x16x16x8xbf16>
    %26 = vector.shape_cast %25 : vector<1x1x16x16x8xbf16> to vector<16x16x8xbf16>
    %27 = vector.shape_cast %26 : vector<16x16x8xbf16> to vector<256x8xbf16>
    %c3 = arith.constant 3 : index
    %c0_30 = arith.constant 0 : index
    %c0_31 = arith.constant 0 : index
    %28 = vector.load %arg3[%c3, %c0_30, %c0_31] : memref<9x8x128xbf16, #tpu.memory_space<vmem>>, vector<1x8x128xbf16>
    %29 = vector.shape_cast %28 : vector<1x8x128xbf16> to vector<8x128xbf16>
    %cst_32 = arith.constant dense<0.000000e+00> : vector<256x128xf32>
    %30 = tpu.matmul %27, %29, %cst_32 {dimension_numbers = #tpu.dot_dimension_numbers<[1], [0], [0], [1], [0, 0, 1, 1], [], []>} : vector<256x8xbf16>, vector<8x128xbf16>, vector<256x128xf32> -> vector<256x128xf32>
    %31 = arith.addf %24, %30 : vector<256x128xf32>
    %c0_33 = arith.constant 0 : index
    %c0_34 = arith.constant 0 : index
    %c1_35 = arith.constant 1 : index
    %c1_36 = arith.constant 1 : index
    %c0_37 = arith.constant 0 : index
    %32 = vector.load %arg2[%c0_33, %c0_34, %c1_35, %c1_36, %c0_37] : memref<1x1x18x18x8xbf16, #tpu.memory_space<vmem>>, vector<1x1x16x16x8xbf16>
    %33 = vector.shape_cast %32 : vector<1x1x16x16x8xbf16> to vector<16x16x8xbf16>
    %34 = vector.shape_cast %33 : vector<16x16x8xbf16> to vector<256x8xbf16>
    %c4 = arith.constant 4 : index
    %c0_38 = arith.constant 0 : index
    %c0_39 = arith.constant 0 : index
    %35 = vector.load %arg3[%c4, %c0_38, %c0_39] : memref<9x8x128xbf16, #tpu.memory_space<vmem>>, vector<1x8x128xbf16>
    %36 = vector.shape_cast %35 : vector<1x8x128xbf16> to vector<8x128xbf16>
    %cst_40 = arith.constant dense<0.000000e+00> : vector<256x128xf32>
    %37 = tpu.matmul %34, %36, %cst_40 {dimension_numbers = #tpu.dot_dimension_numbers<[1], [0], [0], [1], [0, 0, 1, 1], [], []>} : vector<256x8xbf16>, vector<8x128xbf16>, vector<256x128xf32> -> vector<256x128xf32>
    %38 = arith.addf %31, %37 : vector<256x128xf32>
    %c0_41 = arith.constant 0 : index
    %c0_42 = arith.constant 0 : index
    %c1_43 = arith.constant 1 : index
    %c2_44 = arith.constant 2 : index
    %c0_45 = arith.constant 0 : index
    %39 = vector.load %arg2[%c0_41, %c0_42, %c1_43, %c2_44, %c0_45] : memref<1x1x18x18x8xbf16, #tpu.memory_space<vmem>>, vector<1x1x16x16x8xbf16>
    %40 = vector.shape_cast %39 : vector<1x1x16x16x8xbf16> to vector<16x16x8xbf16>
    %41 = vector.shape_cast %40 : vector<16x16x8xbf16> to vector<256x8xbf16>
    %c5 = arith.constant 5 : index
    %c0_46 = arith.constant 0 : index
    %c0_47 = arith.constant 0 : index
    %42 = vector.load %arg3[%c5, %c0_46, %c0_47] : memref<9x8x128xbf16, #tpu.memory_space<vmem>>, vector<1x8x128xbf16>
    %43 = vector.shape_cast %42 : vector<1x8x128xbf16> to vector<8x128xbf16>
    %cst_48 = arith.constant dense<0.000000e+00> : vector<256x128xf32>
    %44 = tpu.matmul %41, %43, %cst_48 {dimension_numbers = #tpu.dot_dimension_numbers<[1], [0], [0], [1], [0, 0, 1, 1], [], []>} : vector<256x8xbf16>, vector<8x128xbf16>, vector<256x128xf32> -> vector<256x128xf32>
    %45 = arith.addf %38, %44 : vector<256x128xf32>
    %c0_49 = arith.constant 0 : index
    %c0_50 = arith.constant 0 : index
    %c2_51 = arith.constant 2 : index
    %c0_52 = arith.constant 0 : index
    %c0_53 = arith.constant 0 : index
    %46 = vector.load %arg2[%c0_49, %c0_50, %c2_51, %c0_52, %c0_53] : memref<1x1x18x18x8xbf16, #tpu.memory_space<vmem>>, vector<1x1x16x16x8xbf16>
    %47 = vector.shape_cast %46 : vector<1x1x16x16x8xbf16> to vector<16x16x8xbf16>
    %48 = vector.shape_cast %47 : vector<16x16x8xbf16> to vector<256x8xbf16>
    %c6 = arith.constant 6 : index
    %c0_54 = arith.constant 0 : index
    %c0_55 = arith.constant 0 : index
    %49 = vector.load %arg3[%c6, %c0_54, %c0_55] : memref<9x8x128xbf16, #tpu.memory_space<vmem>>, vector<1x8x128xbf16>
    %50 = vector.shape_cast %49 : vector<1x8x128xbf16> to vector<8x128xbf16>
    %cst_56 = arith.constant dense<0.000000e+00> : vector<256x128xf32>
    %51 = tpu.matmul %48, %50, %cst_56 {dimension_numbers = #tpu.dot_dimension_numbers<[1], [0], [0], [1], [0, 0, 1, 1], [], []>} : vector<256x8xbf16>, vector<8x128xbf16>, vector<256x128xf32> -> vector<256x128xf32>
    %52 = arith.addf %45, %51 : vector<256x128xf32>
    %c0_57 = arith.constant 0 : index
    %c0_58 = arith.constant 0 : index
    %c2_59 = arith.constant 2 : index
    %c1_60 = arith.constant 1 : index
    %c0_61 = arith.constant 0 : index
    %53 = vector.load %arg2[%c0_57, %c0_58, %c2_59, %c1_60, %c0_61] : memref<1x1x18x18x8xbf16, #tpu.memory_space<vmem>>, vector<1x1x16x16x8xbf16>
    %54 = vector.shape_cast %53 : vector<1x1x16x16x8xbf16> to vector<16x16x8xbf16>
    %55 = vector.shape_cast %54 : vector<16x16x8xbf16> to vector<256x8xbf16>
    %c7 = arith.constant 7 : index
    %c0_62 = arith.constant 0 : index
    %c0_63 = arith.constant 0 : index
    %56 = vector.load %arg3[%c7, %c0_62, %c0_63] : memref<9x8x128xbf16, #tpu.memory_space<vmem>>, vector<1x8x128xbf16>
    %57 = vector.shape_cast %56 : vector<1x8x128xbf16> to vector<8x128xbf16>
    %cst_64 = arith.constant dense<0.000000e+00> : vector<256x128xf32>
    %58 = tpu.matmul %55, %57, %cst_64 {dimension_numbers = #tpu.dot_dimension_numbers<[1], [0], [0], [1], [0, 0, 1, 1], [], []>} : vector<256x8xbf16>, vector<8x128xbf16>, vector<256x128xf32> -> vector<256x128xf32>
    %59 = arith.addf %52, %58 : vector<256x128xf32>
    %c0_65 = arith.constant 0 : index
    %c0_66 = arith.constant 0 : index
    %c2_67 = arith.constant 2 : index
    %c2_68 = arith.constant 2 : index
    %c0_69 = arith.constant 0 : index
    %60 = vector.load %arg2[%c0_65, %c0_66, %c2_67, %c2_68, %c0_69] : memref<1x1x18x18x8xbf16, #tpu.memory_space<vmem>>, vector<1x1x16x16x8xbf16>
    %61 = vector.shape_cast %60 : vector<1x1x16x16x8xbf16> to vector<16x16x8xbf16>
    %62 = vector.shape_cast %61 : vector<16x16x8xbf16> to vector<256x8xbf16>
    %c8 = arith.constant 8 : index
    %c0_70 = arith.constant 0 : index
    %c0_71 = arith.constant 0 : index
    %63 = vector.load %arg3[%c8, %c0_70, %c0_71] : memref<9x8x128xbf16, #tpu.memory_space<vmem>>, vector<1x8x128xbf16>
    %64 = vector.shape_cast %63 : vector<1x8x128xbf16> to vector<8x128xbf16>
    %cst_72 = arith.constant dense<0.000000e+00> : vector<256x128xf32>
    %65 = tpu.matmul %62, %64, %cst_72 {dimension_numbers = #tpu.dot_dimension_numbers<[1], [0], [0], [1], [0, 0, 1, 1], [], []>} : vector<256x8xbf16>, vector<8x128xbf16>, vector<256x128xf32> -> vector<256x128xf32>
    %66 = arith.addf %59, %65 : vector<256x128xf32>
    %cst_73 = arith.constant 0.000000e+00 : f32
    %67 = vector.broadcast %cst_73 : f32 to vector<256x128xf32>
    %68 = arith.cmpf oge, %66, %67 : vector<256x128xf32>
    %cst_74 = arith.constant 0.00999999977 : f32
    %69 = vector.broadcast %cst_74 : f32 to vector<256x128xf32>
    %70 = arith.mulf %69, %66 : vector<256x128xf32>
    %71 = arith.select %68, %66, %70 : vector<256x128xi1>, vector<256x128xf32>
    %cst_75 = arith.constant dense<0.000000e+00> : vector<128xf32>
    %72 = vector.multi_reduction <add>, %71, %cst_75 [0] : vector<256x128xf32> to vector<128xf32>
    %73 = vector.shape_cast %72 : vector<128xf32> to vector<1x128xf32>
    %74 = arith.mulf %71, %71 : vector<256x128xf32>
    %cst_76 = arith.constant dense<0.000000e+00> : vector<128xf32>
    %75 = vector.multi_reduction <add>, %74, %cst_76 [0] : vector<256x128xf32> to vector<128xf32>
    %76 = vector.shape_cast %75 : vector<128xf32> to vector<1x128xf32>
    %77 = tpu.concatenate %73, %76 in 0 : vector<1x128xf32>, vector<1x128xf32> -> vector<2x128xf32>
    %c0_77 = arith.constant 0 : index
    %c0_78 = arith.constant 0 : index
    %c0_79 = arith.constant 0 : index
    %78 = vector.load %arg4[%c0_77, %c0_78, %c0_79] : memref<1x2x128xf32, #tpu.memory_space<vmem>>, vector<1x2x128xf32>
    %79 = vector.shape_cast %78 : vector<1x2x128xf32> to vector<2x128xf32>
    %80 = arith.addf %79, %77 : vector<2x128xf32>
    %c0_80 = arith.constant 0 : index
    %c0_81 = arith.constant 0 : index
    %c0_82 = arith.constant 0 : index
    %81 = vector.load %arg4[%c0_80, %c0_81, %c0_82] : memref<1x2x128xf32, #tpu.memory_space<vmem>>, vector<1x2x128xf32>
    %82 = vector.shape_cast %81 : vector<1x2x128xf32> to vector<2x128xf32>
    %83 = vector.shape_cast %80 : vector<2x128xf32> to vector<1x2x128xf32>
    tpu.vector_store %arg4[%c0_80, %c0_81, %c0_82], %83 {strides = array<i32>} : memref<1x2x128xf32, #tpu.memory_space<vmem>>, vector<1x2x128xf32>,
    return
  }
  func.func @transform_0(%arg0: i32, %arg1: i32) -> (i32, i32, i32, i32, i32) {
    %c0_i32 = arith.constant 0 : i32
    %c0_i32_0 = arith.constant 0 : i32
    %c0_i32_1 = arith.constant 0 : i32
    %c0_i32_2 = arith.constant 0 : i32
    return %arg0, %arg1, %c0_i32, %c0_i32_0, %c0_i32_1 : i32, i32, i32, i32, i32
  }
  func.func @transform_1(%arg0: i32, %arg1: i32) -> (i32, i32, i32) {
    %c0_i32 = arith.constant 0 : i32
    %c0_i32_0 = arith.constant 0 : i32
    %c0_i32_1 = arith.constant 0 : i32
    %c0_i32_2 = arith.constant 0 : i32
    return %c0_i32, %c0_i32_0, %c0_i32_1 : i32, i32, i32
  }
  func.func @transform_2(%arg0: i32, %arg1: i32) -> (i32, i32, i32) {
    %c0_i32 = arith.constant 0 : i32
    %c0_i32_0 = arith.constant 0 : i32
    %c0_i32_1 = arith.constant 0 : i32
    return %arg0, %c0_i32, %c0_i32_0 : i32, i32, i32
  }
}

</mosaic_0001>

<bundles_post_ra>
// kernel: tpu_custom_call.1
= control target key start
LH: loop header
LB: loop body
LE: loop exit
PB: predicated region body
PF: predicated region fallthrough
CT: control target
= control target key end

     0   :  { %7 = vsyncpa [#allocation3], 0  ;;  %s8634_s0 = inlined_call_operand.hbm [shape: bf16[2,1,18,18,8], index: 0, kind: input, shape index: {}]   ;;  %s8635_s1 = inlined_call_operand.hbm [shape: bf16[9,8,128], index: 1, kind: input, shape index: {}]   ;;  %s8636_s2 = inlined_call_operand.hbm [shape: f32[2,2,128], index: 2, kind: output, shape index: {}]  }
   0x1   :  { %9 = vsyncpa [#allocation3 + $0x1], 0 }
   0x2   :  { %10 = vsyncpa [#allocation6], 0 }
   0x3   :  { %11 = vsyncpa [#allocation4], 0 }
   0x4   :  { %13 = vsyncpa [#allocation4 + $0x1], 0  ;;  %s6687_s9 = smov 0   ;;  %s6689_s10 = smov 0  }
   0x5   :  { %s6691_s11 = smov 0   ;;  %s6693_s12 = smov 0  }
   0x6   :  { %s6695_s13 = smov 0   ;;  %s6697_s14 = smov 0  }
   0x7 LB: > { %s5070_s15 = sadd.s32 4294967295, %s6664_s14   ;;  %s5071_s16 = sadd.s32 4294967294, %s6664_s14   ;;  %s6664_s14 = sphi %s6697_s14, %s19_s14   ;;  %s6660_s13 = sphi %s6695_s13, %s8745_s13   ;;  %s6656_s12 = sphi %s6693_s12, %s8744_s12   ;;  %s6652_s11 = sphi %s6691_s11, %s8743_s11   ;;  %s6648_s10 = sphi %s6689_s10, %s8742_s10   ;;  %s6644_s9 = sphi %s6687_s9, %s8741_s9  }
   0x8   : > { %p53_p0 = scmp.ne.s32.totalorder %s6648_s10, %s6644_s9  ;;  %p6721_p1 = scmp.eq.s32.totalorder %s5070_s15, 0 }
   0x9   : > { %p6725_p2 = scmp.eq.s32.totalorder %s5070_s15, 1  ;;  %p104_p3 = scmp.eq.s32.totalorder %s5071_s16, 1 }
   0xa   : > { %s8660_s17 = scalar_select %p6721_p1, 1, 0 }
   0xb   : > { %s8661_s18 = scalar_select %p6725_p2, 1, 0 }
   0xc   : > { %p6731_p4 = por %p6721_p1, %p53_p0  ;;  %p5072_p5 = scmp.ge.s32.totalorder %s6664_s14, 1 }
   0xd   : > { %p6736_p6 = por %p104_p3, %p53_p0  ;;  %p111_p7 = scmp.lt.s32.totalorder %s6664_s14, 3 }
   0xe   : > { %s8662_s19 = scalar_select %p6731_p4, 1, 0 }
   0xf   : > { %s8663_s20 = scalar_select %p6736_p6, 1, 0 }
  0x10   : > { %p6741_p8 = pnand %p5072_p5, %p111_p7  ;;  %s6666_s22 = smov [#allocation5]  }
  0x11   : > { %s123_s23 = sshll.u32 %s6666_s22, 4  ;;  %s31_s25 = sadd.s32 1, %s6660_s13  ;;  %s124_s23 = int_to_ptr.vmem [resolvable:$true] %s123_s23 }
  0x12   : > { %s8664_s21 = scalar_select %p6741_p8, 1, 0 }
  0x13   : > { %p6349_p9 = pneg %p6741_p8  ;;  %s6520_s28 = scalar_lea.hbm %s8635_s1, 576 }
  0x14   : > { %p6521_p12 = scmp.ne.s32.totalorder %s8635_s1, %s6520_s28  ;;  %p6527_p5 = scmp.lt.u32.totalorder %s6520_s28, %s8635_s1 }
  0x15   : > { %p6750_p11 = pnand %p6349_p9, %p6721_p1 }
  0x17   : > { %p6522_p13 = pneg %p6750_p11 }
  0x19   : > { %p6523_p0 = pnand %p6522_p13, %p6521_p12 }
  0x1b   : > { %p6524_p3 = pneg %p6523_p0 }
  0x1d   : > { %p6529_p7 = pnand %p6527_p5, %p6524_p3 }
  0x1f   : > { %6532 = shalt.err (!%p6529_p7)
}
  0x20   : > { %s6533_s5 = scalar_lea.vmem %s124_s23, 576  ;;  %p6541_p1 = scmp.lt.s32.totalorder %s124_s23, %s124_s23 }
  0x21   : > { %p6534_p9 = scmp.ne.s32.totalorder %s124_s23, %s6533_s5  ;;  %p6542_p4 = scmp.lt.s32.totalorder %s6533_s5, %s6533_s5 }
  0x23   : > { %p6536_p10 = pnand %p6534_p9, %p6522_p13  ;;  %p6543_p8 = por %p6542_p4, %p6541_p1 }
  0x25   : > { %p6537_p6 = pneg %p6536_p10 }
  0x27   : > { %p6544_p2 = pnand %p6543_p8, %p6537_p6 }
  0x29   : > { %6547 = shalt.err (!%p6544_p2)
}
  0x2a   : > { %s6667_s6 = smov 64   ;;  %s6668_s7 = smov 4  }
  0x2b   : > { %6352 = dma.hbm_to_vmem [thread:$0]  (!%p6750_p11), %s8635_s1, 576, %s124_s23, [#allocation6], %s6667_s6, %s6667_s6, %s6668_s7  }
  0x2c   : > { %p33_p1 = scmp.ge.s32.totalorder %s31_s25, 2  ;;  %s40_s16 = sadd.s32 1, %s6652_s11 }
  0x2d   : > { %p47_p2 = scmp.ne.s32.totalorder %s6652_s11, %s6648_s10  ;;  %p48_p4 = scmp.eq.s32.totalorder %s6664_s14, 0 }
  0x2e   : > { %s8747_s25 = smov (%p33_p1, %s31_s25), 0  ;;  %p8666_p8 = scmp.ne.s32.totalorder %s8661_s18, 0 }
  0x2f   : > { %p49_p6 = por %p48_p4, %p47_p2  ;;  %s35_s24 = ssub.s32 %s6660_s13, %s8747_s25 }
  0x30   : > { %p6782_p10 = por %p8666_p8, %p47_p2  ;;  %p6362_p12 = scmp.lt.s32.totalorder %s6664_s14, 2 }
  0x31   : > { %p38_p13 = scmp.eq.s32.totalorder %s35_s24, 0  ;;  %s137_s26 = sand.u32 1, %s6652_s11  }
  0x32   : > { %s6338_s27 = smul.u32 216, %s137_s26  ;;  %p6794_p11 = pnand %p6362_p12, %p49_p6 }
  0x33   : > { %s6791_s28 = scalar_select %p38_p13, %s6652_s11, %s40_s16  }
  0x34   : > { %s6339_s23 = smul.u32 3456, %s6660_s13  ;;  %s141_s29 = scalar_lea.vmem [#allocation2], %s6338_s27 }
  0x35   : > { %s150_s30 = sshll.u32 %s141_s29, 4  ;;  %s6805_s8 = scalar_lea.sflag [#allocation3], %s137_s26  ;;  %s6803_s30 = int_to_ptr.vmem [resolvable:$true] %s150_s30 }
  0x36   : > { %s6801_s5 = scalar_lea.hbm %s8634_s0, %s6339_s23  ;;  %p6550_p3 = pneg %p6794_p11 }
  0x37   : > { %s6548_s15 = scalar_lea.hbm %s6801_s5, 3456  ;;  %s6553_s27 = scalar_lea.hbm %s8634_s0, 6912 }
  0x38   : > { %p6549_p0 = scmp.ne.s32.totalorder %s6801_s5, %s6548_s15  ;;  %p6554_p9 = scmp.lt.u32.totalorder %s6801_s5, %s8634_s0 }
  0x39   : > { %p6555_p1 = scmp.lt.u32.totalorder %s6553_s27, %s6548_s15  ;;  %p6557_p4 = scmp.lt.u32.totalorder %s6548_s15, %s6801_s5 }
  0x3a   : > { %p6551_p5 = pnand %p6550_p3, %p6549_p0 }
  0x3b   : > { %p6556_p2 = por %p6555_p1, %p6554_p9 }
  0x3c   : > { %p6552_p7 = pneg %p6551_p5 }
  0x3d   : > { %p6558_p6 = por %p6557_p4, %p6556_p2 }
  0x3f   : > { %p6559_p8 = pnand %p6558_p6, %p6552_p7 }
  0x41   : > { %6562 = shalt.err (!%p6559_p8)
}
  0x42   : > { %s6563_s26 = scalar_lea.vmem %s6803_s30, 3456  ;;  %s6669_s4 = smov [#allocation2]  }
  0x43   : > { %p6564_p12 = scmp.ne.s32.totalorder %s6803_s30, %s6563_s26  ;;  %s6568_s18 = sshll.u32 %s6669_s4, 4  ;;  %s6569_s18 = int_to_ptr.vmem [resolvable:$false] %s6568_s18 }
  0x44   : > { %s6570_s16 = scalar_lea.vmem %s6569_s18, 6912  ;;  %p6571_p5 = scmp.lt.s32.totalorder %s6803_s30, %s6569_s18 }
  0x45   : > { %p6566_p13 = pnand %p6564_p12, %p6550_p3  ;;  %p6572_p9 = scmp.lt.s32.totalorder %s6570_s16, %s6563_s26 }
  0x47   : > { %p6567_p0 = pneg %p6566_p13  ;;  %p6573_p1 = por %p6572_p9, %p6571_p5 }
  0x49   : > { %p6574_p2 = pnand %p6573_p1, %p6567_p0 }
  0x4b   : > { %6577 = shalt.err (!%p6574_p2)
}
  0x4c   : > { %6356 = dma.hbm_to_vmem [thread:$0]  (!%p6794_p11), %s6801_s5, 3456, %s6803_s30, %s6805_s8, %s6667_s6, %s6667_s6, %s6668_s7  }
  0x4d   : > { %p8669_p3 = scmp.ne.s32.totalorder %s8664_s21, 0 }
  0x4f   : > { %162 = sbr.rel (%p8669_p3) target bundleno = 700 (0x2bc), region = 28 }
  0x56   : > { %s6839_s15 = sand.u32 1, %s6648_s10   ;;  %p8670_p7 = scmp.ne.s32.totalorder %s8662_s19, 0 }
  0x57   : > { %s6340_s24 = smul.u32 216, %s6839_s15  ;;  %s165_s27 = scalar_lea.sflag [#allocation3], %s6839_s15 }
  0x59   : > { %s6843_s23 = scalar_lea.vmem [#allocation2], %s6340_s24 }
  0x5a   : > { %6631 = dma.done.wait (%p8670_p7), %s165_s27, 3456  }
  0x5b   : > { %6633 = vsyncadd (%p8670_p7), %s165_s27, 4294963840  ;;  %p8671_p11 = scmp.ne.s32.totalorder %s8660_s17, 0 }
  0x5d   : > { %6635 = dma.done.wait (%p8671_p11), [#allocation6], 576  }
  0x5e   : > { %6637 = vsyncadd (%p8671_p11), [#allocation6], 4294966720  ;;  %vm734_vm0 = vcmask 1043456   ;;  %vm248_vm1 = vsmask.f32 3328  ;;  %vm685_vm4 = vcmask 64512  }
  0x5f   : > { %vm249_vm2 = vsmask.f32 7440  ;;  %v636_v0 = vld [vmem:[#allocation5 + $0x4] sm:$0xf]  ;;  %v2440_v1 = vld [vmem:[#allocation5 + $0x10] sm:$0xf] }
  0x60   : > { %v199_v2 = vld [vmem:[%s6843_s23] sm:$0xf]  ;;  %6328 = vmatprep.subr.msk.bf16.mxu1 %vm734_vm0, %v636_v0  ;;  %6332 = vmatprep.subr.msk.bf16.mxu0 %vm734_vm0, %v2440_v1  ;;  %v736_v3 = vsel %vm734_vm0, %v636_v0, 0  ;;  %v6858_v4 = vsel %vm734_vm0, %v2440_v1, 0  ;;  %v200_v5 = vld [vmem:[%s6843_s23 + $0x4] sm:$0xf]  ;;  %vm6881_vm3 = vmor %vm248_vm1, %vm249_vm2 }
  0x61   : > { %8672 = vst [vmem:[#allocation11_spill] sm:$0xff] %v6858_v4  ;;  %v232_v6 = vld [vmem:[%s6843_s23 + $0x8] sm:$0x1]  ;;  %5765 = vmatpush3.bf16.msra.mxu1 %v736_v3  ;;  %5901 = vmatpush3.bf16.msra.mxu0 %v6858_v4  ;;  %v252_v7 = vshrl.u32 %v199_v2, 16  ;;  %v255_v8 = vshll.u32 %v199_v2, 16  ;;  %v261_v9 = vshll.u32 %v200_v5, 16 }
  0x62   : > { %v265_v10 = vshrl.u32 %v200_v5, 16  ;;  %v231_v11 = vld [vmem:[#allocation5] sm:$0xf]  ;;  %v271_v12 = vshll.u32 %v232_v6, 16  ;;  %v5255_v13 = vld [vmem:[%s6843_s23 + $0xc] sm:$0xf] }
  0x63   : > { %6329 = vmatprep.subr.msk.bf16.mxu1 %vm734_vm0, %v231_v11  ;;  %v6866_v14 = vld [vmem:[%s6843_s23 + $0x10] sm:$0xf]  ;;  %v254_v15 = vrot.slane %v252_v7, 4  ;;  %v257_v16 = vrot.slane %v255_v8, 5  ;;  %v263_v17 = vrot.slane %v261_v9, 5  ;;  %v2056_v21 = vshrl.u32 %v5255_v13, 16 }
  0x64   : > { %v267_v18 = vrot.slane %v265_v10, 4  ;;  %v6869_v19 = vld [vmem:[%s6843_s23 + $0x14] sm:$0x1]  ;;  %v273_v20 = vrot.slane %v271_v12, 5  ;;  %v2059_v22 = vshll.u32 %v5255_v13, 16  ;;  %v2065_v23 = vshll.u32 %v6866_v14, 16 }
  0x65   : > { %v6872_v24 = vld [vmem:[#allocation5 + $0x14] sm:$0xf]  ;;  %v258_v25 = vor.u32 %v257_v16, %v254_v15  ;;  %v2069_v27 = vshrl.u32 %v6866_v14, 16  ;;  %v2075_v28 = vshll.u32 %v6869_v19, 16  ;;  %v2058_v31 = vrot.slane %v2056_v21, 4  ;;  %s5078_s17 = sshll.u32 %s6839_s15, 1 }
  0x66   : > { %v268_v26 = vor.u32 %v267_v18, %v263_v17  ;;  %6334 = vmatprep.subr.msk.bf16.mxu0 %vm734_vm0, %v6872_v24  ;;  %v201_v29 = vld [vmem:[%s6843_s23 + $0xc] sm:$0xf]  ;;  %v2061_v32 = vrot.slane %v2059_v22, 5  ;;  %v2067_v33 = vrot.slane %v2065_v23, 5  ;;  %v202_v34 = vld [vmem:[%s6843_s23 + $0x10] sm:$0xf] }
  0x67   : > { %v259_v35 = vrot.slane %v258_v25, 4  ;;  %v2071_v37 = vrot.slane %v2069_v27, 4  ;;  %v2077_v39 = vrot.slane %v2075_v28, 5  ;;  %v233_v40 = vld [vmem:[%s6843_s23 + $0x14] sm:$0x1]  ;;  %v276_v41 = vshrl.u32 %v201_v29, 16 }
  0x68   : > { %v269_v36 = vrot.slane %v268_v26, 4  ;;  %v2062_v38 = vor.u32 %v2061_v32, %v2058_v31  ;;  %v279_v42 = vshll.u32 %v201_v29, 16  ;;  %v285_v46 = vshll.u32 %v202_v34, 16  ;;  %v5258_v55 = vld [vmem:[%s6843_s23 + $0x18] sm:$0xf]  ;;  %s8546_s19 = scalar_lea.vmem [#allocation7], %s5078_s17 }
  0x69   : > { %v264_v43 = vsel %vm6881_vm3, %v259_v35, %v263_v17  ;;  %v2072_v45 = vor.u32 %v2071_v37, %v2067_v33  ;;  %v278_v49 = vrot.slane %v276_v41, 4  ;;  %v289_v53 = vshrl.u32 %v202_v34, 16  ;;  %v6898_v60 = vld [vmem:[%s6843_s23 + $0x1c] sm:$0xf]  ;;  %v6901_v61 = vld [vmem:[%s6843_s23 + $0x20] sm:$0x1] }
  0x6a   : > { %v274_v44 = vsel %vm6881_vm3, %v269_v36, %v273_v20  ;;  %v2063_v48 = vrot.slane %v2062_v38, 4  ;;  %v281_v50 = vrot.slane %v279_v42, 5  ;;  %v287_v52 = vrot.slane %v285_v46, 5  ;;  %v203_v16 = vld [vmem:[%s6843_s23 + $0x18] sm:$0xf]  ;;  %s5608_s21 = sshll.u32 %s6656_s12, 5 }
  0x6b   : > { %v5079_v47 = vcombine.low %v264_v43, %v274_v44  ;;  %v2073_v51 = vrot.slane %v2072_v45, 4  ;;  %v295_v54 = vshll.u32 %v233_v40, 16  ;;  %v2799_v57 = vrot.slane %v6866_v14, 5  ;;  %v204_v22 = vld [vmem:[%s6843_s23 + $0x1c] sm:$0xf]  ;;  %s4979_s6 = sshll.u32 %s8546_s19, 4  ;;  %s8584_s3 = scalar_lea.hbm %s8636_s2, %s5608_s21  ;;  %s8586_s6 = int_to_ptr.vmem [resolvable:$true] %s4979_s6 }
  0x6c   : > { %v2068_v56 = vsel %vm6881_vm3, %v2063_v48, %v2067_v33  ;;  %v2802_v58 = vrot.slane %v6869_v19, 5  ;;  %v282_v59 = vor.u32 %v281_v50, %v278_v49  ;;  %v291_v63 = vrot.slane %v289_v53, 4  ;;  %v234_v28 = vld [vmem:[%s6843_s23 + $0x20] sm:$0x1]  ;;  %v5261_v34 = vld [vmem:[%s6843_s23 + $0x24] sm:$0xf] }
  0x6d   : > { %5766 = vmatprep.mubr.msk.bf16.mxu1 %vm685_vm4, %v5079_v47  ;;  %v2078_v62 = vsel %vm6881_vm3, %v2073_v51, %v2077_v39  ;;  %v297_v0 = vrot.slane %v295_v54, 5  ;;  %v1028_v1 = vsel %vm734_vm0, %v231_v11, 0  ;;  %v2080_v5 = vshrl.u32 %v5258_v55, 16  ;;  %v6927_v43 = vld [vmem:[%s6843_s23 + $0x28] sm:$0xf]  ;;  %s4966_s5 = scalar_lea.sflag [#allocation4], %s6839_s15 }
  0x6e   : > { %v5303_v2 = vcombine.low %v2068_v56, %v2078_v62  ;;  %v283_v3 = vrot.slane %v282_v59, 4  ;;  %v2083_v6 = vshll.u32 %v5258_v55, 16  ;;  %v292_v7 = vor.u32 %v291_v63, %v287_v52  ;;  %v6933_v46 = vld [vmem:[%s6843_s23 + $0x2c] sm:$0x1]  ;;  %s6578_s8 = scalar_lea.vmem %s8586_s6, 32  ;;  %s6671_s12 = smov [#allocation7]  }
  0x6f   : > { %v2089_v8 = vshll.u32 %v6898_v60, 16  ;;  %v2093_v9 = vshrl.u32 %v6898_v60, 16  ;;  %v2099_v10 = vshll.u32 %v6901_v61, 16  ;;  %v2082_v13 = vrot.slane %v2080_v5, 4  ;;  %p6579_p4 = scmp.ne.s32.totalorder %s8586_s6, %s6578_s8  ;;  %s6582_s29 = sshll.u32 %s6671_s12, 4  ;;  %s6583_s29 = int_to_ptr.vmem [resolvable:$false] %s6582_s29 }
  0x70   : > { %5902 = vmatprep.mubr.msk.bf16.mxu0 %vm685_vm4, %v5303_v2  ;;  %v288_v12 = vsel %vm6881_vm3, %v283_v3, %v287_v52  ;;  %v2085_v11 = vrot.slane %v2083_v6, 5  ;;  %v2806_v15 = vrot.slane %v6898_v60, 5  ;;  %v293_v17 = vrot.slane %v292_v7, 4  ;;  %v205_v52 = vld [vmem:[%s6843_s23 + $0x24] sm:$0xf]  ;;  %s6584_s26 = scalar_lea.vmem %s6583_s29, 64  ;;  %p6585_p12 = scmp.lt.s32.totalorder %s8586_s6, %s6583_s29 }
  0x71   : > { %v2091_v18 = vrot.slane %v2089_v8, 5  ;;  %v2095_v20 = vrot.slane %v2093_v9, 4  ;;  %v2101_v21 = vrot.slane %v2099_v10, 5  ;;  %v2809_v26 = vrot.slane %v6901_v61, 5  ;;  %p6580_p6 = pnand %p6579_p4, %p6782_p10  ;;  %p6586_p13 = scmp.lt.s32.totalorder %s6584_s26, %s6578_s8 }
  0x72   : > { %v2086_v23 = vor.u32 %v2085_v11, %v2082_v13  ;;  %v6917_v25 = vrot.slane %v2806_v15, 4  ;;  %v3008_v27 = vsel %vm734_vm0, %v6872_v24, 0  ;;  %v298_v29 = vsel %vm6881_vm3, %v293_v17, %v297_v0  ;;  %v5264_v13 = vld [vmem:[%s6843_s23 + $0x30] sm:$0xf] }
  0x73   : > { %v2096_v31 = vor.u32 %v2095_v20, %v2091_v18  ;;  %v300_v32 = vshrl.u32 %v203_v16, 16  ;;  %v303_v33 = vshll.u32 %v203_v16, 16  ;;  %v5080_v35 = vcombine.low %v288_v12, %v298_v29  ;;  %v235_v12 = vld [vmem:[%s6843_s23 + $0x2c] sm:$0x1]  ;;  %p6581_p8 = pneg %p6580_p6  ;;  %p6587_p0 = por %p6586_p13, %p6585_p12 }
  0x74   : > { %v2087_v36 = vrot.slane %v2086_v23, 4  ;;  %v309_v37 = vshll.u32 %v204_v22, 16  ;;  %v313_v38 = vshrl.u32 %v204_v22, 16  ;;  %v319_v42 = vshll.u32 %v234_v28, 16 }
  0x75   : > { %v2097_v39 = vrot.slane %v2096_v31, 4  ;;  %v302_v40 = vrot.slane %v300_v32, 4  ;;  %v305_v41 = vrot.slane %v303_v33, 5  ;;  %5767 = vmatmul.mubr.msk.bf16.vlgmr.msra.gmra.mrb[0].mxu1 %vm685_vm4, %v5080_v35  ;;  %v2104_v47 = vshrl.u32 %v5261_v34, 16  ;;  %p6588_p5 = pnand %p6587_p0, %p6581_p8 }
  0x76   : > { %v2092_v24 = vsel %vm6881_vm3, %v2087_v36, %v2091_v18  ;;  %v311_v44 = vrot.slane %v309_v37, 5  ;;  %v315_v45 = vrot.slane %v313_v38, 4  ;;  %5799 = vmatpush3.bf16.msra.mxu1 %v1028_v1  ;;  %v321_v50 = vrot.slane %v319_v42, 5  ;;  %v206_v1 = vld [vmem:[%s6843_s23 + $0x28] sm:$0xf] }
  0x77   : > { %v2102_v48 = vsel %vm6881_vm3, %v2097_v39, %v2101_v21  ;;  %v306_v49 = vor.u32 %v305_v41, %v302_v40  ;;  %v2107_v51 = vshll.u32 %v5261_v34, 16  ;;  %v2106_v55 = vrot.slane %v2104_v47, 4  ;;  %v6956_v36 = vld [vmem:[%s6843_s23 + $0x38] sm:$0x1]  ;;  %v207_v42 = vld [vmem:[%s6843_s23 + $0x30] sm:$0xf] }
  0x78   : > { %v5304_v53 = vcombine.low %v2092_v24, %v2102_v48  ;;  %v316_v54 = vor.u32 %v315_v45, %v311_v44  ;;  %v2113_v56 = vshll.u32 %v6927_v43, 16  ;;  %v2117_v63 = vshrl.u32 %v6927_v43, 16  ;;  %v208_v48 = vld [vmem:[%s6843_s23 + $0x34] sm:$0xf] }
  0x79   : > { %v307_v59 = vrot.slane %v306_v49, 4  ;;  %v2109_v62 = vrot.slane %v2107_v51, 5  ;;  %v2123_v0 = vshll.u32 %v6933_v46, 16  ;;  %v324_v5 = vshrl.u32 %v205_v52, 16 }
  0x7a   : > { %5903 = vmatmul.mubr.msk.bf16.vlgmr.msra.gmra.mrb[0].mxu0 %vm685_vm4, %v5304_v53  ;;  %v317_v2 = vrot.slane %v316_v54, 4  ;;  %v2115_v3 = vrot.slane %v2113_v56, 5  ;;  %v327_v6 = vshll.u32 %v205_v52, 16  ;;  %v2119_v9 = vrot.slane %v2117_v63, 4  ;;  %v236_v56 = vld [vmem:[%s6843_s23 + $0x38] sm:$0x1] }
  0x7b   : > { %5935 = vmatpush3.bf16.msra.mxu0 %v3008_v27  ;;  %v312_v7 = vsel %vm6881_vm3, %v307_v59, %v311_v44  ;;  %v2110_v8 = vor.u32 %v2109_v62, %v2106_v55  ;;  %v2125_v10 = vrot.slane %v2123_v0, 5  ;;  %v326_v16 = vrot.slane %v324_v5, 4  ;;  %v6950_v27 = vld [vmem:[%s6843_s23 + $0x34] sm:$0xf] }
  0x7c   : > { %v322_v11 = vsel %vm6881_vm3, %v317_v2, %v321_v50  ;;  %v329_v17 = vrot.slane %v327_v6, 5  ;;  %v333_v18 = vshll.u32 %v206_v1, 16  ;;  %v2120_v22 = vor.u32 %v2119_v9, %v2115_v3  ;;  %v5267_v2 = vld [vmem:[%s6843_s23 + $0x3c] sm:$0xf] }
  0x7d   : > { %v5081_v20 = vcombine.low %v312_v7, %v322_v11  ;;  %v2111_v21 = vrot.slane %v2110_v8, 4  ;;  %v337_v23 = vshrl.u32 %v206_v1, 16  ;;  %v343_v31 = vshll.u32 %v235_v12, 16  ;;  %v6973_v8 = vld [vmem:[%s6843_s23 + $0x40] sm:$0xf] }
  0x7e   : > { %v330_v28 = vor.u32 %v329_v17, %v326_v16  ;;  %v335_v29 = vrot.slane %v333_v18, 5  ;;  %v2128_v32 = vshrl.u32 %v5264_v13, 16  ;;  %v2121_v34 = vrot.slane %v2120_v22, 4  ;;  %v6978_v18 = vld [vmem:[%s6843_s23 + $0x44] sm:$0x1] }
  0x7f   : > { %5770 = vmatprep.mubr.msk.bf16.mxu1 %vm685_vm4, %v5081_v20  ;;  %v2116_v33 = vsel %vm6881_vm3, %v2111_v21, %v2115_v3  ;;  %v339_v35 = vrot.slane %v337_v23, 4  ;;  %v2131_v37 = vshll.u32 %v5264_v13, 16  ;;  %v345_v39 = vrot.slane %v343_v31, 5  ;;  %v6983_v31 = vld [vmem:[#allocation5 + $0x18] sm:$0xf] }
  0x80   : > { %v331_v38 = vrot.slane %v330_v28, 4  ;;  %v2130_v40 = vrot.slane %v2128_v32, 4  ;;  %v2137_v41 = vshll.u32 %v6950_v27, 16  ;;  %v2126_v24 = vsel %vm6881_vm3, %v2121_v34, %v2125_v10  ;;  %6335 = vmatprep.subr.msk.bf16.mxu0 %vm734_vm0, %v6983_v31 }
  0x81   : > { %v340_v44 = vor.u32 %v339_v35, %v335_v29  ;;  %v2133_v45 = vrot.slane %v2131_v37, 5  ;;  %v2141_v47 = vshrl.u32 %v6950_v27, 16  ;;  %v5305_v49 = vcombine.low %v2116_v33, %v2126_v24 }
  0x82   : > { %v336_v50 = vsel %vm6881_vm3, %v331_v38, %v335_v29  ;;  %v2139_v51 = vrot.slane %v2137_v41, 5  ;;  %v2147_v52 = vshll.u32 %v6956_v36, 16  ;;  %v348_v59 = vshrl.u32 %v207_v42, 16  ;;  %v209_v29 = vld [vmem:[%s6843_s23 + $0x3c] sm:$0xf] }
  0x83   : > { %v341_v53 = vrot.slane %v340_v44, 4  ;;  %v2134_v54 = vor.u32 %v2133_v45, %v2130_v40  ;;  %v2143_v55 = vrot.slane %v2141_v47, 4  ;;  %5906 = vmatprep.mubr.msk.bf16.mxu0 %vm685_vm4, %v5305_v49  ;;  %v351_v63 = vshll.u32 %v207_v42, 16  ;;  %v210_v44 = vld [vmem:[%s6843_s23 + $0x40] sm:$0xf] }
  0x84   : > { %v2149_v62 = vrot.slane %v2147_v52, 5  ;;  %v357_v0 = vshll.u32 %v208_v48, 16  ;;  %v361_v1 = vshrl.u32 %v208_v48, 16  ;;  %v350_v7 = vrot.slane %v348_v59, 4  ;;  %v5270_v52 = vld [vmem:[%s6843_s23 + $0x48] sm:$0xf] }
  0x85   : > { %v346_v3 = vsel %vm6881_vm3, %v341_v53, %v345_v39  ;;  %v2135_v5 = vrot.slane %v2134_v54, 4  ;;  %v2144_v6 = vor.u32 %v2143_v55, %v2139_v51  ;;  %v353_v10 = vrot.slane %v351_v63, 5 }
  0x86   : > { %v5082_v9 = vcombine.low %v336_v50, %v346_v3  ;;  %v359_v12 = vrot.slane %v357_v0, 5  ;;  %v363_v13 = vrot.slane %v361_v1, 4  ;;  %v367_v17 = vshll.u32 %v236_v56, 16  ;;  %v237_v50 = vld [vmem:[%s6843_s23 + $0x44] sm:$0x1] }
  0x87   : > { %v2140_v11 = vsel %vm6881_vm3, %v2135_v5, %v2139_v51  ;;  %v2145_v16 = vrot.slane %v2144_v6, 4  ;;  %v2152_v20 = vshrl.u32 %v5267_v2, 16  ;;  %v354_v21 = vor.u32 %v353_v10, %v350_v7  ;;  %v7001_v3 = vld [vmem:[%s6843_s23 + $0x4c] sm:$0xf] }
  0x88   : > { %5771 = vmatmul.mubr.msk.bf16.gmra.mrb[4].mxu1 %vm685_vm4, %v5082_v9  ;;  %v364_v22 = vor.u32 %v363_v13, %v359_v12  ;;  %v2155_v23 = vshll.u32 %v5267_v2, 16  ;;  %v2161_v28 = vshll.u32 %v6973_v8, 16  ;;  %v369_v33 = vrot.slane %v367_v17, 5  ;;  %v7006_v13 = vld [vmem:[%s6843_s23 + $0x50] sm:$0x1] }
  0x89   : > { %v2150_v32 = vsel %vm6881_vm3, %v2145_v16, %v2149_v62  ;;  %v2154_v34 = vrot.slane %v2152_v20, 4  ;;  %v2165_v35 = vshrl.u32 %v6973_v8, 16  ;;  %v355_v38 = vrot.slane %v354_v21, 4 }
  0x8a   : > { %v5306_v37 = vcombine.low %v2140_v11, %v2150_v32  ;;  %v365_v39 = vrot.slane %v364_v22, 4  ;;  %v2157_v40 = vrot.slane %v2155_v23, 5  ;;  %v2163_v41 = vrot.slane %v2161_v28, 5  ;;  %v7009_v11 = vld [vmem:[%s6843_s23 + $0x48] sm:$0xf] }
  0x8b   : > { %v2167_v42 = vrot.slane %v2165_v35, 4  ;;  %v2171_v24 = vshll.u32 %v6978_v18, 16  ;;  %v372_v45 = vshrl.u32 %v209_v29, 16  ;;  %v360_v47 = vsel %vm6881_vm3, %v355_v38, %v359_v12  ;;  %v7017_v35 = vld [vmem:[%s6843_s23 + $0x4c] sm:$0xf] }
  0x8c   : > { %5907 = vmatmul.mubr.msk.bf16.gmra.mrb[4].mxu0 %vm685_vm4, %v5306_v37  ;;  %v370_v48 = vsel %vm6881_vm3, %v365_v39, %v369_v33  ;;  %v2158_v49 = vor.u32 %v2157_v40, %v2154_v34  ;;  %v375_v51 = vshll.u32 %v209_v29, 16  ;;  %v381_v63 = vshll.u32 %v210_v44, 16 }
  0x8d   : > { %v5083_v53 = vcombine.low %v360_v47, %v370_v48  ;;  %v2168_v54 = vor.u32 %v2167_v42, %v2163_v41  ;;  %v2173_v55 = vrot.slane %v2171_v24, 5  ;;  %v374_v56 = vrot.slane %v372_v45, 4  ;;  %v5273_v48 = vld [vmem:[%s6843_s23 + $0x54] sm:$0xf] }
  0x8e   : > { %v2159_v59 = vrot.slane %v2158_v49, 4  ;;  %v377_v62 = vrot.slane %v375_v51, 5  ;;  %v385_v0 = vshrl.u32 %v210_v44, 16  ;;  %v391_v2 = vshll.u32 %v237_v50, 16 }
  0x8f   : > { %5774 = vmatprep.mubr.msk.bf16.mxu1 %vm685_vm4, %v5083_v53  ;;  %v2169_v1 = vrot.slane %v2168_v54, 4  ;;  %v2176_v5 = vshrl.u32 %v5270_v52, 16  ;;  %v2179_v6 = vshll.u32 %v5270_v52, 16  ;;  %v383_v10 = vrot.slane %v381_v63, 5  ;;  %v7031_v53 = vld [vmem:[%s6843_s23 + $0x58] sm:$0xf] }
  0x90   : > { %v2164_v7 = vsel %vm6881_vm3, %v2159_v59, %v2163_v41  ;;  %v378_v9 = vor.u32 %v377_v62, %v374_v56  ;;  %v387_v12 = vrot.slane %v385_v0, 4  ;;  %v393_v17 = vrot.slane %v391_v2, 5  ;;  %v238_v41 = vld [vmem:[%s6843_s23 + $0x50] sm:$0x1] }
  0x91   : > { %v2174_v16 = vsel %vm6881_vm3, %v2169_v1, %v2173_v55  ;;  %v2178_v20 = vrot.slane %v2176_v5, 4  ;;  %v2181_v21 = vrot.slane %v2179_v6, 5  ;;  %v2185_v29 = vshll.u32 %v7001_v3, 16  ;;  %v7036_v1 = vld [vmem:[%s6843_s23 + $0x5c] sm:$0x1] }
  0x92   : > { %v5307_v22 = vcombine.low %v2164_v7, %v2174_v16  ;;  %v379_v23 = vrot.slane %v378_v9, 4  ;;  %v388_v28 = vor.u32 %v387_v12, %v383_v10  ;;  %v2189_v33 = vshrl.u32 %v7001_v3, 16 }
  0x93   : > { %v2182_v32 = vor.u32 %v2181_v21, %v2178_v20  ;;  %v2195_v34 = vshll.u32 %v7006_v13, 16  ;;  %v396_v37 = vshrl.u32 %v7009_v11, 16  ;;  %v2187_v40 = vrot.slane %v2185_v29, 5  ;;  %v7042_v20 = vld [vmem:[%s6843_s23 + $0x54] sm:$0xf] }
  0x94   : > { %5910 = vmatprep.mubr.msk.bf16.mxu0 %vm685_vm4, %v5307_v22  ;;  %v384_v38 = vsel %vm6881_vm3, %v379_v23, %v383_v10  ;;  %v389_v39 = vrot.slane %v388_v28, 4  ;;  %v399_v42 = vshll.u32 %v7009_v11, 16  ;;  %v2191_v44 = vrot.slane %v2189_v33, 4  ;;  %v7048_v29 = vld [vmem:[%s6843_s23 + $0x58] sm:$0xf] }
  0x95   : > { %v2183_v24 = vrot.slane %v2182_v32, 4  ;;  %v2197_v45 = vrot.slane %v2195_v34, 5  ;;  %v398_v47 = vrot.slane %v396_v37, 4  ;;  %v405_v51 = vshll.u32 %v7017_v35, 16 }
  0x96   : > { %v394_v49 = vsel %vm6881_vm3, %v389_v39, %v393_v17  ;;  %v401_v50 = vrot.slane %v399_v42, 5  ;;  %v409_v52 = vshrl.u32 %v7017_v35, 16  ;;  %v2192_v56 = vor.u32 %v2191_v44, %v2187_v40 }
  0x97   : > { %v5084_v54 = vcombine.low %v384_v38, %v394_v49  ;;  %v2188_v55 = vsel %vm6881_vm3, %v2183_v24, %v2187_v40  ;;  %v415_v59 = vshll.u32 %v238_v41, 16  ;;  %v407_v63 = vrot.slane %v405_v51, 5  ;;  %v239_v40 = vld [vmem:[%s6843_s23 + $0x5c] sm:$0x1]  ;;  %v7061_v49 = vld [vmem:[#allocation5 + $0x8] sm:$0xf] }
  0x98   : > { %v402_v62 = vor.u32 %v401_v50, %v398_v47  ;;  %v411_v0 = vrot.slane %v409_v52, 4  ;;  %v2200_v2 = vshrl.u32 %v5273_v48, 16  ;;  %v2193_v5 = vrot.slane %v2192_v56, 4  ;;  %6330 = vmatprep.subr.msk.bf16.mxu1 %vm734_vm0, %v7061_v49 }
  0x99   : > { %5775 = vmatmul.mubr.msk.bf16.gmra.mrb[8].mxu1 %vm685_vm4, %v5084_v54  ;;  %v417_v6 = vrot.slane %v415_v59, 5  ;;  %v2203_v7 = vshll.u32 %v5273_v48, 16  ;;  %v2209_v9 = vshll.u32 %v7031_v53, 16  ;;  %v2213_v17 = vshrl.u32 %v7031_v53, 16  ;;  %v5276_v48 = vld [vmem:[%s6843_s23 + $0x60] sm:$0xf] }
  0x9a   : > { %v403_v10 = vrot.slane %v402_v62, 4  ;;  %v412_v12 = vor.u32 %v411_v0, %v407_v63  ;;  %v2202_v16 = vrot.slane %v2200_v2, 4  ;;  %v2198_v21 = vsel %vm6881_vm3, %v2193_v5, %v2197_v45  ;;  %v7072_v5 = vld [vmem:[%s6843_s23 + $0x68] sm:$0x1] }
  0x9b   : > { %v2205_v22 = vrot.slane %v2203_v7, 5  ;;  %v2211_v23 = vrot.slane %v2209_v9, 5  ;;  %v2219_v28 = vshll.u32 %v7036_v1, 16  ;;  %v5308_v32 = vcombine.low %v2188_v55, %v2198_v21  ;;  %v7064_v55 = vld [vmem:[%s6843_s23 + $0x64] sm:$0xf] }
  0x9c   : > { %v408_v33 = vsel %vm6881_vm3, %v403_v10, %v407_v63  ;;  %v413_v34 = vrot.slane %v412_v12, 4  ;;  %v2215_v37 = vrot.slane %v2213_v17, 4  ;;  %v420_v41 = vshrl.u32 %v7042_v20, 16  ;;  %v7078_v17 = vld [vmem:[%s6843_s23 + $0x60] sm:$0xf] }
  0x9d   : > { %v2206_v38 = vor.u32 %v2205_v22, %v2202_v16  ;;  %v2221_v39 = vrot.slane %v2219_v28, 5  ;;  %v423_v42 = vshll.u32 %v7042_v20, 16  ;;  %vm1239_vm5 = vcmask 1042432   ;;  %5911 = vmatmul.mubr.msk.bf16.gmra.mrb[8].mxu0 %vm685_vm4, %v5308_v32 }
  0x9e   : > { %vm1240_vm6 = vcmask 1046532   ;;  %v418_v24 = vsel %vm6881_vm3, %v413_v34, %v417_v6  ;;  %v2216_v44 = vor.u32 %v2215_v37, %v2211_v23  ;;  %v429_v45 = vshll.u32 %v7048_v29, 16 }
  0x9f   : > { %v433_v47 = vshrl.u32 %v7048_v29, 16  ;;  %v5085_v50 = vcombine.low %v408_v33, %v418_v24  ;;  %v2207_v51 = vrot.slane %v2206_v38, 4  ;;  %v422_v52 = vrot.slane %v420_v41, 4  ;;  %v240_v41 = vld [vmem:[%s6843_s23 + $0x68] sm:$0x1]  ;;  %vm7101_vm7 = vmor %vm1239_vm5, %vm1240_vm6 }
  0xa0   : > { %v425_v54 = vrot.slane %v423_v42, 5  ;;  %v2217_v56 = vrot.slane %v2216_v44, 4  ;;  %v431_v59 = vrot.slane %v429_v45, 5  ;;  %v439_v63 = vshll.u32 %v239_v40, 16 }
  0xa1   : > { %v435_v62 = vrot.slane %v433_v47, 4  ;;  %5778 = vmatprep.mubr.msk.bf16.mxu1 %vm685_vm4, %v5085_v50  ;;  %v2212_v0 = vsel %vm6881_vm3, %v2207_v51, %v2211_v23  ;;  %v2224_v6 = vshrl.u32 %v5276_v48, 16  ;;  %v2227_v7 = vshll.u32 %v5276_v48, 16  ;;  %v7081_v23 = vld [vmem:[%s6843_s23 + $0x64] sm:$0xf] }
  0xa2   : > { %v426_v2 = vor.u32 %v425_v54, %v422_v52  ;;  %v2222_v9 = vsel %vm6881_vm3, %v2217_v56, %v2221_v39  ;;  %v441_v12 = vrot.slane %v439_v63, 5  ;;  %v2233_v16 = vshll.u32 %v7064_v55, 16  ;;  %v5335_v50 = vld [vmem:[%s6843_s23 + $0xc] sm:$0xe] }
  0xa3   : > { %v436_v10 = vor.u32 %v435_v62, %v431_v59  ;;  %v5309_v21 = vcombine.low %v2212_v0, %v2222_v9  ;;  %v2226_v28 = vrot.slane %v2224_v6, 4  ;;  %v2229_v32 = vrot.slane %v2227_v7, 5 }
  0xa4   : > { %v427_v22 = vrot.slane %v426_v2, 4  ;;  %v2235_v34 = vrot.slane %v2233_v16, 5  ;;  %v2237_v37 = vshrl.u32 %v7064_v55, 16  ;;  %v2243_v38 = vshll.u32 %v7072_v5, 16 }
  0xa5   : > { %v437_v33 = vrot.slane %v436_v10, 4  ;;  %5914 = vmatprep.mubr.msk.bf16.mxu0 %vm685_vm4, %v5309_v21  ;;  %v2230_v40 = vor.u32 %v2229_v32, %v2226_v28  ;;  %v444_v42 = vshrl.u32 %v7078_v17, 16  ;;  %v447_v24 = vshll.u32 %v7078_v17, 16  ;;  %v7111_v28 = vld [vmem:[%s6843_s23 + $0x70] sm:$0xf] }
  0xa6   : > { %v432_v39 = vsel %vm6881_vm3, %v427_v22, %v431_v59  ;;  %v2239_v45 = vrot.slane %v2237_v37, 4  ;;  %v2245_v47 = vrot.slane %v2243_v38, 5  ;;  %v453_v48 = vshll.u32 %v7081_v23, 16  ;;  %v7096_v59 = vld [vmem:[%s6843_s23 + $0x6c] sm:$0xf] }
  0xa7   : > { %v442_v44 = vsel %vm6881_vm3, %v437_v33, %v441_v12  ;;  %v2231_v52 = vrot.slane %v2230_v40, 4  ;;  %v446_v54 = vrot.slane %v444_v42, 4  ;;  %v449_v56 = vrot.slane %v447_v24, 5  ;;  %v241_v38 = vld [vmem:[%s6843_s23 + $0x74] sm:$0x1] }
  0xa8   : > { %v5086_v51 = vcombine.low %v432_v39, %v442_v44  ;;  %v2240_v62 = vor.u32 %v2239_v45, %v2235_v34  ;;  %v455_v63 = vrot.slane %v453_v48, 5  ;;  %v457_v0 = vshrl.u32 %v7081_v23, 16  ;;  %v5336_v40 = vld [vmem:[%s6843_s23 + $0x18] sm:$0xe]  ;;  %v7134_v48 = vld [vmem:[%s6843_s23 + $0x7c] sm:$0xf] }
  0xa9   : > { %v463_v2 = vshll.u32 %v240_v41, 16  ;;  %v2236_v7 = vsel %vm6881_vm3, %v2231_v52, %v2235_v34  ;;  %v450_v9 = vor.u32 %v449_v56, %v446_v54  ;;  %v5351_v10 = vrot.slane %v5335_v50, 9  ;;  %v242_v54 = vld [vmem:[%s6843_s23 + $0x80] sm:$0x1]  ;;  %v5337_v56 = vld [vmem:[%s6843_s23 + $0x24] sm:$0xe] }
  0xaa   : > { %5779 = vmatmul.mubr.msk.bf16.gmra.mrb[12].mxu1 %vm685_vm4, %v5086_v51  ;;  %v2801_v12 = vrot.slane %v2799_v57, 4  ;;  %v2241_v16 = vrot.slane %v2240_v62, 4  ;;  %v459_v21 = vrot.slane %v457_v0, 4  ;;  %v468_v32 = vshrl.u32 %v7096_v59, 16 }
  0xab   : > { %v465_v22 = vrot.slane %v463_v2, 5  ;;  %v451_v33 = vrot.slane %v450_v9, 4  ;;  %v2800_v34 = vsel %vm7101_vm7, %v5351_v10, %v2799_v57  ;;  %v471_v39 = vshll.u32 %v7096_v59, 16 }
  0xac   : > { %v2803_v37 = vsel %vm7101_vm7, %v2801_v12, %v2802_v58  ;;  %v2246_v41 = vsel %vm6881_vm3, %v2241_v16, %v2245_v47  ;;  %v460_v42 = vor.u32 %v459_v21, %v455_v63  ;;  %v470_v14 = vrot.slane %v468_v32, 4  ;;  %v7131_v58 = vld [vmem:[%s6843_s23 + $0x78] sm:$0xf]  ;;  %v7155_v12 = vld [vmem:[%s6843_s23 + $0x84] sm:$0xf] }
  0xad   : > { %v5367_v24 = vcombine.low %v2800_v34, %v2803_v37  ;;  %v5310_v44 = vcombine.low %v2236_v7, %v2246_v41  ;;  %v456_v57 = vsel %vm6881_vm3, %v451_v33, %v455_v63  ;;  %v473_v19 = vrot.slane %v471_v39, 5 }
  0xae   : > { %v477_v45 = vshll.u32 %v7111_v28, 16  ;;  %v461_v50 = vrot.slane %v460_v42, 4  ;;  %v481_v51 = vshrl.u32 %v7111_v28, 16  ;;  %v487_v52 = vshll.u32 %v241_v38, 16  ;;  %v7165_v38 = vld [vmem:[%s6843_s23 + $0x88] sm:$0xf] }
  0xaf   : > { %v5352_v47 = vrot.slane %v5336_v40, 9  ;;  %5915 = vmatmul.mubr.msk.bf16.gmra.mrb[12].mxu0 %vm685_vm4, %v5310_v44  ;;  %v474_v62 = vor.u32 %v473_v19, %v470_v14  ;;  %v2810_v63 = vsel %vm7101_vm7, %v6917_v25, %v2809_v26  ;;  %v3367_v2 = vsel %vm734_vm0, %v6983_v31, 0  ;;  %v5338_v14 = vld [vmem:[%s6843_s23 + $0x30] sm:$0xe]  ;;  %v7169_v44 = vld [vmem:[#allocation5 + $0x1c] sm:$0xf] }
  0xb0   : > { %v479_v0 = vrot.slane %v477_v45, 5  ;;  %v466_v7 = vsel %vm6881_vm3, %v461_v50, %v465_v22  ;;  %5936 = vmatprep.mubr.msk.bf16.mxu0 %vm685_vm4, %v5367_v24  ;;  %v483_v9 = vrot.slane %v481_v51, 4  ;;  %v489_v10 = vrot.slane %v487_v52, 5  ;;  %v243_v24 = vld [vmem:[%s6843_s23 + $0x8c] sm:$0x1] }
  0xb1   : > { %v2807_v61 = vsel %vm7101_vm7, %v5352_v47, %v2806_v15  ;;  %v5087_v16 = vcombine.low %v456_v57, %v466_v7  ;;  %v475_v25 = vrot.slane %v474_v62, 4  ;;  %v492_v31 = vshrl.u32 %v7131_v58, 16 }
  0xb2   : > { %v5368_v26 = vcombine.low %v2807_v61, %v2810_v63  ;;  %v484_v21 = vor.u32 %v483_v9, %v479_v0  ;;  %v495_v22 = vshll.u32 %v7131_v58, 16  ;;  %v501_v32 = vshll.u32 %v7134_v48, 16 }
  0xb3   : > { %v505_v60 = vshrl.u32 %v7134_v48, 16  ;;  %5782 = vmatprep.mubr.msk.bf16.mxu1 %vm685_vm4, %v5087_v16  ;;  %v480_v15 = vsel %vm6881_vm3, %v475_v25, %v479_v0  ;;  %v494_v33 = vrot.slane %v492_v31, 4  ;;  %v511_v34 = vshll.u32 %v242_v54, 16 }
  0xb4   : > { %v5353_v37 = vrot.slane %v5337_v56, 9  ;;  %v485_v39 = vrot.slane %v484_v21, 4  ;;  %v497_v40 = vrot.slane %v495_v22, 5  ;;  %v503_v41 = vrot.slane %v501_v32, 5  ;;  %v7195_v32 = vld [vmem:[%s6843_s23 + $0x94] sm:$0xf] }
  0xb5   : > { %v507_v42 = vrot.slane %v505_v60, 4  ;;  %v513_v57 = vrot.slane %v511_v34, 5  ;;  %v2813_v19 = vrot.slane %v6927_v43, 5  ;;  %v2816_v45 = vrot.slane %v6933_v46, 5  ;;  %v7181_v43 = vld [vmem:[%s6843_s23 + $0x90] sm:$0xf] }
  0xb6   : > { %v516_v50 = vshrl.u32 %v7155_v12, 16  ;;  %v490_v51 = vsel %vm6881_vm3, %v485_v39, %v489_v10  ;;  %v498_v52 = vor.u32 %v497_v40, %v494_v33  ;;  %v519_v54 = vshll.u32 %v7155_v12, 16 }
  0xb7   : > { %v508_v47 = vor.u32 %v507_v42, %v503_v41  ;;  %v5088_v56 = vcombine.low %v480_v15, %v490_v51  ;;  %5937 = vmatmul.mubr.msk.bf16.vlgmr.msra.gmra.mrb[0].mxu0 %vm685_vm4, %v5368_v26  ;;  %v2814_v62 = vsel %vm7101_vm7, %v5353_v37, %v2813_v19  ;;  %v2815_v0 = vrot.slane %v2813_v19, 4  ;;  %v244_v37 = vld [vmem:[%s6843_s23 + $0x98] sm:$0x1] }
  0xb8   : > { %v518_v63 = vrot.slane %v516_v50, 4  ;;  %5969 = vmatpush3.bf16.msra.mxu0 %v3367_v2  ;;  %v499_v46 = vrot.slane %v498_v52, 4  ;;  %v521_v9 = vrot.slane %v519_v54, 5  ;;  %v525_v10 = vshll.u32 %v7165_v38, 16  ;;  %v7212_v52 = vld [vmem:[%s6843_s23 + $0x9c] sm:$0xf] }
  0xb9   : > { %v509_v7 = vrot.slane %v508_v47, 4  ;;  %5783 = vmatmul.mubr.msk.bf16.gmra.mrb[16].mxu1 %vm685_vm4, %v5088_v56  ;;  %v2817_v61 = vsel %vm7101_vm7, %v2815_v0, %v2816_v45  ;;  %v529_v16 = vshrl.u32 %v7165_v38, 16  ;;  %v535_v25 = vshll.u32 %v243_v24, 16  ;;  %6336 = vmatprep.subr.msk.bf16.mxu0 %vm734_vm0, %v7169_v44  ;;  %v5339_v45 = vld [vmem:[%s6843_s23 + $0x3c] sm:$0xe] }
  0xba   : > { %v5354_v26 = vrot.slane %v5338_v14, 9  ;;  %v504_v2 = vsel %vm6881_vm3, %v499_v46, %v503_v41  ;;  %v5369_v21 = vcombine.low %v2814_v62, %v2817_v61  ;;  %v522_v22 = vor.u32 %v521_v9, %v518_v63  ;;  %v7215_v0 = vld [vmem:[%s6843_s23 + $0xa0] sm:$0xf] }
  0xbb   : > { %v514_v31 = vsel %vm6881_vm3, %v509_v7, %v513_v57  ;;  %v527_v15 = vrot.slane %v525_v10, 5  ;;  %v531_v33 = vrot.slane %v529_v16, 4  ;;  %v537_v34 = vrot.slane %v535_v25, 5 }
  0xbc   : > { %v5089_v60 = vcombine.low %v504_v2, %v514_v31  ;;  %5940 = vmatprep.mubr.msk.bf16.mxu0 %vm685_vm4, %v5369_v21  ;;  %v523_v39 = vrot.slane %v522_v22, 4  ;;  %v2820_v40 = vrot.slane %v6950_v27, 5  ;;  %v2823_v41 = vrot.slane %v6956_v36, 5 }
  0xbd   : > { %v540_v42 = vshrl.u32 %v7181_v43, 16  ;;  %v532_v24 = vor.u32 %v531_v33, %v527_v15  ;;  %v543_v14 = vshll.u32 %v7181_v43, 16  ;;  %v549_v57 = vshll.u32 %v7195_v32, 16 }
  0xbe   : > { %5786 = vmatprep.mubr.msk.bf16.mxu1 %vm685_vm4, %v5089_v60  ;;  %v553_v19 = vshrl.u32 %v7195_v32, 16  ;;  %v528_v50 = vsel %vm6881_vm3, %v523_v39, %v527_v15  ;;  %v2821_v27 = vsel %vm7101_vm7, %v5354_v26, %v2820_v40  ;;  %v2822_v36 = vrot.slane %v2820_v40, 4  ;;  %v245_v26 = vld [vmem:[%s6843_s23 + $0xa4] sm:$0x1]  ;;  %v5340_v60 = vld [vmem:[%s6843_s23 + $0x48] sm:$0xe] }
  0xbf   : > { %v542_v51 = vrot.slane %v540_v42, 4  ;;  %v533_v47 = vrot.slane %v532_v24, 4  ;;  %v545_v54 = vrot.slane %v543_v14, 5  ;;  %v551_v56 = vrot.slane %v549_v57, 5 }
  0xc0   : > { %v555_v62 = vrot.slane %v553_v19, 4  ;;  %v2824_v63 = vsel %vm7101_vm7, %v2822_v36, %v2823_v41  ;;  %v559_v46 = vshll.u32 %v244_v37, 16  ;;  %v5355_v7 = vrot.slane %v5339_v45, 9  ;;  %v7230_v37 = vld [vmem:[%s6843_s23 + $0xa8] sm:$0xf] }
  0xc1   : > { %v2827_v9 = vrot.slane %v6973_v8, 5  ;;  %v538_v10 = vsel %vm6881_vm3, %v533_v47, %v537_v34  ;;  %v5370_v61 = vcombine.low %v2821_v27, %v2824_v63  ;;  %v546_v16 = vor.u32 %v545_v54, %v542_v51  ;;  %v7243_v19 = vld [vmem:[%s6843_s23 + $0xac] sm:$0xf]  ;;  %v246_v51 = vld [vmem:[%s6843_s23 + $0xb0] sm:$0x1] }
  0xc2   : > { %v556_v25 = vor.u32 %v555_v62, %v551_v56  ;;  %v5090_v2 = vcombine.low %v528_v50, %v538_v10  ;;  %v561_v31 = vrot.slane %v559_v46, 5  ;;  %v2830_v33 = vrot.slane %v6978_v18, 5 }
  0xc3   : > { %v2828_v21 = vsel %vm7101_vm7, %v5355_v7, %v2827_v9  ;;  %v2829_v22 = vrot.slane %v2827_v9, 4  ;;  %5941 = vmatmul.mubr.msk.bf16.gmra.mrb[4].mxu0 %vm685_vm4, %v5370_v61  ;;  %v547_v15 = vrot.slane %v546_v16, 4  ;;  %v564_v34 = vshrl.u32 %v7212_v52, 16 }
  0xc4   : > { %v557_v8 = vrot.slane %v556_v25, 4  ;;  %5787 = vmatmul.mubr.msk.bf16.gmra.mrb[20].mxu1 %vm685_vm4, %v5090_v2  ;;  %v567_v39 = vshll.u32 %v7212_v52, 16  ;;  %v573_v40 = vshll.u32 %v7215_v0, 16  ;;  %v577_v41 = vshrl.u32 %v7215_v0, 16 }
  0xc5   : > { %v583_v42 = vshll.u32 %v245_v26, 16  ;;  %v552_v24 = vsel %vm6881_vm3, %v547_v15, %v551_v56  ;;  %v2831_v14 = vsel %vm7101_vm7, %v2829_v22, %v2830_v33  ;;  %v566_v57 = vrot.slane %v564_v34, 4 }
  0xc6   : > { %v562_v18 = vsel %vm6881_vm3, %v557_v8, %v561_v31  ;;  %v5371_v50 = vcombine.low %v2828_v21, %v2831_v14  ;;  %v569_v27 = vrot.slane %v567_v39, 5  ;;  %v575_v36 = vrot.slane %v573_v40, 5  ;;  %v7262_v40 = vld [vmem:[%s6843_s23 + $0xb4] sm:$0xf]  ;;  %v7268_v14 = vld [vmem:[%s6843_s23 + $0xb8] sm:$0xf] }
  0xc7   : > { %v5091_v45 = vcombine.low %v552_v24, %v562_v18  ;;  %v579_v47 = vrot.slane %v577_v41, 4  ;;  %v585_v54 = vrot.slane %v583_v42, 5  ;;  %v5356_v62 = vrot.slane %v5340_v60, 9 }
  0xc8   : > { %v2834_v56 = vrot.slane %v7001_v3, 5  ;;  %5944 = vmatprep.mubr.msk.bf16.mxu0 %vm685_vm4, %v5371_v50  ;;  %v570_v63 = vor.u32 %v569_v27, %v566_v57  ;;  %v2837_v46 = vrot.slane %v7006_v13, 5  ;;  %v588_v7 = vshrl.u32 %v7230_v37, 16  ;;  %v5341_v3 = vld [vmem:[%s6843_s23 + $0x54] sm:$0xe] }
  0xc9   : > { %5790 = vmatprep.mubr.msk.bf16.mxu1 %vm685_vm4, %v5091_v45  ;;  %v591_v9 = vshll.u32 %v7230_v37, 16  ;;  %v580_v10 = vor.u32 %v579_v47, %v575_v36  ;;  %v597_v25 = vshll.u32 %v7243_v19, 16  ;;  %v601_v21 = vshrl.u32 %v7243_v19, 16 }
  0xca   : > { %v2835_v61 = vsel %vm7101_vm7, %v5356_v62, %v2834_v56  ;;  %v2836_v16 = vrot.slane %v2834_v56, 4  ;;  %v571_v26 = vrot.slane %v570_v63, 4  ;;  %v590_v2 = vrot.slane %v588_v7, 4 }
  0xcb   : > { %v593_v31 = vrot.slane %v591_v9, 5  ;;  %v581_v13 = vrot.slane %v580_v10, 4  ;;  %v599_v60 = vrot.slane %v597_v25, 5  ;;  %v607_v15 = vshll.u32 %v246_v51, 16 }
  0xcc   : > { %v2838_v22 = vsel %vm7101_vm7, %v2836_v16, %v2837_v46  ;;  %v576_v8 = vsel %vm6881_vm3, %v571_v26, %v575_v36  ;;  %v603_v39 = vrot.slane %v601_v21, 4  ;;  %v5357_v24 = vrot.slane %v5341_v3, 9  ;;  %v7273_v36 = vld [vmem:[%s6843_s23 + $0xbc] sm:$0x1]  ;;  %v5342_v46 = vld [vmem:[%s6843_s23 + $0x60] sm:$0xe] }
  0xcd   : > { %v5372_v33 = vcombine.low %v2835_v61, %v2838_v22  ;;  %v594_v34 = vor.u32 %v593_v31, %v590_v2  ;;  %v586_v41 = vsel %vm6881_vm3, %v581_v13, %v585_v54  ;;  %v609_v42 = vrot.slane %v607_v15, 5  ;;  %v5343_v16 = vld [vmem:[%s6843_s23 + $0x6c] sm:$0xe]  ;;  %v5280_v31 = vld [vmem:[%s6843_s23 + $0x70] sm:$0xf] }
  0xce   : > { %v2841_v18 = vrot.slane %v7031_v53, 5  ;;  %v5092_v57 = vcombine.low %v576_v8, %v586_v41  ;;  %v604_v50 = vor.u32 %v603_v39, %v599_v60  ;;  %v2844_v27 = vrot.slane %v7036_v1, 5  ;;  %v5281_v21 = vld [vmem:[%s6843_s23 + $0x74] sm:$0x1] }
  0xcf   : > { %5945 = vmatmul.mubr.msk.bf16.gmra.mrb[8].mxu0 %vm685_vm4, %v5372_v33  ;;  %v595_v45 = vrot.slane %v594_v34, 4  ;;  %v612_v54 = vshrl.u32 %v7262_v40, 16  ;;  %v615_v53 = vshll.u32 %v7262_v40, 16  ;;  %v621_v1 = vshll.u32 %v7268_v14, 16 }
  0xd0   : > { %v2842_v51 = vsel %vm7101_vm7, %v5357_v24, %v2841_v18  ;;  %v2843_v47 = vrot.slane %v2841_v18, 4  ;;  %5791 = vmatmul.mubr.msk.bf16.gmra.mrb[24].mxu1 %vm685_vm4, %v5092_v57  ;;  %v605_v56 = vrot.slane %v604_v50, 4  ;;  %v625_v63 = vshrl.u32 %v7268_v14, 16 }
  0xd1   : > { %v600_v62 = vsel %vm6881_vm3, %v595_v45, %v599_v60  ;;  %v614_v9 = vrot.slane %v612_v54, 4  ;;  %v617_v10 = vrot.slane %v615_v53, 5  ;;  %v631_v61 = vshll.u32 %v7273_v36, 16  ;;  %v6465_v54 = vld [vmem:[%s6843_s23] sm:$0xf] }
  0xd2   : > { %v2845_v7 = vsel %vm7101_vm7, %v2843_v47, %v2844_v27  ;;  %v610_v25 = vsel %vm6881_vm3, %v605_v56, %v609_v42  ;;  %v623_v26 = vrot.slane %v621_v1, 5  ;;  %v627_v2 = vrot.slane %v625_v63, 4  ;;  %v5344_v27 = vld [vmem:[%s6843_s23 + $0x78] sm:$0xe]  ;;  %v7310_v53 = vld [vmem:[%s6843_s23 + $0x4] sm:$0xf] }
  0xd3   : > { %v5373_v3 = vcombine.low %v2842_v51, %v2845_v7  ;;  %v5093_v13 = vcombine.low %v600_v62, %v610_v25  ;;  %v618_v22 = vor.u32 %v617_v10, %v614_v9  ;;  %v633_v60 = vrot.slane %v631_v61, 5  ;;  %v7314_v56 = vld [vmem:[%s6843_s23 + $0x7c] sm:$0xf]  ;;  %v7317_v1 = vld [vmem:[%s6843_s23 + $0x80] sm:$0x1] }
  0xd4   : > { %v5358_v15 = vrot.slane %v5342_v46, 9  ;;  %v628_v8 = vor.u32 %v627_v2, %v623_v26  ;;  %v2848_v33 = vrot.slane %v7064_v55, 5  ;;  %v2851_v34 = vrot.slane %v7072_v5, 5  ;;  %v5345_v63 = vld [vmem:[%s6843_s23 + $0x84] sm:$0xe] }
  0xd5   : > { %5948 = vmatprep.mubr.msk.bf16.mxu0 %vm685_vm4, %v5373_v3  ;;  %v5359_v39 = vrot.slane %v5343_v16, 9  ;;  %5794 = vmatprep.mubr.msk.bf16.mxu1 %vm685_vm4, %v5093_v13  ;;  %v619_v41 = vrot.slane %v618_v22, 4  ;;  %v2855_v42 = vrot.slane %v5280_v31, 5  ;;  %v2858_v24 = vrot.slane %v5281_v21, 5  ;;  %v5286_v10 = vld [vmem:[%s6843_s23 + $0x88] sm:$0xf] }
  0xd6   : > { %v629_v18 = vrot.slane %v628_v8, 4  ;;  %v2849_v57 = vsel %vm7101_vm7, %v5358_v15, %v2848_v33  ;;  %v2850_v45 = vrot.slane %v2848_v33, 4  ;;  %v5111_v62 = vcombine.low %v6465_v54, %v7310_v53  ;;  %v5287_v61 = vld [vmem:[%s6843_s23 + $0x8c] sm:$0x1]  ;;  %v5289_v3 = vld [vmem:[%s6843_s23 + $0x94] sm:$0xf] }
  0xd7   : > { %v624_v55 = vsel %vm6881_vm3, %v619_v41, %v623_v26  ;;  %v2856_v5 = vsel %vm7101_vm7, %v5359_v39, %v2855_v42  ;;  %v2857_v50 = vrot.slane %v2855_v42, 4  ;;  %v5360_v25 = vrot.slane %v5344_v27, 9  ;;  %v5290_v22 = vld [vmem:[%s6843_s23 + $0x98] sm:$0x1]  ;;  %v6467_v39 = vld [vmem:[%s6843_s23 + $0xc] sm:$0xf] }
  0xd8   : > { %v634_v51 = vsel %vm6881_vm3, %v629_v18, %v633_v60  ;;  %v2852_v47 = vsel %vm7101_vm7, %v2850_v45, %v2851_v34  ;;  %v2862_v26 = vrot.slane %v7314_v56, 5  ;;  %v2865_v2 = vrot.slane %v7317_v1, 5  ;;  %v5346_v60 = vld [vmem:[%s6843_s23 + $0x90] sm:$0xe]  ;;  %v5292_v34 = vld [vmem:[%s6843_s23 + $0xa0] sm:$0xf] }
  0xd9   : > { %v5094_v46 = vcombine.low %v624_v55, %v634_v51  ;;  %v5374_v7 = vcombine.low %v2849_v57, %v2852_v47  ;;  %v2859_v9 = vsel %vm7101_vm7, %v2857_v50, %v2858_v24  ;;  %v5361_v31 = vrot.slane %v5345_v63, 9  ;;  %v7338_v41 = vld [vmem:[%s6843_s23 + $0x10] sm:$0xf]  ;;  %v5293_v57 = vld [vmem:[%s6843_s23 + $0xa4] sm:$0x1] }
  0xda   : > { %v5375_v16 = vcombine.low %v2856_v5, %v2859_v9  ;;  %v2869_v21 = vrot.slane %v5286_v10, 5  ;;  %v2872_v13 = vrot.slane %v5287_v61, 5  ;;  %v2863_v15 = vsel %vm7101_vm7, %v5360_v25, %v2862_v26  ;;  %v5347_v45 = vld [vmem:[%s6843_s23 + $0x9c] sm:$0xe]  ;;  %v6469_v5 = vld [vmem:[%s6843_s23 + $0x18] sm:$0xf] }
  0xdb   : > { %5795 = vmatmul.mubr.msk.bf16.gmra.mrb[28].mxu1 %vm685_vm4, %v5094_v46  ;;  %5949 = vmatmul.mubr.msk.bf16.gmra.mrb[12].mxu0 %vm685_vm4, %v5374_v7  ;;  %v2864_v8 = vrot.slane %v2862_v26, 4  ;;  %v2876_v33 = vrot.slane %v5289_v3, 5  ;;  %v5112_v42 = vcombine.low %v6467_v39, %v7338_v41  ;;  %v7349_v50 = vld [vmem:[%s6843_s23 + $0x1c] sm:$0xf]  ;;  %v5362_v51 = vrot.slane %v5346_v60, 9 }
  0xdc   : > { %5800 = vmatprep.mubr.msk.bf16.mxu1 %vm685_vm4, %v5111_v62  ;;  %5952 = vmatprep.mubr.msk.bf16.mxu0 %vm685_vm4, %v5375_v16  ;;  %v2870_v24 = vsel %vm7101_vm7, %v5361_v31, %v2869_v21  ;;  %v2871_v18 = vrot.slane %v2869_v21, 4  ;;  %v5113_v27 = vcombine.low %v6469_v5, %v7349_v50  ;;  %v2879_v47 = vrot.slane %v5290_v22, 5  ;;  %v5295_v7 = vld [vmem:[%s6843_s23 + $0xac] sm:$0xf]  ;;  %v5298_v9 = vld [vmem:[%s6843_s23 + $0xb8] sm:$0xf] }
  0xdd   : > { %v2866_v55 = vsel %vm7101_vm7, %v2864_v8, %v2865_v2  ;;  %v2878_v63 = vrot.slane %v2876_v33, 4  ;;  %v2883_v46 = vrot.slane %v5292_v34, 5  ;;  %v1453_v10 = vsel %vm734_vm0, %v7061_v49, 0  ;;  %v7358_v26 = vld [vmem:[#allocation5 + $0xc] sm:$0xf] }
  0xde   : > { %v5376_v54 = vcombine.low %v2863_v15, %v2866_v55  ;;  %v2873_v62 = vsel %vm7101_vm7, %v2871_v18, %v2872_v13  ;;  %v5363_v16 = vrot.slane %v5347_v45, 9  ;;  %v2886_v25 = vrot.slane %v5293_v57, 5  ;;  %v5296_v31 = vld [vmem:[%s6843_s23 + $0xb0] sm:$0x1]  ;;  %v5348_v60 = vld [vmem:[%s6843_s23 + $0xa8] sm:$0xe] }
  0xdf   : > { %v5377_v61 = vcombine.low %v2870_v24, %v2873_v62  ;;  %v2885_v3 = vrot.slane %v2883_v46, 4  ;;  %v2877_v49 = vsel %vm7101_vm7, %v5362_v51, %v2876_v33  ;;  %v2880_v2 = vsel %vm7101_vm7, %v2878_v63, %v2879_v47  ;;  %v5299_v8 = vld [vmem:[%s6843_s23 + $0xbc] sm:$0x1]  ;;  %v5349_v33 = vld [vmem:[%s6843_s23 + $0xb4] sm:$0xe] }
  0xe0   : > { %v2890_v21 = vrot.slane %v5295_v7, 5  ;;  %v2884_v13 = vsel %vm7101_vm7, %v5363_v16, %v2883_v46  ;;  %v2897_v15 = vrot.slane %v5298_v9, 5  ;;  %v6471_v34 = vld [vmem:[%s6843_s23 + $0x24] sm:$0xf]  ;;  %v7380_v39 = vld [vmem:[%s6843_s23 + $0x28] sm:$0xf]  ;;  %v5378_v24 = vcombine.low %v2877_v49, %v2880_v2 }
  0xe1   : > { %v2887_v22 = vsel %vm7101_vm7, %v2885_v3, %v2886_v25  ;;  %v6473_v18 = vld [vmem:[%s6843_s23 + $0x30] sm:$0xf]  ;;  %v7385_v57 = vld [vmem:[%s6843_s23 + $0x34] sm:$0xf]  ;;  %v5301_v55 = vld [vmem:[%s6843_s23 + $0xc4] sm:$0xf] }
  0xe2   : > { %v5115_v45 = vcombine.low %v6473_v18, %v7385_v57  ;;  %v5379_v5 = vcombine.low %v2884_v13, %v2887_v22  ;;  %v2892_v51 = vrot.slane %v2890_v21, 4  ;;  %v2893_v47 = vrot.slane %v5296_v31, 5  ;;  %v5302_v16 = vld [vmem:[%s6843_s23 + $0xc8] sm:$0x1]  ;;  %v5350_v25 = vld [vmem:[%s6843_s23 + $0xc0] sm:$0xe] }
  0xe3   : > { %5801 = vmatmul.mubr.msk.bf16.vlgmr.msra.gmra.mrb[0].mxu1 %vm685_vm4, %v5112_v42  ;;  %5953 = vmatmul.mubr.msk.bf16.gmra.mrb[16].mxu0 %vm685_vm4, %v5376_v54  ;;  %v5114_v42 = vcombine.low %v6471_v34, %v7380_v39  ;;  %v5365_v54 = vrot.slane %v5349_v33, 9  ;;  %v2899_v62 = vrot.slane %v2897_v15, 4  ;;  %v2900_v63 = vrot.slane %v5299_v8, 5  ;;  %v6475_v3 = vld [vmem:[%s6843_s23 + $0x3c] sm:$0xf] }
  0xe4   : > { %5833 = vmatpush3.bf16.msra.mxu1 %v1453_v10  ;;  %5804 = vmatprep.mubr.msk.bf16.mxu1 %vm685_vm4, %v5113_v27  ;;  %v5364_v27 = vrot.slane %v5348_v60, 9  ;;  %v2894_v7 = vsel %vm7101_vm7, %v2892_v51, %v2893_v47  ;;  %v2904_v9 = vrot.slane %v5301_v55, 5  ;;  %v7405_v49 = vld [vmem:[%s6843_s23 + $0x40] sm:$0xf]  ;;  %v5366_v22 = vrot.slane %v5350_v25, 9  ;;  %v6428_v25 = vld [vmem:[%s6843_s23 + $0x24] sm:$0xff]  }
  0xe5   : > { %5956 = vmatprep.mubr.msk.bf16.mxu0 %vm685_vm4, %v5377_v61  ;;  %6331 = vmatprep.subr.msk.bf16.mxu1 %vm734_vm0, %v7358_v26  ;;  %v2898_v10 = vsel %vm7101_vm7, %v5365_v54, %v2897_v15  ;;  %v2901_v61 = vsel %vm7101_vm7, %v2899_v62, %v2900_v63  ;;  %v5116_v2 = vcombine.low %v6475_v3, %v7405_v49  ;;  %v2907_v8 = vrot.slane %v5302_v16, 5  ;;  %v1192_v51 = vld [vmem:[%s6843_s23 + $0xc] sm:$0xe]  ;;  %v7434_v47 = vld [vmem:[%s6843_s23 + $0x8] sm:$0x1] }
  0xe6   : > { %v2891_v46 = vsel %vm7101_vm7, %v5364_v27, %v2890_v21  ;;  %v5117_v21 = vcombine.low %v7009_v11, %v7017_v35  ;;  %v5381_v13 = vcombine.low %v2898_v10, %v2901_v61  ;;  %v2906_v60 = vrot.slane %v2904_v9, 4  ;;  %v1193_v63 = vld [vmem:[%s6843_s23 + $0x18] sm:$0xe]  ;;  %v1194_v61 = vld [vmem:[%s6843_s23 + $0x24] sm:$0xe] }
  0xe7   : > { %v5380_v31 = vcombine.low %v2891_v46, %v2894_v7  ;;  %v2281_v15 = vshll.u32 %v7314_v56, 16  ;;  %v2285_v33 = vshrl.u32 %v7314_v56, 16  ;;  %v2905_v11 = vsel %vm7101_vm7, %v5366_v22, %v2904_v9  ;;  %v1195_v16 = vld [vmem:[%s6843_s23 + $0x30] sm:$0xe] }
  0xe8   : > { %v2908_v35 = vsel %vm7101_vm7, %v2906_v60, %v2907_v8  ;;  %v5119_v18 = vcombine.low %v7078_v17, %v7081_v23  ;;  %v1251_v27 = vrot.slane %v7338_v41, 5  ;;  %v1191_v23 = vld [vmem:[%s6843_s23] sm:$0xe]  ;;  %v5120_v54 = vcombine.low %v7096_v59, %v7111_v28 }
  0xe9   : > { %v7420_v34 = vrot.slane %v2281_v15, 5  ;;  %v2287_v56 = vrot.slane %v2285_v33, 4  ;;  %v1244_v62 = vrot.slane %v7310_v53, 5  ;;  %v4093_v46 = vsel %vm734_vm0, %v7169_v44, 0  ;;  %v1196_v44 = vld [vmem:[%s6843_s23 + $0x3c] sm:$0xe] }
  0xea   : > { %v5144_v7 = vrot.slane %v1192_v51, 9  ;;  %v1253_v9 = vrot.slane %v1251_v27, 4  ;;  %v1258_v10 = vrot.slane %v7349_v50, 5  ;;  %v5121_v3 = vcombine.low %v7131_v58, %v7134_v48  ;;  %v6430_v53 = vld [vmem:[%s6843_s23 + $0x30] sm:$0xff]   ;;  %v6479_v33 = vld [vmem:[%s6843_s23 + $0x20] sm:$0x1] }
  0xeb   : > { %5805 = vmatmul.mubr.msk.bf16.gmra.mrb[4].mxu1 %vm685_vm4, %v5114_v42  ;;  %5957 = vmatmul.mubr.msk.bf16.gmra.mrb[20].mxu0 %vm685_vm4, %v5378_v24  ;;  %8677 = vst [vmem:[#allocation12_spill] sm:$0xff] %v7420_v34  ;;  %v5118_v42 = vcombine.low %v7042_v20, %v7048_v29  ;;  %v5382_v24 = vcombine.low %v2905_v11, %v2908_v35  ;;  %v1247_v20 = vrot.slane %v7434_v47, 5  ;;  %v6478_v29 = vld [vmem:[%s6843_s23 + $0x14] sm:$0x1]  ;;  %v1265_v28 = vrot.slane %v7380_v39, 5 }
  0xec   : > { %5808 = vmatprep.mubr.msk.bf16.mxu1 %vm685_vm4, %v5115_v45  ;;  %5960 = vmatprep.mubr.msk.bf16.mxu0 %vm685_vm4, %v5379_v5  ;;  %v6426_v45 = vld [vmem:[%s6843_s23 + $0x18] sm:$0xff]   ;;  %v2288_v55 = vor.u32 %v2287_v56, %v7420_v34  ;;  %v2291_v5 = vshll.u32 %v7317_v1, 16  ;;  %v1254_v17 = vrot.slane %v6478_v29, 5  ;;  %v5123_v59 = vcombine.low %v7181_v43, %v7195_v32  ;;  %v6480_v56 = vld [vmem:[%s6843_s23 + $0x2c] sm:$0x1] }
  0xed   : > { %v7467_v58 = vld [vmem:[#allocation5 + $0x20] sm:$0xf]  ;;  %v1246_v60 = vrot.slane %v1244_v62, 4  ;;  %v1279_v39 = vrot.slane %v7405_v49, 5  ;;  %v7476_v8 = vsel %vm7101_vm7, %v5144_v7, %v1251_v27  ;;  %v1261_v11 = vrot.slane %v6479_v33, 5 }
  0xee   : > { %v7441_v1 = vrot.slane %v2288_v55, 4  ;;  %v7443_v41 = vrot.slane %v2291_v5, 5  ;;  %v7480_v15 = vsel %vm7101_vm7, %v1253_v9, %v1254_v17  ;;  %v5146_v49 = vrot.slane %v1194_v61, 9  ;;  %v1197_v27 = vld [vmem:[%s6843_s23 + $0x48] sm:$0xe]  ;;  %v6432_v17 = vld [vmem:[%s6843_s23 + $0x3c] sm:$0xff]  }
  0xef   : > { %v1267_v35 = vrot.slane %v1265_v28, 4  ;;  %v5148_v5 = vrot.slane %v1196_v44, 9  ;;  %v6482_v51 = vld [vmem:[%s6843_s23 + $0x4c] sm:$0xf]  ;;  %v7507_v9 = vsel %vm7101_vm7, %v1246_v60, %v1247_v20  ;;  %v5149_v44 = vrot.slane %v1197_v27, 9 }
  0xf0   : > { %8678 = vst [vmem:[#allocation13_spill] sm:$0xff] %v7441_v1  ;;  %8679 = vst [vmem:[#allocation14_spill] sm:$0xff] %v7443_v41  ;;  %v1286_v29 = vrot.slane %v6482_v51, 5  ;;  %v7524_v47 = vsel %vm7101_vm7, %v5146_v49, %v1265_v28  ;;  %v6484_v60 = vld [vmem:[%s6843_s23 + $0x50] sm:$0x1] }
  0xf1   : > { %v6486_v51 = vld [vmem:[%s6843_s23 + $0x5c] sm:$0x1]  ;;  %v5465_v43 = vld [vmem:[%s6843_s23 + $0x20] sm:$0x1]  ;;  %v5467_v32 = vld [vmem:[%s6843_s23 + $0x28] sm:$0xf] }
  0xf2   : > { %v1288_v28 = vrot.slane %v1286_v29, 4  ;;  %v7784_v34 = vld [vmem:[%s6843_s23 + $0x64] sm:$0xf] }
  0xf3   : > { %5809 = vmatmul.mubr.msk.bf16.gmra.mrb[8].mxu1 %vm685_vm4, %v5116_v2  ;;  %5961 = vmatmul.mubr.msk.bf16.gmra.mrb[24].mxu0 %vm685_vm4, %v5380_v31  ;;  %v5122_v2 = vcombine.low %v7155_v12, %v7165_v38  ;;  %v5143_v31 = vrot.slane %v1191_v23, 9  ;;  %v5466_v12 = vld [vmem:[%s6843_s23 + $0x24] sm:$0xf]  ;;  %8692 = vst [vmem:[#allocation21_spill] sm:$0xff] %v7784_v34 }
  0xf4   : > { %5812 = vmatprep.mubr.msk.bf16.mxu1 %vm685_vm4, %v5117_v21  ;;  %5964 = vmatprep.mubr.msk.bf16.mxu0 %vm685_vm4, %v5381_v13  ;;  %v5145_v21 = vrot.slane %v1193_v63, 9  ;;  %v1272_v13 = vrot.slane %v7385_v57, 5  ;;  %v1260_v57 = vrot.slane %v1258_v10, 4  ;;  %v1281_v63 = vrot.slane %v1279_v39, 4 }
  0xf5   : > { %v7494_v23 = vsel %vm7101_vm7, %v5143_v31, %v1244_v62 }
  0xf6   : > { %v7517_v61 = vsel %vm7101_vm7, %v1260_v57, %v1261_v11  ;;  %v1289_v57 = vrot.slane %v6484_v60, 5  ;;  %v3638_v60 = vshll.u32 %v5466_v12, 16 }
  0xf8   : > { %v3640_v50 = vrot.slane %v3638_v60, 5  ;;  %v7641_v60 = vld [vmem:[%s6843_s23 + $0x38] sm:$0x1] }
  0xf9   : > { %8683 = vst [vmem:[#allocation16_spill] sm:$0xff] %v7641_v60 }
  0xfb   : > { %5813 = vmatmul.mubr.msk.bf16.gmra.mrb[12].mxu1 %vm685_vm4, %v5118_v42  ;;  %5965 = vmatmul.mubr.msk.bf16.gmra.mrb[28].mxu0 %vm685_vm4, %v5382_v24  ;;  %v1268_v42 = vrot.slane %v6480_v56, 5  ;;  %v5147_v24 = vrot.slane %v1195_v16, 9  ;;  %v1198_v16 = vld [vmem:[%s6843_s23 + $0x54] sm:$0xe] }
  0xfc   : > { %5816 = vmatprep.mubr.msk.bf16.mxu1 %vm685_vm4, %v5119_v18  ;;  %5970 = vmatprep.mubr.msk.bf16.mxu0 %vm685_vm4, %v6426_v45  ;;  %v1274_v18 = vrot.slane %v1272_v13, 4  ;;  %v6481_v45 = vld [vmem:[%s6843_s23 + $0x38] sm:$0x1] }
  0xfd   : > { %v1275_v55 = vrot.slane %v6481_v45, 5  ;;  %v7528_v20 = vsel %vm7101_vm7, %v1267_v35, %v1268_v42  ;;  %v3644_v45 = vshll.u32 %v5467_v32, 16 }
  0xff   : > { %v7537_v31 = vsel %vm7101_vm7, %v1274_v18, %v1275_v55  ;;  %v7566_v55 = vsel %vm7101_vm7, %v5149_v44, %v1286_v29  ;;  %v1296_v29 = vrot.slane %v6486_v51, 5  ;;  %v1200_v51 = vld [vmem:[%s6843_s23 + $0x6c] sm:$0xe]  ;;  %v6438_v18 = vld [vmem:[%s6843_s23 + $0x60] sm:$0xff]  }
 0x103   : > { %5817 = vmatmul.mubr.msk.bf16.gmra.mrb[16].mxu1 %vm685_vm4, %v5120_v54  ;;  %5971 = vmatmul.mubr.msk.bf16.vlgmr.msra.gmra.mrb[0].mxu0 %vm685_vm4, %v6428_v25  ;;  %v7498_v54 = vsel %vm734_vm0, %v7358_v26, 0  ;;  %v7513_v26 = vsel %vm7101_vm7, %v5145_v21, %v1258_v10  ;;  %v5463_v25 = vld [vmem:[%s6843_s23 + $0x18] sm:$0xf]  ;;  %v7532_v10 = vsel %vm7101_vm7, %v5147_v24, %v1272_v13  ;;  %v7541_v21 = vsel %vm7101_vm7, %v5148_v5, %v1279_v39  ;;  %v7553_v39 = vld [vmem:[%s6843_s23 + $0x60] sm:$0xe] }
 0x104   : > { %6003 = vmatpush3.bf16.msra.mxu0 %v4093_v46  ;;  %5820 = vmatprep.mubr.msk.bf16.mxu1 %vm685_vm4, %v5121_v3  ;;  %v6483_v46 = vld [vmem:[%s6843_s23 + $0x44] sm:$0x1]  ;;  %v6434_v3 = vld [vmem:[%s6843_s23 + $0x48] sm:$0xff]   ;;  %v5150_v13 = vrot.slane %v1198_v16, 9  ;;  %v3611_v11 = vshrl.u32 %v5463_v25, 16  ;;  %v3614_v49 = vshll.u32 %v5463_v25, 16  ;;  %v8695_v4 = vcombine.low %v7532_v10, %v7537_v31 }
 0x105   : > { %5974 = vmatprep.mubr.msk.bf16.mxu0 %vm685_vm4, %v6430_v53  ;;  %v1282_v7 = vrot.slane %v6483_v46, 5  ;;  %6337 = vmatprep.subr.msk.bf16.mxu0 %vm734_vm0, %v7467_v58  ;;  %v5464_v53 = vld [vmem:[%s6843_s23 + $0x1c] sm:$0xf]  ;;  %v6485_v5 = vld [vmem:[%s6843_s23 + $0x58] sm:$0xf] }
 0x106   : > { %v3620_v42 = vshll.u32 %v5464_v53, 16  ;;  %v3624_v24 = vshrl.u32 %v5464_v53, 16  ;;  %v1293_v27 = vrot.slane %v6485_v5, 5  ;;  %v6436_v46 = vld [vmem:[%s6843_s23 + $0x54] sm:$0xff]   ;;  %v3613_v16 = vrot.slane %v3611_v11, 4 }
 0x107   : > { %v7546_v33 = vsel %vm7101_vm7, %v1281_v63, %v1282_v7  ;;  %v5151_v7 = vrot.slane %v7553_v39, 9  ;;  %v3616_v25 = vrot.slane %v3614_v49, 5  ;;  %v6489_v39 = vld [vmem:[%s6843_s23 + $0x68] sm:$0x1] }
 0x108   : > { %v7592_v44 = vrot.slane %v3620_v42, 5  ;;  %v3626_v53 = vrot.slane %v3624_v24, 4  ;;  %v1295_v5 = vrot.slane %v1293_v27, 4  ;;  %v1303_v11 = vrot.slane %v6489_v39, 5  ;;  %v6490_v39 = vld [vmem:[%s6843_s23 + $0x74] sm:$0x1] }
 0x109   : > { %v3617_v35 = vor.u32 %v3616_v25, %v3613_v16  ;;  %v3630_v42 = vshll.u32 %v5465_v43, 16  ;;  %v7606_v16 = vrot.slane %v3644_v45, 5  ;;  %v8681_v25 = vcombine.low %v7230_v37, %v7243_v19  ;;  %v7622_v45 = vld [vmem:[%s6843_s23 + $0x2c] sm:$0x1] }
 0x10a   : > { %8682 = vst [vmem:[#allocation15_spill] sm:$0xff] %v7622_v45 }
 0x10b   : > { %5821 = vmatmul.mubr.msk.bf16.gmra.mrb[20].mxu1 %vm685_vm4, %v5122_v2  ;;  %5975 = vmatmul.mubr.msk.bf16.gmra.mrb[4].mxu0 %vm685_vm4, %v6432_v17  ;;  %v7579_v2 = vsel %vm7101_vm7, %v1288_v28, %v1289_v57  ;;  %v6487_v17 = vld [vmem:[%s6843_s23 + $0x64] sm:$0xf]  ;;  %v3635_v28 = vshrl.u32 %v5466_v12, 16  ;;  %v5470_v57 = vld [vmem:[%s6843_s23 + $0x34] sm:$0xf]  ;;  %v3627_v12 = vor.u32 %v3626_v53, %v7592_v44 }
 0x10c   : > { %5824 = vmatprep.mubr.msk.bf16.mxu1 %vm685_vm4, %v5123_v59  ;;  %5978 = vmatprep.mubr.msk.bf16.mxu0 %vm685_vm4, %v6434_v3  ;;  %v1300_v63 = vrot.slane %v6487_v17, 5  ;;  %v7588_v59 = vsel %vm7101_vm7, %v5150_v13, %v1293_v27  ;;  %v5469_v3 = vld [vmem:[%s6843_s23 + $0x30] sm:$0xf]  ;;  %v3648_v13 = vshrl.u32 %v5467_v32, 16  ;;  %v3668_v22 = vshll.u32 %v5470_v57, 16 }
 0x10d   : > { %v6488_v17 = vld [vmem:[%s6843_s23 + $0x70] sm:$0xf]  ;;  %v3659_v62 = vshrl.u32 %v5469_v3, 16  ;;  %v3662_v49 = vshll.u32 %v5469_v3, 16  ;;  %v3672_v24 = vshrl.u32 %v5470_v57, 16  ;;  %v5152_v27 = vrot.slane %v1200_v51, 9 }
 0x10e   : > { %v1307_v38 = vrot.slane %v6488_v17, 5  ;;  %v1302_v56 = vrot.slane %v1300_v63, 4  ;;  %v3637_v48 = vrot.slane %v3635_v28, 4  ;;  %v8680_v32 = vcombine.low %v7212_v52, %v7215_v0  ;;  %v6491_v51 = vld [vmem:[%s6843_s23 + $0x7c] sm:$0xf] }
 0x10f   : > { %v1310_v3 = vrot.slane %v6490_v39, 5  ;;  %v3650_v43 = vrot.slane %v3648_v13, 4  ;;  %v7615_v52 = vsel %vm7101_vm7, %v1295_v5, %v1296_v29  ;;  %v7619_v0 = vsel %vm7101_vm7, %v5151_v7, %v1300_v63  ;;  %v1201_v5 = vld [vmem:[%s6843_s23 + $0x78] sm:$0xe]  ;;  %v5472_v39 = vld [vmem:[%s6843_s23 + $0x3c] sm:$0xf] }
 0x110   : > { %v1309_v17 = vrot.slane %v1307_v38, 4  ;;  %v3664_v37 = vrot.slane %v3662_v49, 5  ;;  %v7626_v19 = vsel %vm7101_vm7, %v1302_v56, %v1303_v11  ;;  %v7630_v53 = vrot.slane %v3668_v22, 5  ;;  %v6440_v56 = vld [vmem:[%s6843_s23 + $0x6c] sm:$0xff]  }
 0x111   : > { %v3674_v29 = vrot.slane %v3672_v24, 4  ;;  %v7632_v28 = vrot.slane %v3627_v12, 4  ;;  %v7634_v63 = vrot.slane %v3630_v42, 5  ;;  %v7638_v7 = vsel %vm7101_vm7, %v5152_v27, %v1307_v38  ;;  %v6441_v38 = vld [vmem:[%s6843_s23 + $0x78] sm:$0xff]   ;;  %v1202_v27 = vld [vmem:[%s6843_s23 + $0x84] sm:$0xe] }
 0x112   : > { %v3651_v22 = vor.u32 %v3650_v43, %v7606_v16  ;;  %v3654_v57 = vshll.u32 %v7622_v45, 16  ;;  %v1314_v13 = vrot.slane %v6491_v51, 5  ;;  %v3678_v12 = vshll.u32 %v7641_v60, 16  ;;  %v6493_v51 = vld [vmem:[%s6843_s23 + $0x80] sm:$0x1] }
 0x113   : > { %5825 = vmatmul.mubr.msk.bf16.gmra.mrb[24].mxu1 %vm685_vm4, %v8680_v32  ;;  %5979 = vmatmul.mubr.msk.bf16.gmra.mrb[8].mxu0 %vm685_vm4, %v6436_v46  ;;  %v3661_v46 = vrot.slane %v3659_v62, 4  ;;  %v3641_v62 = vor.u32 %v3640_v50, %v3637_v48  ;;  %v3675_v24 = vor.u32 %v3674_v29, %v7630_v53  ;;  %v6492_v32 = vld [vmem:[%s6843_s23 + $0x88] sm:$0xf]  ;;  %v6494_v43 = vld [vmem:[%s6843_s23 + $0x8c] sm:$0x1] }
 0x114   : > { %5828 = vmatprep.mubr.msk.bf16.mxu1 %vm685_vm4, %v8681_v25  ;;  %5982 = vmatprep.mubr.msk.bf16.mxu0 %vm685_vm4, %v6438_v18  ;;  %v7628_v18 = vrot.slane %v3617_v35, 4  ;;  %v7646_v35 = vsel %vm7101_vm7, %v1309_v17, %v1310_v3  ;;  %v1321_v17 = vrot.slane %v6492_v32, 5  ;;  %v3633_v3 = vsel %vm6881_vm3, %v7632_v28, %v7634_v63  ;;  %v7681_v28 = vld [vmem:[%s6843_s23 + $0x40] sm:$0xf] }
 0x115   : > { %v3665_v49 = vor.u32 %v3664_v37, %v3661_v46  ;;  %v3642_v25 = vrot.slane %v3641_v62, 4  ;;  %v8684_v46 = vcombine.low %v7262_v40, %v7268_v14  ;;  %v3652_v37 = vrot.slane %v3651_v22, 4  ;;  %8685 = vst [vmem:[#allocation17_spill] sm:$0xff] %v7681_v28 }
 0x116   : > { %v3623_v42 = vsel %vm6881_vm3, %v7628_v18, %v7592_v44  ;;  %v5153_v44 = vrot.slane %v1201_v5, 9  ;;  %v3656_v18 = vrot.slane %v3654_v57, 5  ;;  %v1316_v29 = vrot.slane %v1314_v13, 4  ;;  %v5475_v5 = vld [vmem:[%s6843_s23 + $0x48] sm:$0xf] }
 0x117   : > { %v1317_v32 = vrot.slane %v6493_v51, 5  ;;  %v8686_v63 = vcombine.low %v7494_v23, %v7507_v9  ;;  %v3666_v40 = vrot.slane %v3665_v49, 4  ;;  %v5154_v62 = vrot.slane %v1202_v27, 9  ;;  %v7700_v27 = vld [vmem:[%s6843_s23 + $0x4c] sm:$0xf] }
 0x118   : > { %v3686_v22 = vshll.u32 %v5472_v39, 16  ;;  %v3676_v57 = vrot.slane %v3675_v24, 4  ;;  %v1323_v51 = vrot.slane %v1321_v17, 4  ;;  %v1324_v11 = vrot.slane %v6494_v43, 5  ;;  %v6442_v24 = vld [vmem:[%s6843_s23 + $0x84] sm:$0xff]  }
 0x119   : > { %v3647_v23 = vsel %vm6881_vm3, %v3642_v25, %v7606_v16  ;;  %v7695_v9 = vsel %vm7101_vm7, %v5153_v44, %v1314_v13  ;;  %v3696_v49 = vshrl.u32 %v7681_v28, 16  ;;  %v3707_v43 = vshrl.u32 %v5475_v5, 16  ;;  %v7717_v44 = vld [vmem:[%s6843_s23 + $0x44] sm:$0x1] }
 0x11a   : > { %v3710_v16 = vshll.u32 %v5475_v5, 16  ;;  %v3671_v13 = vsel %vm6881_vm3, %v3666_v40, %v7630_v53  ;;  %v7714_v25 = vsel %vm7101_vm7, %v5154_v62, %v1321_v17  ;;  %8687 = vst [vmem:[#allocation18_spill] sm:$0xff] %v7717_v44  ;;  %v3688_v48 = vrot.slane %v3686_v22, 5  ;;  %v5478_v22 = vld [vmem:[%s6843_s23 + $0x54] sm:$0xf] }
 0x11b   : > { %5829 = vmatmul.mubr.msk.bf16.gmra.mrb[28].mxu1 %vm685_vm4, %v8684_v46  ;;  %5983 = vmatmul.mubr.msk.bf16.gmra.mrb[12].mxu0 %vm685_vm4, %v6440_v56  ;;  %v3683_v56 = vshrl.u32 %v5472_v39, 16  ;;  %v3680_v46 = vrot.slane %v3678_v12, 5  ;;  %v3657_v12 = vsel %vm6881_vm3, %v3652_v37, %v3656_v18  ;;  %v7707_v39 = vsel %vm7101_vm7, %v1316_v29, %v1317_v32  ;;  %v6443_v37 = vld [vmem:[%s6843_s23 + $0x90] sm:$0xff]  }
 0x11c   : > { %5834 = vmatprep.mubr.msk.bf16.mxu1 %vm685_vm4, %v8686_v63  ;;  %5986 = vmatprep.mubr.msk.bf16.mxu0 %vm685_vm4, %v6441_v38  ;;  %v3692_v38 = vshll.u32 %v7681_v28, 16  ;;  %v7724_v29 = vsel %vm7101_vm7, %v1323_v51, %v1324_v11  ;;  %v3716_v32 = vshll.u32 %v7700_v27, 16  ;;  %v3720_v53 = vshrl.u32 %v7700_v27, 16  ;;  %v1204_v11 = vld [vmem:[%s6843_s23 + $0x9c] sm:$0xe] }
 0x11d   : > { %v3685_v63 = vrot.slane %v3683_v56, 4  ;;  %v3681_v18 = vsel %vm6881_vm3, %v3676_v57, %v3680_v46  ;;  %v7728_v40 = vcombine.low %v3623_v42, %v3633_v3  ;;  %v7730_v17 = vcombine.low %v3647_v23, %v3657_v12  ;;  %v7744_v46 = vld [vmem:[%s6843_s23 + $0x58] sm:$0xf]  ;;  %v6495_v12 = vld [vmem:[#allocation5 + $0x10] sm:$0xf] }
 0x11e   : > { %v7732_v62 = vrot.slane %v3692_v38, 5  ;;  %v3698_v56 = vrot.slane %v3696_v49, 4  ;;  %v8688_v5 = vcombine.low %v7476_v8, %v7480_v15  ;;  %v3702_v42 = vshll.u32 %v7717_v44, 16  ;;  %8689 = vst [vmem:[#allocation19_spill] sm:$0xff] %v7744_v46  ;;  %v1203_v49 = vld [vmem:[%s6843_s23 + $0x90] sm:$0xe] }
 0x11f   : > { %v3709_v3 = vrot.slane %v3707_v43, 4  ;;  %v3712_v57 = vrot.slane %v3710_v16, 5  ;;  %v8690_v51 = vcombine.low %v7513_v26, %v7517_v61  ;;  %v7753_v8 = vsel %vm734_vm0, %v7467_v58, 0  ;;  %v5481_v58 = vld [vmem:[%s6843_s23 + $0x60] sm:$0xf] }
 0x120   : > { %v7755_v15 = vcombine.low %v3671_v13, %v3681_v18  ;;  %v3689_v38 = vor.u32 %v3688_v48, %v3685_v63  ;;  %v3722_v26 = vrot.slane %v3720_v53, 4  ;;  %v3731_v61 = vshrl.u32 %v5478_v22, 16  ;;  %v6496_v48 = vld [vmem:[%s6843_s23 + $0x94] sm:$0xf]  ;;  %v7768_v13 = vld [vmem:[%s6843_s23 + $0x50] sm:$0x1] }
 0x121   : > { %v3699_v43 = vor.u32 %v3698_v56, %v7732_v62  ;;  %v1328_v16 = vrot.slane %v6496_v48, 5  ;;  %8691 = vst [vmem:[#allocation20_spill] sm:$0xff] %v7768_v13  ;;  %v3740_v63 = vshll.u32 %v7744_v46, 16  ;;  %v6444_v18 = vld [vmem:[%s6843_s23 + $0x9c] sm:$0xff]   ;;  %v7774_v53 = vrot.slane %v3702_v42, 5 }
 0x122   : > { %v7777_v56 = vrot.slane %v3689_v38, 4  ;;  %v6498_v23 = vld [vmem:[%s6843_s23 + $0x98] sm:$0x1]  ;;  %v3755_v50 = vshrl.u32 %v5481_v58, 16  ;;  %v3758_v44 = vshll.u32 %v5481_v58, 16  ;;  %v3726_v60 = vshll.u32 %v7768_v13, 16 }
 0x123   : > { %5835 = vmatmul.mubr.msk.bf16.vlgmr.msra.gmra.mrb[0].mxu1 %vm685_vm4, %v8688_v5  ;;  %5987 = vmatmul.mubr.msk.bf16.gmra.mrb[16].mxu0 %vm685_vm4, %v6442_v24  ;;  %v3734_v24 = vshll.u32 %v5478_v22, 16  ;;  %v5155_v22 = vrot.slane %v1203_v49, 9  ;;  %v3713_v5 = vor.u32 %v3712_v57, %v3709_v3  ;;  %v1331_v48 = vrot.slane %v6498_v23, 5  ;;  %v7787_v49 = vld [vmem:[%s6843_s23 + $0x5c] sm:$0x1] }
 0x124   : > { %5867 = vmatpush3.bf16.msra.mxu1 %v7498_v54  ;;  %5838 = vmatprep.mubr.msk.bf16.mxu1 %vm685_vm4, %v8690_v51  ;;  %v7761_v54 = vrot.slane %v3716_v32, 5  ;;  %v6445_v32 = vld [vmem:[%s6843_s23 + $0xa8] sm:$0xff]   ;;  %v6497_v51 = vld [vmem:[%s6843_s23 + $0xa0] sm:$0xf]  ;;  %v3733_v45 = vrot.slane %v3731_v61, 4  ;;  %v3700_v3 = vrot.slane %v3699_v43, 4  ;;  %v8694_v23 = vcombine.low %v7524_v47, %v7528_v20 }
 0x125   : > { %5990 = vmatprep.mubr.msk.bf16.mxu0 %vm685_vm4, %v6443_v37  ;;  %6333 = vmatprep.subr.msk.bf16.mxu1 %vm734_vm0, %v6495_v12  ;;  %v3744_v37 = vshrl.u32 %v7744_v46, 16  ;;  %v1335_v12 = vrot.slane %v6497_v51, 5  ;;  %v3736_v42 = vrot.slane %v3734_v24, 5  ;;  %v1330_v57 = vrot.slane %v1328_v16, 4  ;;  %8693 = vst [vmem:[#allocation22_spill] sm:$0xff] %v7787_v49 }
 0x126   : > { %v3723_v28 = vor.u32 %v3722_v26, %v7761_v54  ;;  %v7789_v38 = vrot.slane %v3740_v63, 5  ;;  %v3714_v26 = vrot.slane %v3713_v5, 4  ;;  %v5156_v58 = vrot.slane %v1204_v11, 9  ;;  %v6499_v24 = vld [vmem:[%s6843_s23 + $0xa4] sm:$0x1] }
 0x127   : > { %v3746_v51 = vrot.slane %v3744_v37, 4  ;;  %v1337_v61 = vrot.slane %v1335_v12, 4  ;;  %v1338_v43 = vrot.slane %v6499_v24, 5  ;;  %v3757_v47 = vrot.slane %v3755_v50, 4  ;;  %v1205_v50 = vld [vmem:[%s6843_s23 + $0xa8] sm:$0xe] }
 0x128   : > { %v3760_v20 = vrot.slane %v3758_v44, 5  ;;  %v3764_v63 = vshll.u32 %v7784_v34, 16  ;;  %v3768_v37 = vshrl.u32 %v7784_v34, 16  ;;  %v3724_v11 = vrot.slane %v3723_v28, 4  ;;  %v6500_v44 = vld [vmem:[%s6843_s23 + $0xac] sm:$0xf] }
 0x129   : > { %v3737_v5 = vor.u32 %v3736_v42, %v3733_v45  ;;  %v7811_v10 = vsel %vm7101_vm7, %v5155_v22, %v1328_v16  ;;  %v3747_v31 = vor.u32 %v3746_v51, %v7789_v38  ;;  %v1342_v28 = vrot.slane %v6500_v44, 5  ;;  %v7832_v22 = vld [vmem:[%s6843_s23 + $0x68] sm:$0x1]  ;;  %v7966_v34 = vld [vmem:[%s6843_s23 + $0x98] sm:$0x1] }
 0x12a   : > { %v3705_v45 = vsel %vm6881_vm3, %v3700_v3, %v7774_v53  ;;  %v7829_v16 = vsel %vm7101_vm7, %v5156_v58, %v1335_v12  ;;  %8697 = vst [vmem:[#allocation24_spill] sm:$0xff] %v7832_v22  ;;  %v7837_v42 = vsel %vm7101_vm7, %v1337_v61, %v1338_v43  ;;  %v3761_v53 = vor.u32 %v3760_v20, %v3757_v47  ;;  %v1206_v58 = vld [vmem:[%s6843_s23 + $0xb4] sm:$0xe]  ;;  %v6501_v61 = vld [vmem:[%s6843_s23 + $0xb0] sm:$0x1] }
 0x12b   : > { %5839 = vmatmul.mubr.msk.bf16.gmra.mrb[4].mxu1 %vm685_vm4, %v8694_v23  ;;  %5991 = vmatmul.mubr.msk.bf16.gmra.mrb[20].mxu0 %vm685_vm4, %v6444_v18  ;;  %v3728_v18 = vrot.slane %v3726_v60, 5  ;;  %v3750_v23 = vshll.u32 %v7787_v49, 16  ;;  %v7822_v60 = vsel %vm7101_vm7, %v1330_v57, %v1331_v48  ;;  %8696 = vst [vmem:[#allocation23_spill] sm:$0xff] %v7829_v16  ;;  %8698 = vst [vmem:[#allocation25_spill] sm:$0xff] %v7837_v42  ;;  %v7839_v3 = vrot.slane %v3764_v63, 5 }
 0x12c   : > { %5842 = vmatprep.mubr.msk.bf16.mxu1 %vm685_vm4, %v8695_v4  ;;  %5994 = vmatprep.mubr.msk.bf16.mxu0 %vm685_vm4, %v6445_v32  ;;  %v3695_v4 = vsel %vm6881_vm3, %v7777_v56, %v7732_v62  ;;  %v6446_v32 = vld [vmem:[%s6843_s23 + $0xb4] sm:$0xff]   ;;  %v3719_v62 = vsel %vm6881_vm3, %v3714_v26, %v7761_v54  ;;  %v6447_v56 = vld [vmem:[%s6843_s23 + $0xc0] sm:$0xff]   ;;  %v3770_v48 = vrot.slane %v3768_v37, 4  ;;  %v5484_v57 = vld [vmem:[%s6843_s23 + $0x6c] sm:$0xf]  ;;  %v7844_v51 = vrot.slane %v3737_v5, 4 }
 0x12d   : > { %v3729_v54 = vsel %vm6881_vm3, %v3724_v11, %v3728_v18  ;;  %v7846_v26 = vrot.slane %v3750_v23, 5  ;;  %v5157_v12 = vrot.slane %v1205_v50, 9  ;;  %v7849_v24 = vrot.slane %v3747_v31, 4  ;;  %v7872_v31 = vld [vmem:[%s6843_s23 + $0x70] sm:$0xf] }
 0x12e   : > { %v1344_v44 = vrot.slane %v1342_v28, 4  ;;  %v1345_v43 = vrot.slane %v6501_v61, 5  ;;  %v3774_v47 = vshll.u32 %v7832_v22, 16  ;;  %v8699_v20 = vcombine.low %v7541_v21, %v7546_v33  ;;  %8701 = vst [vmem:[#allocation26_spill] sm:$0xff] %v7872_v31  ;;  %v6448_v50 = vld [vmem:[%s6843_s23 + $0xcc] sm:$0xff]  }
 0x12f   : > { %v7858_v63 = vcombine.low %v3695_v4, %v3705_v45  ;;  %v3779_v11 = vshrl.u32 %v5484_v57, 16  ;;  %v3782_v18 = vshll.u32 %v5484_v57, 16  ;;  %v8700_v5 = vcombine.low %v7566_v55, %v7579_v2  ;;  %v7900_v57 = vld [vmem:[%s6843_s23 + $0x7c] sm:$0xf] }
 0x130   : > { %v7867_v21 = vrot.slane %v3761_v53, 4  ;;  %v3771_v33 = vor.u32 %v3770_v48, %v7839_v3  ;;  %v5158_v23 = vrot.slane %v1206_v58, 9  ;;  %v1349_v4 = vrot.slane %v7268_v14, 5  ;;  %8702 = vst [vmem:[#allocation27_spill] sm:$0xff] %v7900_v57  ;;  %v7929_v48 = vld [vmem:[%s6843_s23 + $0x94] sm:$0xf] }
 0x131   : > { %v7885_v45 = vsel %vm7101_vm7, %v5157_v12, %v1342_v28  ;;  %v7896_v53 = vrot.slane %v3774_v47, 5  ;;  %v5490_v28 = vld [vmem:[%s6843_s23 + $0x84] sm:$0xf]  ;;  %v7905_v12 = vrot.slane %v3782_v18, 5  ;;  %v3788_v58 = vshll.u32 %v7872_v31, 16  ;;  %8705 = vst [vmem:[#allocation30_spill] sm:$0xff] %v7929_v48 }
 0x132   : > { %v3792_v61 = vshrl.u32 %v7872_v31, 16  ;;  %v7920_v47 = vsel %vm7101_vm7, %v5158_v23, %v1349_v4  ;;  %v7923_v18 = vld [vmem:[%s6843_s23 + $0x74] sm:$0x1]  ;;  %v3812_v14 = vshll.u32 %v7900_v57, 16  ;;  %v3816_v37 = vshrl.u32 %v7900_v57, 16 }
 0x133   : > { %5843 = vmatmul.mubr.msk.bf16.gmra.mrb[8].mxu1 %vm685_vm4, %v8699_v20  ;;  %5995 = vmatmul.mubr.msk.bf16.gmra.mrb[24].mxu0 %vm685_vm4, %v6446_v32  ;;  %v7875_v32 = vcombine.low %v3719_v62, %v3729_v54  ;;  %v7894_v62 = vsel %vm7101_vm7, %v1344_v44, %v1345_v43  ;;  %v7903_v54 = vrot.slane %v3779_v11, 4  ;;  %v7910_v20 = vld [vmem:[%s6843_s23 + $0x88] sm:$0xf]  ;;  %v7916_v43 = vrot.slane %v3771_v33, 4  ;;  %8704 = vst [vmem:[#allocation29_spill] sm:$0xff] %v7923_v18 }
 0x134   : > { %5846 = vmatprep.mubr.msk.bf16.mxu1 %vm685_vm4, %v8700_v5  ;;  %5998 = vmatprep.mubr.msk.bf16.mxu0 %vm685_vm4, %v6447_v56  ;;  %v5487_v56 = vld [vmem:[%s6843_s23 + $0x78] sm:$0xf]  ;;  %8703 = vst [vmem:[#allocation28_spill] sm:$0xff] %v7910_v20  ;;  %v1351_v11 = vrot.slane %v1349_v4, 4  ;;  %v5493_v5 = vld [vmem:[%s6843_s23 + $0x90] sm:$0xf]  ;;  %v8706_v4 = vcombine.low %v7588_v59, %v7615_v52 }
 0x135   : > { %v3803_v55 = vshrl.u32 %v5487_v56, 16  ;;  %v3806_v2 = vshll.u32 %v5487_v56, 16  ;;  %v3827_v44 = vshrl.u32 %v5490_v28, 16  ;;  %v3830_v33 = vshll.u32 %v5490_v28, 16  ;;  %v5496_v31 = vld [vmem:[%s6843_s23 + $0x9c] sm:$0xf] }
 0x136   : > { %v3836_v1 = vshll.u32 %v7910_v20, 16  ;;  %v3840_v23 = vshrl.u32 %v7910_v20, 16  ;;  %v3785_v56 = vor.u32 %v7905_v12, %v7903_v54  ;;  %v7940_v41 = vrot.slane %v3788_v58, 5  ;;  %v7953_v12 = vld [vmem:[%s6843_s23 + $0xa0] sm:$0xf] }
 0x137   : > { %v3794_v28 = vrot.slane %v3792_v61, 4  ;;  %v3798_v57 = vshll.u32 %v7923_v18, 16  ;;  %v8707_v20 = vcombine.low %v7619_v0, %v7626_v19  ;;  %v3851_v59 = vshrl.u32 %v5493_v5, 16  ;;  %8708 = vst [vmem:[#allocation31_spill] sm:$0xff] %v7953_v12  ;;  %v7956_v58 = vld [vmem:[%s6843_s23 + $0x80] sm:$0x1] }
 0x138   : > { %v3854_v52 = vshll.u32 %v5493_v5, 16  ;;  %v3864_v54 = vshrl.u32 %v7929_v48, 16  ;;  %v3805_v61 = vrot.slane %v3803_v55, 4  ;;  %v7958_v18 = vrot.slane %v3812_v14, 5  ;;  %v7961_v19 = vld [vmem:[%s6843_s23 + $0x8c] sm:$0x1] }
 0x139   : > { %v3818_v0 = vrot.slane %v3816_v37, 4  ;;  %v7963_v22 = vrot.slane %v3836_v1, 5  ;;  %v3842_v5 = vrot.slane %v3840_v23, 4  ;;  %v3875_v49 = vshrl.u32 %v5496_v31, 16 }
 0x13a   : > { %v3884_v42 = vshll.u32 %v7953_v12, 16  ;;  %v3888_v16 = vshrl.u32 %v7953_v12, 16  ;;  %v3853_v55 = vrot.slane %v3851_v59, 4  ;;  %v3866_v37 = vrot.slane %v3864_v54, 4 }
 0x13b   : > { %5847 = vmatmul.mubr.msk.bf16.gmra.mrb[12].mxu1 %vm685_vm4, %v8706_v4  ;;  %5999 = vmatmul.mubr.msk.bf16.gmra.mrb[28].mxu0 %vm685_vm4, %v6448_v50  ;;  %v3860_v50 = vshll.u32 %v7929_v48, 16  ;;  %v3808_v4 = vrot.slane %v3806_v2, 5  ;;  %v3878_v48 = vshll.u32 %v5496_v31, 16  ;;  %v3856_v2 = vrot.slane %v3854_v52, 5 }
 0x13c   : > { %5850 = vmatprep.mubr.msk.bf16.mxu1 %vm685_vm4, %v8707_v20  ;;  %6004 = vmatprep.mubr.msk.bf16.mxu0 %vm685_vm4, %v7728_v40  ;;  %v3829_v20 = vrot.slane %v3827_v44, 4  ;;  %v3832_v40 = vrot.slane %v3830_v33, 5  ;;  %v3795_v46 = vor.u32 %v3794_v28, %v7940_v41  ;;  %v3819_v1 = vor.u32 %v3818_v0, %v7958_v18 }
 0x13d   : > { %v7970_v14 = vrot.slane %v3860_v50, 5  ;;  %v3809_v44 = vor.u32 %v3808_v4, %v3805_v61  ;;  %v3822_v33 = vshll.u32 %v7956_v58, 16  ;;  %v3843_v31 = vor.u32 %v3842_v5, %v7963_v22  ;;  %v5499_v4 = vld [vmem:[%s6843_s23 + $0xa8] sm:$0xf] }
 0x13e   : > { %v3833_v23 = vor.u32 %v3832_v40, %v3829_v20  ;;  %v3846_v13 = vshll.u32 %v7961_v19, 16  ;;  %v3870_v12 = vshll.u32 %v7966_v34, 16  ;;  %v8709_v59 = vcombine.low %v7638_v7, %v7646_v35 }
 0x13f   : > { %v3877_v28 = vrot.slane %v3875_v49, 4  ;;  %v3880_v52 = vrot.slane %v3878_v48, 5  ;;  %v7984_v50 = vrot.slane %v3884_v42, 5  ;;  %v3890_v54 = vrot.slane %v3888_v16, 4  ;;  %v7999_v42 = vld [vmem:[%s6843_s23 + $0xa4] sm:$0x1] }
 0x140   : > { %v8710_v61 = vcombine.low %v7695_v9, %v7707_v39  ;;  %v8711_v7 = vrot.slane %v7273_v36, 5  ;;  %v3857_v49 = vor.u32 %v3856_v2, %v3853_v55  ;;  %v3867_v48 = vor.u32 %v3866_v37, %v7970_v14  ;;  %v8007_v2 = vld [vmem:[%s6843_s23 + $0xac] sm:$0xf] }
 0x141   : > { %v3796_v9 = vrot.slane %v3795_v46, 4  ;;  %v3810_v39 = vrot.slane %v3809_v44, 4  ;;  %v3824_v16 = vrot.slane %v3822_v33, 5  ;;  %v3820_v36 = vrot.slane %v3819_v1, 4 }
 0x142   : > { %v7995_v35 = vsel %vm7101_vm7, %v1351_v11, %v8711_v7  ;;  %v3834_v0 = vrot.slane %v3833_v23, 4  ;;  %v3844_v20 = vrot.slane %v3843_v31, 4  ;;  %v3848_v11 = vrot.slane %v3846_v13, 5 }
 0x143   : > { %5851 = vmatmul.mubr.msk.bf16.gmra.mrb[16].mxu1 %vm685_vm4, %v8709_v59  ;;  %6005 = vmatmul.mubr.msk.bf16.vlgmr.msra.gmra.mrb[0].mxu0 %vm685_vm4, %v7730_v17  ;;  %v3800_v17 = vrot.slane %v3798_v57, 5  ;;  %v3872_v40 = vrot.slane %v3870_v12, 5  ;;  %v3881_v57 = vor.u32 %v3880_v52, %v3877_v28  ;;  %v3891_v5 = vor.u32 %v3890_v54, %v7984_v50 }
 0x144   : > { %6037 = vmatpush3.bf16.msra.mxu0 %v7753_v8  ;;  %5854 = vmatprep.mubr.msk.bf16.mxu1 %vm685_vm4, %v8710_v61  ;;  %v3786_v8 = vrot.slane %v3785_v56, 4  ;;  %v3894_v55 = vshll.u32 %v7999_v42, 16  ;;  %v3858_v37 = vrot.slane %v3857_v49, 4  ;;  %v3868_v59 = vrot.slane %v3867_v48, 4 }
 0x145   : > { %6008 = vmatprep.mubr.msk.bf16.mxu0 %vm685_vm4, %v7755_v15  ;;  %v3899_v15 = vshrl.u32 %v5499_v4, 16  ;;  %v3902_v56 = vshll.u32 %v5499_v4, 16  ;;  %v3777_v46 = vsel %vm6881_vm3, %v7916_v43, %v7896_v53  ;;  %v3801_v12 = vsel %vm6881_vm3, %v3796_v9, %v3800_v17  ;;  %v5548_v9 = vld [vmem:[%s6843_s23 + $0x54] sm:$0xe] }
 0x146   : > { %v3791_v13 = vsel %vm6881_vm3, %v3786_v8, %v7940_v41  ;;  %v3815_v44 = vsel %vm6881_vm3, %v3810_v39, %v7958_v18  ;;  %v3825_v1 = vsel %vm6881_vm3, %v3820_v36, %v3824_v16  ;;  %v3839_v33 = vsel %vm6881_vm3, %v3834_v0, %v7963_v22 }
 0x147   : > { %v3908_v53 = vshll.u32 %v8007_v2, 16  ;;  %v3912_v43 = vshrl.u32 %v8007_v2, 16  ;;  %v8712_v41 = vcombine.low %v7714_v25, %v7724_v29  ;;  %v3849_v18 = vsel %vm6881_vm3, %v3844_v20, %v3848_v11 }
 0x148   : > { %v3882_v23 = vrot.slane %v3881_v57, 4  ;;  %v3892_v31 = vrot.slane %v3891_v5, 4  ;;  %v3896_v22 = vrot.slane %v3894_v55, 5  ;;  %v8713_v28 = vcombine.low %v7811_v10, %v7822_v60 }
 0x149   : > { %v3863_v25 = vsel %vm6881_vm3, %v3858_v37, %v7970_v14  ;;  %v3873_v29 = vsel %vm6881_vm3, %v3868_v59, %v3872_v40  ;;  %v8049_v52 = vrot.slane %v3902_v56, 5  ;;  %v8714_v10 = vsel %vm6881_vm3, %v7849_v24, %v7846_v26  ;;  %v8071_v26 = vld [vmem:[%s6843_s23 + $0xb0] sm:$0x1]  ;;  %v5502_v24 = vld [vmem:[%s6843_s23 + $0xb4] sm:$0xf]  ;;  %v8717_v40 = vld [vmem:[#allocation20_spill] sm:$0xff] }
 0x14a   : > { %v8715_v60 = vsel %vm6881_vm3, %v7844_v51, %v7789_v38  ;;  %v5173_v14 = vcombine.low %v7885_v45, %v7894_v62  ;;  %v8716_v54 = vsel %vm6881_vm3, %v7867_v21, %v7839_v3  ;;  %v5174_v7 = vcombine.low %v7920_v47, %v7995_v35  ;;  %v8081_v45 = vld [vmem:[%s6843_s23 + $0xb8] sm:$0xf]  ;;  %v5547_v62 = vld [vmem:[%s6843_s23 + $0x48] sm:$0xe]  ;;  %v5550_v56 = vld [vmem:[%s6843_s23 + $0x6c] sm:$0xe] }
 0x14b   : > { %5855 = vmatmul.mubr.msk.bf16.gmra.mrb[20].mxu1 %vm685_vm4, %v8712_v41  ;;  %6009 = vmatmul.mubr.msk.bf16.gmra.mrb[4].mxu0 %vm685_vm4, %v7858_v63  ;;  %v8047_v63 = vrot.slane %v3899_v15, 4  ;;  %v5517_v61 = vcombine.low %v8716_v54, %v3777_v46  ;;  %v8074_v17 = vcombine.low %v3791_v13, %v3801_v12  ;;  %v8076_v38 = vcombine.low %v3815_v44, %v3825_v1  ;;  %v8718_v59 = vld [vmem:[#allocation19_spill] sm:$0xff]  ;;  %v8720_v13 = vld [vmem:[#allocation25_spill] sm:$0xff] }
 0x14c   : > { %5858 = vmatprep.mubr.msk.bf16.mxu1 %vm685_vm4, %v8713_v28  ;;  %6012 = vmatprep.mubr.msk.bf16.mxu0 %vm685_vm4, %v7875_v32  ;;  %v5516_v32 = vcombine.low %v8715_v60, %v8714_v10  ;;  %v8078_v51 = vrot.slane %v3908_v53, 5  ;;  %v3914_v49 = vrot.slane %v3912_v43, 4  ;;  %v8084_v48 = vcombine.low %v3839_v33, %v3849_v18  ;;  %v8719_v46 = vld [vmem:[#allocation23_spill] sm:$0xff]  ;;  %v8722_v33 = vld [vmem:[#allocation22_spill] sm:$0xff] }
 0x14d   : > { %v8086_v3 = vcombine.low %v3863_v25, %v3873_v29  ;;  %v3887_v21 = vsel %vm6881_vm3, %v3882_v23, %v7984_v50  ;;  %v3897_v8 = vsel %vm6881_vm3, %v3892_v31, %v3896_v22  ;;  %v3905_v39 = vor.u32 %v8049_v52, %v8047_v63  ;;  %v5549_v50 = vld [vmem:[%s6843_s23 + $0x60] sm:$0xe]  ;;  %v8723_v23 = vld [vmem:[#allocation21_spill] sm:$0xff]  ;;  %v8725_v52 = vld [vmem:[#allocation26_spill] sm:$0xff] }
 0x14e   : > { %v3918_v16 = vshll.u32 %v8071_v26, 16  ;;  %v3923_v4 = vshrl.u32 %v5502_v24, 16  ;;  %v3926_v36 = vshll.u32 %v5502_v24, 16  ;;  %v3932_v0 = vshll.u32 %v8081_v45, 16  ;;  %v5505_v22 = vld [vmem:[%s6843_s23 + $0xc0] sm:$0xf] }
 0x14f   : > { %v5563_v20 = vrot.slane %v5547_v62, 9  ;;  %v4382_v11 = vrot.slane %v7700_v27, 5  ;;  %v4385_v57 = vrot.slane %v8717_v40, 5  ;;  %v8101_v5 = vcombine.low %v3887_v21, %v3897_v8  ;;  %v8724_v25 = vld [vmem:[#allocation24_spill] sm:$0xff]  ;;  %v8726_v21 = vld [vmem:[#allocation29_spill] sm:$0xff] }
 0x150   : > { %v3915_v55 = vor.u32 %v3914_v49, %v8078_v51  ;;  %v5564_v37 = vrot.slane %v5548_v9, 9  ;;  %v4389_v15 = vrot.slane %v8718_v59, 5  ;;  %v8721_v12 = vcombine.low %v8719_v46, %v8720_v13  ;;  %v6449_v9 = vld [vmem:[%s6843_s23 + $0xc] sm:$0xff]   ;;  %v8193_v47 = vld [vmem:[%s6843_s23 + $0xbc] sm:$0x1] }
 0x151   : > { %v3936_v27 = vshrl.u32 %v8081_v45, 16  ;;  %v8114_v44 = vsel %vm7101_vm7, %v5563_v20, %v4382_v11  ;;  %v4384_v1 = vrot.slane %v4382_v11, 4  ;;  %v4392_v53 = vrot.slane %v8722_v33, 5  ;;  %v5552_v33 = vld [vmem:[%s6843_s23 + $0x84] sm:$0xe] }
 0x152   : > { %v8121_v43 = vsel %vm7101_vm7, %v5564_v37, %v4389_v15  ;;  %v4391_v41 = vrot.slane %v4389_v15, 4  ;;  %v5565_v18 = vrot.slane %v5549_v50, 9  ;;  %v4396_v31 = vrot.slane %v8723_v23, 5  ;;  %v5551_v50 = vld [vmem:[%s6843_s23 + $0x78] sm:$0xe] }
 0x153   : > { %5859 = vmatmul.mubr.msk.bf16.gmra.mrb[24].mxu1 %vm685_vm4, %v8721_v12  ;;  %6013 = vmatmul.mubr.msk.bf16.gmra.mrb[8].mxu0 %vm685_vm4, %v5516_v32  ;;  %v8127_v28 = vsel %vm7101_vm7, %v4384_v1, %v4385_v57  ;;  %v4399_v29 = vrot.slane %v8724_v25, 5  ;;  %v5566_v63 = vrot.slane %v5550_v56, 9  ;;  %v4403_v10 = vrot.slane %v8725_v52, 5  ;;  %v8727_v1 = vld [vmem:[#allocation27_spill] sm:$0xff]  ;;  %v8728_v23 = vld [vmem:[#allocation14_spill] sm:$0xff] }
 0x154   : > { %5862 = vmatprep.mubr.msk.bf16.mxu1 %vm685_vm4, %v5173_v14  ;;  %6016 = vmatprep.mubr.msk.bf16.mxu0 %vm685_vm4, %v5517_v61  ;;  %v5579_v60 = vcombine.low %v8114_v44, %v8127_v28  ;;  %v8135_v32 = vsel %vm7101_vm7, %v4391_v41, %v4392_v53  ;;  %v8139_v14 = vsel %vm7101_vm7, %v5565_v18, %v4396_v31  ;;  %v4398_v54 = vrot.slane %v4396_v31, 4  ;;  %v8142_v61 = vld [vmem:[%s6843_s23 + $0xc4] sm:$0xf]  ;;  %v8729_v31 = vld [vmem:[#allocation13_spill] sm:$0xff] }
 0x155   : > { %v5580_v24 = vcombine.low %v8121_v43, %v8135_v32  ;;  %v8148_v49 = vsel %vm7101_vm7, %v5566_v63, %v4403_v10  ;;  %v4405_v62 = vrot.slane %v4403_v10, 4  ;;  %v4406_v8 = vrot.slane %v8726_v21, 5  ;;  %v6450_v63 = vld [vmem:[%s6843_s23 + $0x18] sm:$0xff]  }
 0x156   : > { %v8152_v20 = vrot.slane %v3918_v16, 5  ;;  %v8154_v11 = vrot.slane %v3923_v4, 4  ;;  %v3947_v40 = vshrl.u32 %v5505_v22, 16  ;;  %v8158_v57 = vsel %vm7101_vm7, %v4398_v54, %v4399_v29  ;;  %v5282_v4 = vld [vmem:[%s6843_s23 + $0x78] sm:$0xf]  ;;  %v8730_v54 = vld [vmem:[#allocation28_spill] sm:$0xff] }
 0x157   : > { %v8161_v37 = vrot.slane %v3905_v39, 4  ;;  %v8163_v59 = vrot.slane %v3926_v36, 5  ;;  %v5581_v15 = vcombine.low %v8139_v14, %v8158_v57  ;;  %v8169_v16 = vsel %vm7101_vm7, %v4405_v62, %v4406_v8  ;;  %v6451_v8 = vld [vmem:[%s6843_s23 + $0x24] sm:$0xff]  }
 0x158   : > { %v8172_v56 = vrot.slane %v3915_v55, 4  ;;  %v8174_v46 = vrot.slane %v3932_v0, 5  ;;  %v3950_v13 = vshll.u32 %v5505_v22, 16  ;;  %v5582_v39 = vcombine.low %v8148_v49, %v8169_v16  ;;  %v5294_v57 = vld [vmem:[%s6843_s23 + $0xa8] sm:$0xf] }
 0x159   : > { %v8184_v36 = vrot.slane %v3936_v27, 4  ;;  %v3956_v12 = vshll.u32 %v8142_v61, 16  ;;  %v5567_v55 = vrot.slane %v5551_v50, 9  ;;  %v4410_v0 = vrot.slane %v8727_v1, 5  ;;  %v5508_v50 = vld [vmem:[%s6843_s23 + $0xcc] sm:$0xf] }
 0x15a   : > { %v3949_v35 = vrot.slane %v3947_v40, 4  ;;  %v2275_v27 = vshll.u32 %v5282_v4, 16  ;;  %v3960_v53 = vshrl.u32 %v8142_v61, 16  ;;  %v3952_v22 = vrot.slane %v3950_v13, 5 }
 0x15b   : > { %5863 = vmatmul.mubr.msk.bf16.gmra.mrb[28].mxu1 %vm685_vm4, %v5174_v7  ;;  %6017 = vmatmul.mubr.msk.bf16.gmra.mrb[12].mxu0 %vm685_vm4, %v8074_v17  ;;  %v4413_v7 = vrot.slane %v7956_v58, 5  ;;  %v2272_v17 = vshrl.u32 %v5282_v4, 16  ;;  %v8199_v41 = vsel %vm7101_vm7, %v5567_v55, %v4410_v0  ;;  %v4412_v18 = vrot.slane %v4410_v0, 4  ;;  %v8222_v4 = vld [vmem:[%s6843_s23 + $0xd0] sm:$0xf] }
 0x15c   : > { %5868 = vmatprep.mubr.msk.bf16.mxu1 %vm685_vm4, %v6449_v9  ;;  %6020 = vmatprep.mubr.msk.bf16.mxu0 %vm685_vm4, %v8076_v38  ;;  %v2294_v38 = vsel %vm6881_vm3, %v8729_v31, %v8728_v23  ;;  %v2277_v58 = vrot.slane %v2275_v27, 5  ;;  %v5568_v29 = vrot.slane %v5552_v33, 9  ;;  %v3942_v52 = vshll.u32 %v8193_v47, 16 }
 0x15d   : > { %v2274_v25 = vrot.slane %v2272_v17, 4  ;;  %v8209_v10 = vsel %vm7101_vm7, %v4412_v18, %v4413_v7  ;;  %v4417_v62 = vrot.slane %v8730_v54, 5  ;;  %v4420_v21 = vrot.slane %v7961_v19, 5  ;;  %v5553_v7 = vld [vmem:[%s6843_s23 + $0x90] sm:$0xe] }
 0x15e   : > { %v3911_v9 = vsel %vm6881_vm3, %v8161_v37, %v8078_v51  ;;  %v3929_v40 = vor.u32 %v8163_v59, %v8154_v11  ;;  %v5583_v13 = vcombine.low %v8199_v41, %v8209_v10  ;;  %v8226_v1 = vrot.slane %v3956_v12, 5  ;;  %v8240_v37 = vld [vmem:[%s6843_s23 + $0xc8] sm:$0x1] }
 0x15f   : > { %v2278_v55 = vor.u32 %v2277_v58, %v2274_v25  ;;  %v3962_v0 = vrot.slane %v3960_v53, 4  ;;  %v8230_v19 = vsel %vm7101_vm7, %v5568_v29, %v4417_v62  ;;  %v4419_v33 = vrot.slane %v4417_v62, 4  ;;  %v6452_v29 = vld [vmem:[%s6843_s23 + $0x30] sm:$0xff]  }
 0x160   : > { %v3921_v51 = vsel %vm6881_vm3, %v8172_v56, %v8152_v20  ;;  %v3939_v11 = vor.u32 %v8184_v36, %v8174_v46  ;;  %v3953_v59 = vor.u32 %v3952_v22, %v3949_v35  ;;  %v3971_v17 = vshrl.u32 %v5508_v50, 16  ;;  %v8731_v56 = vld [vmem:[#allocation11_spill] sm:$0xff]  ;;  %v8732_v35 = vld [vmem:[#allocation12_spill] sm:$0xff]  ;;  %v8733_v62 = vld [vmem:[#allocation30_spill] sm:$0xff] }
 0x161   : > { %v2279_v12 = vrot.slane %v2278_v55, 4  ;;  %v3974_v27 = vshll.u32 %v5508_v50, 16  ;;  %v3980_v53 = vshll.u32 %v8222_v4, 16  ;;  %v8248_v20 = vsel %vm7101_vm7, %v4419_v33, %v4420_v21 }
 0x162   : > { %v3984_v36 = vshrl.u32 %v8222_v4, 16  ;;  %v5569_v23 = vrot.slane %v5553_v7, 9  ;;  %v3944_v31 = vrot.slane %v3942_v52, 5  ;;  %v3963_v22 = vor.u32 %v3962_v0, %v8226_v1  ;;  %v8270_v52 = vld [vmem:[%s6843_s23 + $0xd4] sm:$0x1] }
 0x163   : > { %5869 = vmatmul.mubr.msk.bf16.vlgmr.msra.gmra.mrb[0].mxu1 %vm685_vm4, %v6450_v63  ;;  %6021 = vmatmul.mubr.msk.bf16.gmra.mrb[16].mxu0 %vm685_vm4, %v8084_v48  ;;  %v2284_v18 = vsel %vm6881_vm3, %v2279_v12, %v8732_v35  ;;  %v5584_v48 = vcombine.low %v8230_v19, %v8248_v20  ;;  %v3966_v25 = vshll.u32 %v8240_v37, 16  ;;  %v5523_v63 = vcombine.low %v3911_v9, %v3921_v51  ;;  %v6453_v12 = vld [vmem:[%s6843_s23 + $0x3c] sm:$0xff]   ;;  %v6517_v19 = vld [vmem:[%s6843_s23 + $0xc4] sm:$0xf] }
 0x164   : > { %6071 = vmatpush3.bf16.msra.mxu1 %v8731_v56  ;;  %5872 = vmatprep.mubr.msk.bf16.mxu1 %vm685_vm4, %v6451_v8  ;;  %v8262_v58 = vcombine.low %v2284_v18, %v2294_v38  ;;  %v3930_v54 = vrot.slane %v3929_v40, 4  ;;  %v4424_v21 = vrot.slane %v8733_v62, 5  ;;  %v4427_v8 = vrot.slane %v7966_v34, 5  ;;  %v5555_v62 = vld [vmem:[%s6843_s23 + $0xa8] sm:$0xe] }
 0x165   : > { %6024 = vmatprep.mubr.msk.bf16.mxu0 %vm685_vm4, %v8086_v3  ;;  %v3940_v50 = vrot.slane %v3939_v11, 4  ;;  %v3954_v55 = vrot.slane %v3953_v59, 4  ;;  %v3973_v33 = vrot.slane %v3971_v17, 4  ;;  %v3976_v7 = vrot.slane %v3974_v27, 5  ;;  %v5554_v3 = vld [vmem:[%s6843_s23 + $0x9c] sm:$0xe] }
 0x166   : > { %v8272_v0 = vrot.slane %v3980_v53, 5  ;;  %v3986_v56 = vrot.slane %v3984_v36, 4  ;;  %v8276_v38 = vsel %vm7101_vm7, %v5569_v23, %v4424_v21  ;;  %v4426_v9 = vrot.slane %v4424_v21, 4  ;;  %v8734_v53 = vld [vmem:[#allocation31_spill] sm:$0xff] }
 0x167   : > { %v3964_v40 = vrot.slane %v3963_v22, 4  ;;  %v3968_v51 = vrot.slane %v3966_v25, 5  ;;  %v3935_v34 = vsel %vm6881_vm3, %v3930_v54, %v8174_v46  ;;  %v5570_v59 = vrot.slane %v5554_v3, 9  ;;  %v5543_v23 = vld [vmem:[%s6843_s23 + $0x18] sm:$0xe] }
 0x168   : > { %v8283_v11 = vsel %vm7101_vm7, %v4426_v9, %v4427_v8  ;;  %v3945_v17 = vsel %vm6881_vm3, %v3940_v50, %v3944_v31  ;;  %v3990_v27 = vshll.u32 %v8270_v52, 16  ;;  %v4431_v36 = vrot.slane %v8734_v53, 5  ;;  %v6502_v25 = vld [vmem:[%s6843_s23 + $0x1c] sm:$0xf]  ;;  %v6503_v9 = vld [vmem:[%s6843_s23 + $0x20] sm:$0x1] }
 0x169   : > { %v5585_v46 = vcombine.low %v8276_v38, %v8283_v11  ;;  %v3977_v35 = vor.u32 %v3976_v7, %v3973_v33  ;;  %v3987_v18 = vor.u32 %v3986_v56, %v8272_v0  ;;  %v4434_v31 = vrot.slane %v7999_v42, 5 }
 0x16a   : > { %v3969_v22 = vsel %vm6881_vm3, %v3964_v40, %v3968_v51  ;;  %v4433_v54 = vrot.slane %v4431_v36, 4  ;;  %v5524_v21 = vcombine.low %v3935_v34, %v3945_v17  ;;  %v3992_v8 = vrot.slane %v3990_v27, 5  ;;  %v5544_v17 = vld [vmem:[%s6843_s23 + $0x24] sm:$0xe] }
 0x16b   : > { %5873 = vmatmul.mubr.msk.bf16.gmra.mrb[4].mxu1 %vm685_vm4, %v6452_v29  ;;  %6025 = vmatmul.mubr.msk.bf16.gmra.mrb[20].mxu0 %vm685_vm4, %v8101_v5  ;;  %v3959_v5 = vsel %vm6881_vm3, %v3954_v55, %v8226_v1  ;;  %v4354_v29 = vrot.slane %v6502_v25, 5  ;;  %v6454_v1 = vld [vmem:[%s6843_s23 + $0x48] sm:$0xff]   ;;  %v5559_v50 = vrot.slane %v5543_v23, 9  ;;  %v6455_v55 = vld [vmem:[%s6843_s23 + $0x54] sm:$0xff]   ;;  %v3978_v7 = vrot.slane %v3977_v35, 4 }
 0x16c   : > { %5876 = vmatprep.mubr.msk.bf16.mxu1 %vm685_vm4, %v6453_v12  ;;  %6028 = vmatprep.mubr.msk.bf16.mxu0 %vm685_vm4, %v5523_v63  ;;  %v8307_v63 = vsel %vm7101_vm7, %v5570_v59, %v4431_v36  ;;  %v8313_v42 = vsel %vm7101_vm7, %v4433_v54, %v4434_v31  ;;  %v5525_v33 = vcombine.low %v3959_v5, %v3969_v22  ;;  %v3988_v3 = vrot.slane %v3987_v18, 4  ;;  %v6504_v36 = vld [vmem:[%s6843_s23 + $0x28] sm:$0xf]  ;;  %v5556_v35 = vld [vmem:[%s6843_s23 + $0xb4] sm:$0xe] }
 0x16d   : > { %v5586_v12 = vcombine.low %v8307_v63, %v8313_v42  ;;  %v4356_v56 = vrot.slane %v4354_v29, 4  ;;  %v4357_v40 = vrot.slane %v6503_v9, 5  ;;  %v5571_v51 = vrot.slane %v5555_v62, 9  ;;  %v5545_v31 = vld [vmem:[%s6843_s23 + $0x30] sm:$0xe] }
 0x16e   : > { %v4438_v34 = vrot.slane %v8007_v2, 5  ;;  %v4441_v59 = vrot.slane %v8071_v26, 5  ;;  %v3983_v2 = vsel %vm6881_vm3, %v3978_v7, %v8272_v0  ;;  %v3993_v26 = vsel %vm6881_vm3, %v3988_v3, %v3992_v8  ;;  %v6505_v22 = vld [vmem:[%s6843_s23 + $0x34] sm:$0xf]  ;;  %v8735_v8 = vld [vmem:[#allocation15_spill] sm:$0xff] }
 0x16f   : > { %v4361_v5 = vrot.slane %v6504_v36, 5  ;;  %v4355_v18 = vsel %vm7101_vm7, %v5559_v50, %v4354_v29  ;;  %v4358_v23 = vsel %vm7101_vm7, %v4356_v56, %v4357_v40  ;;  %v4368_v25 = vrot.slane %v6505_v22, 5 }
 0x170   : > { %v8326_v27 = vsel %vm7101_vm7, %v5571_v51, %v4438_v34  ;;  %v4440_v53 = vrot.slane %v4438_v34, 4  ;;  %v5560_v0 = vrot.slane %v5544_v17, 9  ;;  %v5572_v29 = vrot.slane %v5556_v35, 9  ;;  %v8736_v51 = vld [vmem:[#allocation16_spill] sm:$0xff]  ;;  %v5546_v35 = vld [vmem:[%s6843_s23 + $0x3c] sm:$0xe] }
 0x171   : > { %v4445_v50 = vrot.slane %v8081_v45, 5  ;;  %v5575_v7 = vcombine.low %v4355_v18, %v4358_v23  ;;  %v4363_v3 = vrot.slane %v4361_v5, 4  ;;  %v5561_v56 = vrot.slane %v5545_v31, 9  ;;  %v8737_v45 = vld [vmem:[#allocation17_spill] sm:$0xff] }
 0x172   : > { %v8345_v54 = vsel %vm7101_vm7, %v4440_v53, %v4441_v59  ;;  %v4448_v9 = vrot.slane %v8193_v47, 5  ;;  %v4370_v40 = vrot.slane %v4368_v25, 4  ;;  %v4371_v34 = vrot.slane %v8736_v51, 5  ;;  %v5557_v53 = vld [vmem:[%s6843_s23 + $0xc0] sm:$0xe] }
 0x173   : > { %5877 = vmatmul.mubr.msk.bf16.gmra.mrb[8].mxu1 %vm685_vm4, %v6454_v1  ;;  %6029 = vmatmul.mubr.msk.bf16.gmra.mrb[24].mxu0 %vm685_vm4, %v5524_v21  ;;  %v5587_v62 = vcombine.low %v8326_v27, %v8345_v54  ;;  %v6456_v1 = vld [vmem:[%s6843_s23 + $0x60] sm:$0xff]   ;;  %v5526_v21 = vcombine.low %v3983_v2, %v3993_v26  ;;  %v8357_v59 = vsel %vm7101_vm7, %v5572_v29, %v4445_v50  ;;  %v4447_v17 = vrot.slane %v4445_v50, 4  ;;  %v5558_v50 = vld [vmem:[%s6843_s23 + $0xcc] sm:$0xe] }
 0x174   : > { %5880 = vmatprep.mubr.msk.bf16.mxu1 %vm685_vm4, %v6455_v55  ;;  %6032 = vmatprep.mubr.msk.bf16.mxu0 %vm685_vm4, %v5525_v33  ;;  %v4364_v55 = vrot.slane %v8735_v8, 5  ;;  %v6457_v33 = vld [vmem:[%s6843_s23 + $0x6c] sm:$0xff]   ;;  %v4375_v2 = vrot.slane %v8737_v45, 5  ;;  %v4362_v26 = vsel %vm7101_vm7, %v5560_v0, %v4361_v5  ;;  %v4369_v23 = vsel %vm7101_vm7, %v5561_v56, %v4368_v25  ;;  %v6458_v5 = vld [vmem:[%s6843_s23 + $0x78] sm:$0xff]  }
 0x175   : > { %v8365_v47 = vsel %vm7101_vm7, %v4447_v17, %v4448_v9  ;;  %v4372_v31 = vsel %vm7101_vm7, %v4370_v40, %v4371_v34  ;;  %v5573_v22 = vrot.slane %v5557_v53, 9  ;;  %v4455_v8 = vrot.slane %v8240_v37, 5  ;;  %v6506_v34 = vld [vmem:[%s6843_s23 + $0x70] sm:$0xf] }
 0x176   : > { %v4365_v36 = vsel %vm7101_vm7, %v4363_v3, %v4364_v55  ;;  %v5588_v18 = vcombine.low %v8357_v59, %v8365_v47  ;;  %v5562_v55 = vrot.slane %v5546_v35, 9  ;;  %v4377_v29 = vrot.slane %v4375_v2, 4  ;;  %v8738_v3 = vld [vmem:[#allocation18_spill] sm:$0xff] }
 0x177   : > { %v5576_v0 = vcombine.low %v4362_v26, %v4365_v36  ;;  %v4378_v9 = vrot.slane %v8738_v3, 5  ;;  %v5574_v37 = vrot.slane %v5558_v50, 9  ;;  %v2257_v17 = vshll.u32 %v6506_v34, 16 }
 0x178   : > { %v2261_v53 = vshrl.u32 %v6506_v34, 16  ;;  %v4459_v26 = vrot.slane %v8222_v4, 5  ;;  %v4376_v36 = vsel %vm7101_vm7, %v5562_v55, %v4375_v2  ;;  %v6461_v55 = vld [vmem:[%s6843_s23 + $0x9c] sm:$0xff]   ;;  %v5288_v34 = vld [vmem:[%s6843_s23 + $0x90] sm:$0xf]  ;;  %v2425_v20 = vshll.u32 %v6517_v19, 16 }
 0x179   : > { %v4379_v35 = vsel %vm7101_vm7, %v4377_v29, %v4378_v9  ;;  %v5285_v29 = vld [vmem:[%s6843_s23 + $0x84] sm:$0xf]  ;;  %v2320_v28 = vshrl.u32 %v5288_v34, 16  ;;  %v6670_v59 = vmov 0.0  }
 0x17a   : > { %v4461_v4 = vrot.slane %v4459_v26, 4  ;;  %v2296_v6 = vshrl.u32 %v5285_v29, 16  ;;  %v2299_v9 = vshll.u32 %v5285_v29, 16  ;;  %v2427_v38 = vrot.slane %v2425_v20, 5  ;;  %198 = vst [vmem:[%s8546_s19] sm:$0x3] %v6670_v59 }
 0x17b   : > { %5881 = vmatmul.mubr.msk.bf16.gmra.mrb[12].mxu1 %vm685_vm4, %v6456_v1  ;;  %6033 = vmatmul.mubr.msk.bf16.gmra.mrb[28].mxu0 %vm685_vm4, %v5526_v21  ;;  %v5279_v1 = vld [vmem:[%s6843_s23 + $0x6c] sm:$0xf]  ;;  %v4452_v21 = vrot.slane %v8142_v61, 5 }
 0x17c   : > { %5884 = vmatprep.mubr.msk.bf16.mxu1 %vm685_vm4, %v6457_v33  ;;  %6038 = vmatprep.mubr.msk.bf16.mxu0 %vm685_vm4, %v5575_v7  ;;  %v6459_v33 = vld [vmem:[%s6843_s23 + $0x84] sm:$0xff]   ;;  %v5577_v7 = vcombine.low %v4369_v23, %v4372_v31  ;;  %v2248_v40 = vshrl.u32 %v5279_v1, 16  ;;  %v2251_v51 = vshll.u32 %v5279_v1, 16  ;;  %v4462_v23 = vrot.slane %v8270_v52, 5 }
 0x17d   : > { %v8389_v25 = vsel %vm7101_vm7, %v5573_v22, %v4452_v21  ;;  %v4454_v56 = vrot.slane %v4452_v21, 4  ;;  %v8410_v1 = vsel %vm7101_vm7, %v5574_v37, %v4459_v26  ;;  %v6460_v21 = vld [vmem:[%s6843_s23 + $0x90] sm:$0xff]  }
 0x17e   : > { %v2250_v31 = vrot.slane %v2248_v40, 4  ;;  %v2253_v22 = vrot.slane %v2251_v51, 5  ;;  %v8415_v2 = vsel %vm7101_vm7, %v4461_v4, %v4462_v23  ;;  %v5291_v23 = vld [vmem:[%s6843_s23 + $0x9c] sm:$0xf] }
 0x17f   : > { %v8393_v61 = vsel %vm7101_vm7, %v4454_v56, %v4455_v8  ;;  %v5578_v8 = vcombine.low %v4376_v36, %v4379_v35  ;;  %v5590_v52 = vcombine.low %v8410_v1, %v8415_v2  ;;  %v6508_v56 = vld [vmem:[%s6843_s23 + $0x88] sm:$0xf]  ;;  %v2298_v36 = vrot.slane %v2296_v6, 4 }
 0x180   : > { %v5589_v45 = vcombine.low %v8389_v25, %v8393_v61  ;;  %v2254_v50 = vor.u32 %v2253_v22, %v2250_v31  ;;  %v2305_v40 = vshll.u32 %v6508_v56, 16  ;;  %v2309_v51 = vshrl.u32 %v6508_v56, 16  ;;  %v6463_v31 = vld [vmem:[%s6843_s23 + $0xb4] sm:$0xff]  }
 0x181   : > { %v2301_v35 = vrot.slane %v2299_v9, 5  ;;  %v2347_v29 = vshll.u32 %v5291_v23, 16 }
 0x182   : > { %v2255_v37 = vrot.slane %v2254_v50, 4  ;;  %v8434_v22 = vrot.slane %v2305_v40, 5  ;;  %v2311_v44 = vrot.slane %v2309_v51, 4 }
 0x183   : > { %5885 = vmatmul.mubr.msk.bf16.gmra.mrb[16].mxu1 %vm685_vm4, %v6458_v5  ;;  %6039 = vmatmul.mubr.msk.bf16.vlgmr.msra.gmra.mrb[0].mxu0 %vm685_vm4, %v5576_v0  ;;  %v2259_v5 = vrot.slane %v2257_v17, 5  ;;  %v2263_v0 = vrot.slane %v2261_v53, 4  ;;  %v6462_v17 = vld [vmem:[%s6843_s23 + $0xa8] sm:$0xff]   ;;  %v2302_v43 = vor.u32 %v2301_v35, %v2298_v36 }
 0x184   : > { %5888 = vmatprep.mubr.msk.bf16.mxu1 %vm685_vm4, %v6459_v33  ;;  %6042 = vmatprep.mubr.msk.bf16.mxu0 %vm685_vm4, %v5577_v7  ;;  %v6507_v7 = vld [vmem:[%s6843_s23 + $0x74] sm:$0x1]  ;;  %v2312_v32 = vor.u32 %v2311_v44, %v8434_v22 }
 0x185   : > { %v2264_v33 = vor.u32 %v2263_v0, %v2259_v5  ;;  %v2267_v3 = vshll.u32 %v6507_v7, 16  ;;  %v2260_v4 = vsel %vm6881_vm3, %v2255_v37, %v2259_v5  ;;  %v2349_v37 = vrot.slane %v2347_v29, 5  ;;  %v6514_v29 = vld [vmem:[%s6843_s23 + $0xac] sm:$0xf] }
 0x186   : > { %v2313_v36 = vrot.slane %v2312_v32, 4 }
 0x187   : > { %v2265_v53 = vrot.slane %v2264_v33, 4  ;;  %v2269_v26 = vrot.slane %v2267_v3, 5  ;;  %v6510_v33 = vld [vmem:[%s6843_s23 + $0x8c] sm:$0x1]  ;;  %v6511_v3 = vld [vmem:[%s6843_s23 + $0xa0] sm:$0xf] }
 0x188   : > { %v2315_v7 = vshll.u32 %v6510_v33, 16  ;;  %v2353_v5 = vshll.u32 %v6511_v3, 16  ;;  %v2357_v6 = vshrl.u32 %v6511_v3, 16  ;;  %v2381_v33 = vshrl.u32 %v6514_v29, 16 }
 0x189   : > { %v2270_v50 = vsel %vm6881_vm3, %v2265_v53, %v2269_v26 }
 0x18a   : > { %v2317_v53 = vrot.slane %v2315_v7, 5  ;;  %v8457_v26 = vrot.slane %v2353_v5, 5  ;;  %v2359_v14 = vrot.slane %v2357_v6, 4  ;;  %v6515_v6 = vld [vmem:[%s6843_s23 + $0xb8] sm:$0xf] }
 0x18b   : > { %5889 = vmatmul.mubr.msk.bf16.gmra.mrb[20].mxu1 %vm685_vm4, %v6460_v21  ;;  %6043 = vmatmul.mubr.msk.bf16.gmra.mrb[4].mxu0 %vm685_vm4, %v5578_v8  ;;  %v6509_v21 = vld [vmem:[%s6843_s23 + $0x94] sm:$0xf]  ;;  %v2405_v32 = vshrl.u32 %v6515_v6, 16 }
 0x18c   : > { %5892 = vmatprep.mubr.msk.bf16.mxu1 %vm685_vm4, %v6461_v55  ;;  %6046 = vmatprep.mubr.msk.bf16.mxu0 %vm685_vm4, %v5579_v60  ;;  %v2323_v60 = vshll.u32 %v5288_v34, 16  ;;  %v2329_v8 = vshll.u32 %v6509_v21, 16  ;;  %v2333_v0 = vshrl.u32 %v6509_v21, 16  ;;  %v2344_v55 = vshrl.u32 %v5291_v23, 16  ;;  %v6464_v34 = vld [vmem:[%s6843_s23 + $0xc0] sm:$0xff]  }
 0x18d   : > { %v6512_v23 = vld [vmem:[%s6843_s23 + $0x98] sm:$0x1]  ;;  %v2318_v49 = vsel %vm6881_vm3, %v2313_v36, %v2317_v53 }
 0x18e   : > { %v2325_v9 = vrot.slane %v2323_v60, 5  ;;  %v8454_v56 = vrot.slane %v2329_v8, 5  ;;  %v2335_v40 = vrot.slane %v2333_v0, 4  ;;  %v2346_v51 = vrot.slane %v2344_v55, 4  ;;  %v6513_v60 = vld [vmem:[%s6843_s23 + $0xa4] sm:$0x1] }
 0x18f   : > { %v2363_v21 = vshll.u32 %v6513_v60, 16  ;;  %v2368_v8 = vshrl.u32 %v5294_v57, 16  ;;  %v5297_v0 = vld [vmem:[%s6843_s23 + $0xb4] sm:$0xf]  ;;  %v2371_v55 = vshll.u32 %v5294_v57, 16  ;;  %v2429_v60 = vshrl.u32 %v6517_v19, 16 }
 0x190   : > { %v2336_v44 = vor.u32 %v2335_v40, %v8454_v56  ;;  %v2392_v3 = vshrl.u32 %v5297_v0, 16  ;;  %v2395_v5 = vshll.u32 %v5297_v0, 16  ;;  %v5300_v57 = vld [vmem:[%s6843_s23 + $0xc0] sm:$0xf] }
 0x191   : > { %v2365_v41 = vrot.slane %v2363_v21, 5  ;;  %v2370_v10 = vrot.slane %v2368_v8, 4  ;;  %v2373_v40 = vrot.slane %v2371_v55, 5  ;;  %v6518_v8 = vld [vmem:[%s6843_s23 + $0xbc] sm:$0x1]  ;;  %v2431_v11 = vrot.slane %v2429_v60, 4 }
 0x192   : > { %v2411_v0 = vshll.u32 %v6518_v8, 16 }
 0x193   : > { %5893 = vmatmul.mubr.msk.bf16.gmra.mrb[24].mxu1 %vm685_vm4, %v6462_v17  ;;  %6047 = vmatmul.mubr.msk.bf16.gmra.mrb[8].mxu0 %vm685_vm4, %v5580_v24  ;;  %v2322_v24 = vrot.slane %v2320_v28, 4  ;;  %v5311_v17 = vcombine.low %v2260_v4, %v2270_v50  ;;  %v2350_v28 = vor.u32 %v2349_v37, %v2346_v51  ;;  %v2360_v4 = vor.u32 %v2359_v14, %v8457_v26 }
 0x194   : > { %5896 = vmatprep.mubr.msk.bf16.mxu1 %vm685_vm4, %v6463_v31  ;;  %6050 = vmatprep.mubr.msk.bf16.mxu0 %vm685_vm4, %v5581_v15  ;;  %v2303_v15 = vrot.slane %v2302_v43, 4  ;;  %v2339_v31 = vshll.u32 %v6512_v23, 16  ;;  %v2377_v50 = vshll.u32 %v6514_v29, 16  ;;  %v2401_v43 = vshll.u32 %v6515_v6, 16 }
 0x195   : > { %v2326_v35 = vor.u32 %v2325_v9, %v2322_v24  ;;  %v2337_v24 = vrot.slane %v2336_v44, 4  ;;  %v2351_v9 = vrot.slane %v2350_v28, 4  ;;  %v2407_v14 = vrot.slane %v2405_v32, 4  ;;  %v6516_v44 = vld [vmem:[%s6843_s23 + $0xb0] sm:$0x1] }
 0x196   : > { %v2308_v7 = vsel %vm6881_vm3, %v2303_v15, %v8434_v22  ;;  %v2379_v51 = vrot.slane %v2377_v50, 5  ;;  %v2383_v22 = vrot.slane %v2381_v33, 4  ;;  %v2403_v53 = vrot.slane %v2401_v43, 5  ;;  %v6519_v32 = vld [vmem:[%s6843_s23 + $0xc8] sm:$0x1] }
 0x197   : > { %v2327_v16 = vrot.slane %v2326_v35, 4  ;;  %v5313_v37 = vcombine.low %v2308_v7, %v2318_v49  ;;  %v2356_v35 = vsel %vm6881_vm3, %v2351_v9, %v8457_v26  ;;  %v2387_v28 = vshll.u32 %v6516_v44, 16 }
 0x198   : > { %v2419_v26 = vshll.u32 %v5300_v57, 16  ;;  %v2408_v21 = vor.u32 %v2407_v14, %v2403_v53  ;;  %v2432_v43 = vor.u32 %v2431_v11, %v2427_v38 }
 0x199   : > { %v2332_v15 = vsel %vm6881_vm3, %v2327_v16, %v8454_v56  ;;  %v2374_v56 = vor.u32 %v2373_v40, %v2370_v10  ;;  %v2389_v33 = vrot.slane %v2387_v28, 5 }
 0x19a   : > { %v2421_v49 = vrot.slane %v2419_v26, 5  ;;  %v2409_v16 = vrot.slane %v2408_v21, 4  ;;  %v2433_v27 = vrot.slane %v2432_v43, 4 }
 0x19b   : > { %5897 = vmatmul.mubr.msk.bf16.gmra.mrb[28].mxu1 %vm685_vm4, %v6464_v34  ;;  %6051 = vmatmul.mubr.msk.bf16.gmra.mrb[12].mxu0 %vm685_vm4, %v5582_v39  ;;  %v2341_v39 = vrot.slane %v2339_v31, 5  ;;  %v2394_v34 = vrot.slane %v2392_v3, 4  ;;  %v2384_v31 = vor.u32 %v2383_v22, %v2379_v51  ;;  %v2375_v29 = vrot.slane %v2374_v56, 4 }
 0x19c   : > { %5918 = vmatprep.mubr.msk.bf16.mxu1 %vm685_vm4, %v5311_v17  ;;  %6054 = vmatprep.mubr.msk.bf16.mxu0 %vm685_vm4, %v5583_v13  ;;  %v2361_v13 = vrot.slane %v2360_v4, 4  ;;  %v2397_v17 = vrot.slane %v2395_v5, 5 }
 0x19d   : > { %v2342_v36 = vsel %vm6881_vm3, %v2337_v24, %v2341_v39  ;;  %v2385_v50 = vrot.slane %v2384_v31, 4  ;;  %v2413_v39 = vrot.slane %v2411_v0, 5  ;;  %v2380_v3 = vsel %vm6881_vm3, %v2375_v29, %v2379_v51 }
 0x19e   : > { %v2366_v23 = vsel %vm6881_vm3, %v2361_v13, %v2365_v41  ;;  %v5314_v4 = vcombine.low %v2332_v15, %v2342_v36  ;;  %v2435_v24 = vshll.u32 %v6519_v32, 16 }
 0x19f   : > { %v5315_v55 = vcombine.low %v2356_v35, %v2366_v23  ;;  %v2390_v5 = vsel %vm6881_vm3, %v2385_v50, %v2389_v33  ;;  %v2414_v42 = vsel %vm6881_vm3, %v2409_v16, %v2413_v39 }
 0x1a0   : > { %v2437_v54 = vrot.slane %v2435_v24, 5 }
 0x1a2   : > { %v2438_v10 = vsel %vm6881_vm3, %v2433_v27, %v2437_v54 }
 0x1a3   : > { %5919 = vmatmul.mubr.msk.bf16.vlgmr.msra.gmra.mrb[16].mxu1 %vm685_vm4, %v8262_v58  ;;  %6055 = vmatmul.mubr.msk.bf16.gmra.mrb[16].mxu0 %vm685_vm4, %v5584_v48  ;;  %v2416_v58 = vshrl.u32 %v5300_v57, 16  ;;  %v2398_v48 = vor.u32 %v2397_v17, %v2394_v34 }
 0x1a4   : > { %5922 = vmatprep.mubr.msk.bf16.mxu1 %vm685_vm4, %v5313_v37  ;;  %6058 = vmatprep.mubr.msk.bf16.mxu0 %vm685_vm4, %v5585_v46 }
 0x1a5   : > { %v2418_v7 = vrot.slane %v2416_v58, 4  ;;  %v2399_v46 = vrot.slane %v2398_v48, 4 }
 0x1a7   : > { %v2422_v6 = vor.u32 %v2421_v49, %v2418_v7  ;;  %v2404_v63 = vsel %vm6881_vm3, %v2399_v46, %v2403_v53 }
 0x1a8   : > { %v5317_v9 = vcombine.low %v2404_v63, %v2414_v42 }
 0x1a9   : > { %v2423_v41 = vrot.slane %v2422_v6, 4 }
 0x1ab   : > { %5923 = vmatmul.mubr.msk.bf16.gmra.mrb[20].mxu1 %vm685_vm4, %v5314_v4  ;;  %6059 = vmatmul.mubr.msk.bf16.gmra.mrb[20].mxu0 %vm685_vm4, %v5586_v12  ;;  %v5316_v12 = vcombine.low %v2380_v3, %v2390_v5 }
 0x1ac   : > { %5926 = vmatprep.mubr.msk.bf16.mxu1 %vm685_vm4, %v5315_v55  ;;  %6062 = vmatprep.mubr.msk.bf16.mxu0 %vm685_vm4, %v5587_v62  ;;  %v2428_v62 = vsel %vm6881_vm3, %v2423_v41, %v2427_v38 }
 0x1ad   : > { %v5318_v13 = vcombine.low %v2428_v62, %v2438_v10 }
 0x1b3   : > { %5927 = vmatmul.mubr.msk.bf16.gmra.mrb[24].mxu1 %vm685_vm4, %v5316_v12  ;;  %6063 = vmatmul.mubr.msk.bf16.gmra.mrb[24].mxu0 %vm685_vm4, %v5588_v18 }
 0x1b4   : > { %5930 = vmatprep.mubr.msk.bf16.mxu1 %vm685_vm4, %v5317_v9  ;;  %6066 = vmatprep.mubr.msk.bf16.mxu0 %vm685_vm4, %v5589_v45 }
 0x1bb   : > { %5931 = vmatmul.mubr.msk.bf16.gmra.mrb[28].mxu1 %vm685_vm4, %v5318_v13  ;;  %6067 = vmatmul.mubr.msk.bf16.gmra.mrb[28].mxu0 %vm685_vm4, %v5590_v52 }
 0x236   : > { %v5870_v47 = vpop.f32.mrb[0].mxu1 }
 0x237   : > { %v1848_v18 = vpop.f32.mrb[1].mxu1 }
 0x238   : > { %v5871_v25 = vpop.f32.mrb[2].mxu1 }
 0x239   : > { %v1851_v61 = vpop.f32.mrb[3].mxu1 }
 0x23e   : > { %v5874_v30 = vpop.f32.mrb[4].mxu1 }
 0x23f   : > { %v1864_v45 = vpop.f32.mrb[5].mxu1 }
 0x240   : > { %v5875_v40 = vpop.f32.mrb[6].mxu1 }
 0x241   : > { %v1867_v51 = vpop.f32.mrb[7].mxu1 }
 0x246   : > { %v5878_v22 = vpop.f32.mrb[8].mxu1 }
 0x247   : > { %v8549_v37 = vpop.f32.mrb[9].mxu1 }
 0x248   : > { %v8551_v1 = vpop.f32.mrb[10].mxu1 }
 0x249   : > { %v8553_v2 = vpop.f32.mrb[11].mxu1 }
 0x24e   : > { %v8555_v52 = vpop.f32.mrb[12].mxu1 }
 0x24f   : > { %v8557_v34 = vpop.f32.mrb[13].mxu1 }
 0x250   : > { %v8559_v17 = vpop.f32.mrb[14].mxu1 }
 0x251   : > { %v8561_v53 = vpop.f32.mrb[15].mxu1 }
 0x256   : > { %v6040_v14 = vpop.f32.mrb[0].mxu0 }
 0x257   : > { %v6072_v57 = vadd.f32 %v6040_v14, %v5870_v47  ;;  %v4599_v15 = vpop.f32.mrb[1].mxu0 }
 0x258   : > { %v6073_v36 = vadd.f32 %v4599_v15, %v1848_v18  ;;  %v6041_v35 = vpop.f32.mrb[2].mxu0 }
 0x259   : > { %v6074_v23 = vadd.f32 %v6041_v35, %v5871_v25  ;;  %v4602_v56 = vpop.f32.mrb[3].mxu0  ;;  %v4792_v31 = vmul.f32 0.01, %v6072_v57  ;;  %vm4760_vm9 = vcmp.ge.f32.partialorder %v6072_v57, 0.0 }
 0x25a   : > { %vm4758_vm8 = vcmp.ge.f32.partialorder %v6073_v36, 0.0  ;;  %v4790_v44 = vmul.f32 0.01, %v6073_v36  ;;  %v6075_v28 = vadd.f32 %v4602_v56, %v1851_v61 }
 0x25b   : > { %v4793_v26 = vmul.f32 0.01, %v6074_v23  ;;  %vm4761_vm11 = vcmp.ge.f32.partialorder %v6074_v23, 0.0  ;;  %v4824_v20 = vsel %vm4760_vm9, %v6072_v57, %v4792_v31 }
 0x25c   : > { %v4822_v58 = vsel %vm4758_vm8, %v6073_v36, %v4790_v44  ;;  %vm4759_vm10 = vcmp.ge.f32.partialorder %v6075_v28, 0.0  ;;  %v4791_v19 = vmul.f32 0.01, %v6075_v28  ;;  %v4893_v7 = vmul.f32 %v4824_v20, %v4824_v20 }
 0x25d   : > { %v4891_v21 = vmul.f32 %v4822_v58, %v4822_v58  ;;  %v4825_v29 = vsel %vm4761_vm11, %v6074_v23, %v4793_v26 }
 0x25e   : > { %v4823_v60 = vsel %vm4759_vm10, %v6075_v28, %v4791_v19  ;;  %v6044_v48 = vpop.f32.mrb[4].mxu0  ;;  %v4894_v3 = vmul.f32 %v4825_v29, %v4825_v29 }
 0x25f   : > { %v4854_v8 = vadd.f32 %v4823_v60, %v4822_v58  ;;  %v4892_v0 = vmul.f32 %v4823_v60, %v4823_v60  ;;  %v6076_v4 = vadd.f32 %v6044_v48, %v5874_v30  ;;  %v4615_v55 = vpop.f32.mrb[5].mxu0 }
 0x260   : > { %v6077_v50 = vadd.f32 %v4615_v55, %v1864_v45  ;;  %v6045_v33 = vpop.f32.mrb[6].mxu0 }
 0x261   : > { %v4855_v49 = vadd.f32 %v4854_v8, %v4824_v20  ;;  %v4923_v38 = vadd.f32 %v4892_v0, %v4891_v21  ;;  %v4618_v11 = vpop.f32.mrb[7].mxu0  ;;  %v6078_v16 = vadd.f32 %v6045_v33, %v5875_v40  ;;  %vm4764_vm13 = vcmp.ge.f32.partialorder %v6076_v4, 0.0 }
 0x262   : > { %vm4762_vm12 = vcmp.ge.f32.partialorder %v6077_v50, 0.0  ;;  %v4794_v46 = vmul.f32 0.01, %v6077_v50  ;;  %v6079_v39 = vadd.f32 %v4618_v11, %v1867_v51  ;;  %v4796_v43 = vmul.f32 0.01, %v6076_v4 }
 0x263   : > { %v4924_v5 = vadd.f32 %v4923_v38, %v4893_v7  ;;  %v4856_v6 = vadd.f32 %v4855_v49, %v4825_v29  ;;  %vm4765_vm14 = vcmp.ge.f32.partialorder %v6078_v16, 0.0  ;;  %v4797_v24 = vmul.f32 0.01, %v6078_v16 }
 0x264   : > { %v4826_v32 = vsel %vm4762_vm12, %v6077_v50, %v4794_v46  ;;  %vm4763_vm15 = vcmp.ge.f32.partialorder %v6079_v39, 0.0  ;;  %v4795_v9 = vmul.f32 0.01, %v6079_v39  ;;  %v4828_v10 = vsel %vm4764_vm13, %v6076_v4, %v4796_v43 }
 0x265   : > { %v4857_v63 = vadd.f32 %v4856_v6, %v4826_v32  ;;  %v4895_v42 = vmul.f32 %v4826_v32, %v4826_v32  ;;  %v4925_v12 = vadd.f32 %v4924_v5, %v4894_v3  ;;  %v4829_v13 = vsel %vm4765_vm14, %v6078_v16, %v4797_v24 }
 0x266   : > { %v6048_v41 = vpop.f32.mrb[8].mxu0  ;;  %v4827_v59 = vsel %vm4763_vm15, %v6079_v39, %v4795_v9  ;;  %v4897_v14 = vmul.f32 %v4828_v10, %v4828_v10  ;;  %v4898_v57 = vmul.f32 %v4829_v13, %v4829_v13 }
 0x267   : > { %v4926_v27 = vadd.f32 %v4925_v12, %v4895_v42  ;;  %v6080_v54 = vadd.f32 %v6048_v41, %v5878_v22  ;;  %v4631_v62 = vpop.f32.mrb[9].mxu0  ;;  %v4858_v25 = vadd.f32 %v4857_v63, %v4827_v59  ;;  %v4896_v61 = vmul.f32 %v4827_v59, %v4827_v59 }
 0x268   : > { %v6081_v47 = vadd.f32 %v4631_v62, %v8549_v37  ;;  %v6049_v18 = vpop.f32.mrb[10].mxu0 }
 0x269   : > { %v4634_v30 = vpop.f32.mrb[11].mxu0  ;;  %v6082_v40 = vadd.f32 %v6049_v18, %v8551_v1  ;;  %v4859_v15 = vadd.f32 %v4858_v25, %v4828_v10  ;;  %v4927_v22 = vadd.f32 %v4926_v27, %v4896_v61  ;;  %vm4768_vm1 = vcmp.ge.f32.partialorder %v6080_v54, 0.0 }
 0x26a   : > { %vm4766_vm0 = vcmp.ge.f32.partialorder %v6081_v47, 0.0  ;;  %v4798_v45 = vmul.f32 0.01, %v6081_v47  ;;  %v6083_v51 = vadd.f32 %v4634_v30, %v8553_v2  ;;  %v4800_v36 = vmul.f32 0.01, %v6080_v54 }
 0x26b   : > { %v4801_v23 = vmul.f32 0.01, %v6082_v40  ;;  %v4928_v56 = vadd.f32 %v4927_v22, %v4897_v14  ;;  %v4860_v37 = vadd.f32 %v4859_v15, %v4829_v13  ;;  %vm4769_vm3 = vcmp.ge.f32.partialorder %v6082_v40, 0.0 }
 0x26c   : > { %v4830_v35 = vsel %vm4766_vm0, %v6081_v47, %v4798_v45  ;;  %vm4767_vm2 = vcmp.ge.f32.partialorder %v6083_v51, 0.0  ;;  %v4799_v44 = vmul.f32 0.01, %v6083_v51  ;;  %v4832_v19 = vsel %vm4768_vm1, %v6080_v54, %v4800_v36 }
 0x26d   : > { %v4899_v31 = vmul.f32 %v4830_v35, %v4830_v35  ;;  %v4861_v58 = vadd.f32 %v4860_v37, %v4830_v35  ;;  %v4929_v26 = vadd.f32 %v4928_v56, %v4898_v57  ;;  %v4833_v8 = vsel %vm4769_vm3, %v6082_v40, %v4801_v23 }
 0x26e   : > { %v6052_v28 = vpop.f32.mrb[12].mxu0  ;;  %v4831_v20 = vsel %vm4767_vm2, %v6083_v51, %v4799_v44  ;;  %v4901_v33 = vmul.f32 %v4832_v19, %v4832_v19  ;;  %v4902_v38 = vmul.f32 %v4833_v8, %v4833_v8 }
 0x26f   : > { %v6084_v1 = vadd.f32 %v6052_v28, %v8555_v52  ;;  %v4647_v2 = vpop.f32.mrb[13].mxu0  ;;  %v4930_v21 = vadd.f32 %v4929_v26, %v4899_v31  ;;  %v4862_v0 = vadd.f32 %v4861_v58, %v4831_v20  ;;  %v4900_v4 = vmul.f32 %v4831_v20, %v4831_v20 }
 0x270   : > { %v6085_v60 = vadd.f32 %v4647_v2, %v8557_v34  ;;  %v6053_v48 = vpop.f32.mrb[14].mxu0 }
 0x271   : > { %v4650_v55 = vpop.f32.mrb[15].mxu0  ;;  %v6086_v50 = vadd.f32 %v6053_v48, %v8559_v17  ;;  %v4863_v7 = vadd.f32 %v4862_v0, %v4832_v19  ;;  %v4931_v49 = vadd.f32 %v4930_v21, %v4900_v4  ;;  %vm4772_vm5 = vcmp.ge.f32.partialorder %v6084_v1, 0.0 }
 0x272   : > { %vm4770_vm4 = vcmp.ge.f32.partialorder %v6085_v60, 0.0  ;;  %v4802_v29 = vmul.f32 0.01, %v6085_v60  ;;  %v6087_v52 = vadd.f32 %v4650_v55, %v8561_v53  ;;  %v4804_v11 = vmul.f32 0.01, %v6084_v1 }
 0x273   : > { %v4932_v34 = vadd.f32 %v4931_v49, %v4901_v33  ;;  %v4864_v16 = vadd.f32 %v4863_v7, %v4833_v8  ;;  %v4805_v3 = vmul.f32 0.01, %v6086_v50  ;;  %vm4773_vm6 = vcmp.ge.f32.partialorder %v6086_v50, 0.0 }
 0x274   : > { %v4834_v46 = vsel %vm4770_vm4, %v6085_v60, %v4802_v29  ;;  %vm4771_vm7 = vcmp.ge.f32.partialorder %v6087_v52, 0.0  ;;  %v4803_v5 = vmul.f32 0.01, %v6087_v52  ;;  %v4836_v53 = vsel %vm4772_vm5, %v6084_v1, %v4804_v11 }
 0x275   : > { %v4903_v39 = vmul.f32 %v4834_v46, %v4834_v46  ;;  %v4865_v32 = vadd.f32 %v4864_v16, %v4834_v46  ;;  %v4933_v17 = vadd.f32 %v4932_v34, %v4902_v38  ;;  %v4837_v62 = vsel %vm4773_vm6, %v6086_v50, %v4805_v3 }
 0x276   : > { %v5920_v6 = vpop.f32.mrb[16].mxu1  ;;  %v6056_v43 = vpop.f32.mrb[16].mxu0  ;;  %v4835_v12 = vsel %vm4771_vm7, %v6087_v52, %v4803_v5  ;;  %v4905_v61 = vmul.f32 %v4836_v53, %v4836_v53  ;;  %v4906_v51 = vmul.f32 %v4837_v62, %v4837_v62 }
 0x277   : > { %v6088_v24 = vadd.f32 %v6056_v43, %v5920_v6  ;;  %v2638_v63 = vpop.f32.mrb[17].mxu1  ;;  %v4663_v42 = vpop.f32.mrb[17].mxu0  ;;  %v4934_v54 = vadd.f32 %v4933_v17, %v4903_v39  ;;  %v4866_v10 = vadd.f32 %v4865_v32, %v4835_v12  ;;  %v4904_v13 = vmul.f32 %v4835_v12, %v4835_v12 }
 0x278   : > { %v6089_v9 = vadd.f32 %v4663_v42, %v2638_v63  ;;  %v5921_v41 = vpop.f32.mrb[18].mxu1  ;;  %v6057_v27 = vpop.f32.mrb[18].mxu0 }
 0x279   : > { %v2641_v59 = vpop.f32.mrb[19].mxu1  ;;  %v4666_v47 = vpop.f32.mrb[19].mxu0  ;;  %v6090_v25 = vadd.f32 %v6057_v27, %v5921_v41  ;;  %v4867_v30 = vadd.f32 %v4866_v10, %v4836_v53  ;;  %v4935_v45 = vadd.f32 %v4934_v54, %v4904_v13  ;;  %vm4776_vm9 = vcmp.ge.f32.partialorder %v6088_v24, 0.0 }
 0x27a   : > { %vm4774_vm8 = vcmp.ge.f32.partialorder %v6089_v9, 0.0  ;;  %v4806_v18 = vmul.f32 0.01, %v6089_v9  ;;  %v6091_v40 = vadd.f32 %v4666_v47, %v2641_v59  ;;  %v4808_v14 = vmul.f32 0.01, %v6088_v24 }
 0x27b   : > { %v4936_v15 = vadd.f32 %v4935_v45, %v4905_v61  ;;  %v4868_v22 = vadd.f32 %v4867_v30, %v4837_v62  ;;  %v4809_v35 = vmul.f32 0.01, %v6090_v25  ;;  %vm4777_vm10 = vcmp.ge.f32.partialorder %v6090_v25, 0.0 }
 0x27c   : > { %v4838_v57 = vsel %vm4774_vm8, %v6089_v9, %v4806_v18  ;;  %vm4775_vm11 = vcmp.ge.f32.partialorder %v6091_v40, 0.0  ;;  %v4807_v23 = vmul.f32 0.01, %v6091_v40  ;;  %v4840_v1 = vsel %vm4776_vm9, %v6088_v24, %v4808_v14 }
 0x27d   : > { %v4907_v36 = vmul.f32 %v4838_v57, %v4838_v57  ;;  %v4869_v31 = vadd.f32 %v4868_v22, %v4838_v57  ;;  %v4937_v44 = vadd.f32 %v4936_v15, %v4906_v51  ;;  %v4841_v21 = vsel %vm4777_vm10, %v6090_v25, %v4809_v35 }
 0x27e   : > { %v5924_v56 = vpop.f32.mrb[20].mxu1  ;;  %v6060_v37 = vpop.f32.mrb[20].mxu0  ;;  %v4839_v2 = vsel %vm4775_vm11, %v6091_v40, %v4807_v23  ;;  %v4909_v33 = vmul.f32 %v4840_v1, %v4840_v1  ;;  %v4910_v38 = vmul.f32 %v4841_v21, %v4841_v21  ;;  %vm4960_vm8 = vcmask 1040384  }
 0x27f   : > { %v6092_v28 = vadd.f32 %v6060_v37, %v5924_v56  ;;  %v2654_v58 = vpop.f32.mrb[21].mxu1  ;;  %v4679_v26 = vpop.f32.mrb[21].mxu0  ;;  %v4938_v48 = vadd.f32 %v4937_v44, %v4907_v36  ;;  %v4870_v8 = vadd.f32 %v4869_v31, %v4839_v2  ;;  %v4908_v0 = vmul.f32 %v4839_v2, %v4839_v2 }
 0x280   : > { %v6093_v19 = vadd.f32 %v4679_v26, %v2654_v58  ;;  %v5925_v20 = vpop.f32.mrb[22].mxu1  ;;  %v6061_v60 = vpop.f32.mrb[22].mxu0 }
 0x281   : > { %v2657_v4 = vpop.f32.mrb[23].mxu1  ;;  %v4682_v55 = vpop.f32.mrb[23].mxu0  ;;  %v6094_v50 = vadd.f32 %v6061_v60, %v5925_v20  ;;  %v4871_v7 = vadd.f32 %v4870_v8, %v4840_v1  ;;  %v4939_v49 = vadd.f32 %v4938_v48, %v4908_v0  ;;  %vm4780_vm13 = vcmp.ge.f32.partialorder %v6092_v28, 0.0 }
 0x282   : > { %vm4778_vm12 = vcmp.ge.f32.partialorder %v6093_v19, 0.0  ;;  %v4810_v29 = vmul.f32 0.01, %v6093_v19  ;;  %v6095_v52 = vadd.f32 %v4682_v55, %v2657_v4  ;;  %v4812_v11 = vmul.f32 0.01, %v6092_v28 }
 0x283   : > { %v4940_v34 = vadd.f32 %v4939_v49, %v4909_v33  ;;  %v4872_v16 = vadd.f32 %v4871_v7, %v4841_v21  ;;  %v4813_v3 = vmul.f32 0.01, %v6094_v50  ;;  %vm4781_vm14 = vcmp.ge.f32.partialorder %v6094_v50, 0.0 }
 0x284   : > { %v4842_v46 = vsel %vm4778_vm12, %v6093_v19, %v4810_v29  ;;  %vm4779_vm15 = vcmp.ge.f32.partialorder %v6095_v52, 0.0  ;;  %v4811_v5 = vmul.f32 0.01, %v6095_v52  ;;  %v4844_v53 = vsel %vm4780_vm13, %v6092_v28, %v4812_v11 }
 0x285   : > { %v4911_v39 = vmul.f32 %v4842_v46, %v4842_v46  ;;  %v4873_v32 = vadd.f32 %v4872_v16, %v4842_v46  ;;  %v4941_v17 = vadd.f32 %v4940_v34, %v4910_v38  ;;  %v4845_v62 = vsel %vm4781_vm14, %v6094_v50, %v4813_v3 }
 0x286   : > { %v5928_v6 = vpop.f32.mrb[24].mxu1  ;;  %v6064_v43 = vpop.f32.mrb[24].mxu0  ;;  %v4843_v12 = vsel %vm4779_vm15, %v6095_v52, %v4811_v5  ;;  %v4913_v61 = vmul.f32 %v4844_v53, %v4844_v53  ;;  %v4914_v51 = vmul.f32 %v4845_v62, %v4845_v62 }
 0x287   : > { %v6096_v24 = vadd.f32 %v6064_v43, %v5928_v6  ;;  %v2670_v63 = vpop.f32.mrb[25].mxu1  ;;  %v4695_v42 = vpop.f32.mrb[25].mxu0  ;;  %v4942_v54 = vadd.f32 %v4941_v17, %v4911_v39  ;;  %v4874_v10 = vadd.f32 %v4873_v32, %v4843_v12  ;;  %v4912_v13 = vmul.f32 %v4843_v12, %v4843_v12 }
 0x288   : > { %v6097_v9 = vadd.f32 %v4695_v42, %v2670_v63  ;;  %v5929_v41 = vpop.f32.mrb[26].mxu1  ;;  %v6065_v27 = vpop.f32.mrb[26].mxu0 }
 0x289   : > { %v2673_v59 = vpop.f32.mrb[27].mxu1  ;;  %v4698_v47 = vpop.f32.mrb[27].mxu0  ;;  %v6098_v25 = vadd.f32 %v6065_v27, %v5929_v41  ;;  %v4875_v30 = vadd.f32 %v4874_v10, %v4844_v53  ;;  %v4943_v45 = vadd.f32 %v4942_v54, %v4912_v13  ;;  %vm4784_vm1 = vcmp.ge.f32.partialorder %v6096_v24, 0.0 }
 0x28a   : > { %vm4782_vm0 = vcmp.ge.f32.partialorder %v6097_v9, 0.0  ;;  %v4814_v18 = vmul.f32 0.01, %v6097_v9  ;;  %v6099_v40 = vadd.f32 %v4698_v47, %v2673_v59  ;;  %v4816_v14 = vmul.f32 0.01, %v6096_v24 }
 0x28b   : > { %v4944_v15 = vadd.f32 %v4943_v45, %v4913_v61  ;;  %v4876_v22 = vadd.f32 %v4875_v30, %v4845_v62  ;;  %v4817_v35 = vmul.f32 0.01, %v6098_v25  ;;  %vm4785_vm2 = vcmp.ge.f32.partialorder %v6098_v25, 0.0 }
 0x28c   : > { %v4846_v57 = vsel %vm4782_vm0, %v6097_v9, %v4814_v18  ;;  %vm4783_vm3 = vcmp.ge.f32.partialorder %v6099_v40, 0.0  ;;  %v4815_v23 = vmul.f32 0.01, %v6099_v40  ;;  %v4848_v1 = vsel %vm4784_vm1, %v6096_v24, %v4816_v14 }
 0x28d   : > { %v4915_v36 = vmul.f32 %v4846_v57, %v4846_v57  ;;  %v4877_v31 = vadd.f32 %v4876_v22, %v4846_v57  ;;  %v4945_v44 = vadd.f32 %v4944_v15, %v4914_v51  ;;  %v4849_v21 = vsel %vm4785_vm2, %v6098_v25, %v4817_v35  ;;  %v4962_v15 = vld [vmem:[%s8546_s19] sm:$0x3] }
 0x28e   : > { %v5932_v56 = vpop.f32.mrb[28].mxu1  ;;  %v6068_v37 = vpop.f32.mrb[28].mxu0  ;;  %v4847_v2 = vsel %vm4783_vm3, %v6099_v40, %v4815_v23  ;;  %v4917_v33 = vmul.f32 %v4848_v1, %v4848_v1  ;;  %v4918_v38 = vmul.f32 %v4849_v21, %v4849_v21 }
 0x28f   : > { %v6100_v28 = vadd.f32 %v6068_v37, %v5932_v56  ;;  %v2686_v58 = vpop.f32.mrb[29].mxu1  ;;  %v4711_v26 = vpop.f32.mrb[29].mxu0  ;;  %v4946_v48 = vadd.f32 %v4945_v44, %v4915_v36  ;;  %v4878_v8 = vadd.f32 %v4877_v31, %v4847_v2  ;;  %v4916_v0 = vmul.f32 %v4847_v2, %v4847_v2 }
 0x290   : > { %v6101_v19 = vadd.f32 %v4711_v26, %v2686_v58  ;;  %v5933_v20 = vpop.f32.mrb[30].mxu1  ;;  %v6069_v60 = vpop.f32.mrb[30].mxu0 }
 0x291   : > { %v2689_v4 = vpop.f32.mrb[31].mxu1  ;;  %v4714_v55 = vpop.f32.mrb[31].mxu0  ;;  %v6102_v50 = vadd.f32 %v6069_v60, %v5933_v20  ;;  %v4879_v7 = vadd.f32 %v4878_v8, %v4848_v1  ;;  %v4947_v49 = vadd.f32 %v4946_v48, %v4916_v0  ;;  %v4820_v11 = vmul.f32 0.01, %v6100_v28 }
 0x292   : > { %vm4786_vm4 = vcmp.ge.f32.partialorder %v6101_v19, 0.0  ;;  %v4818_v29 = vmul.f32 0.01, %v6101_v19  ;;  %v6103_v52 = vadd.f32 %v4714_v55, %v2689_v4  ;;  %vm4788_vm5 = vcmp.ge.f32.partialorder %v6100_v28, 0.0 }
 0x293   : > { %v4948_v34 = vadd.f32 %v4947_v49, %v4917_v33  ;;  %v4880_v16 = vadd.f32 %v4879_v7, %v4849_v21  ;;  %v4821_v3 = vmul.f32 0.01, %v6102_v50  ;;  %vm4789_vm7 = vcmp.ge.f32.partialorder %v6102_v50, 0.0 }
 0x294   : > { %v4850_v46 = vsel %vm4786_vm4, %v6101_v19, %v4818_v29  ;;  %vm4787_vm6 = vcmp.ge.f32.partialorder %v6103_v52, 0.0  ;;  %v4819_v5 = vmul.f32 0.01, %v6103_v52  ;;  %v4852_v32 = vsel %vm4788_vm5, %v6100_v28, %v4820_v11 }
 0x295   : > { %v4919_v39 = vmul.f32 %v4850_v46, %v4850_v46  ;;  %v4881_v6 = vadd.f32 %v4880_v16, %v4850_v46  ;;  %v4949_v43 = vadd.f32 %v4948_v34, %v4918_v38  ;;  %v4853_v53 = vsel %vm4789_vm7, %v6102_v50, %v4821_v3 }
 0x296   : > { %v4851_v17 = vsel %vm4787_vm6, %v6103_v52, %v4819_v5  ;;  %v4921_v12 = vmul.f32 %v4852_v32, %v4852_v32  ;;  %v4922_v27 = vmul.f32 %v4853_v53, %v4853_v53 }
 0x297   : > { %v4950_v24 = vadd.f32 %v4949_v43, %v4919_v39  ;;  %v4882_v63 = vadd.f32 %v4881_v6, %v4851_v17  ;;  %v4920_v42 = vmul.f32 %v4851_v17, %v4851_v17 }
 0x299   : > { %v4883_v9 = vadd.f32 %v4882_v63, %v4852_v32  ;;  %v4951_v41 = vadd.f32 %v4950_v24, %v4920_v42 }
 0x29b   : > { %v4884_v54 = vadd.f32 %v4883_v9, %v4853_v53  ;;  %v4952_v62 = vadd.f32 %v4951_v41, %v4921_v12 }
 0x29d   : > { %v4885_v10 = vrot.slane %v4884_v54, 4  ;;  %v4953_v13 = vadd.f32 %v4952_v62, %v4922_v27 }
 0x29f   : > { %v4886_v59 = vadd.f32 %v4885_v10, %v4884_v54  ;;  %v4954_v47 = vrot.slane %v4953_v13, 4 }
 0x2a1   : > { %v4887_v18 = vrot.slane %v4886_v59, 2  ;;  %v4955_v25 = vadd.f32 %v4954_v47, %v4953_v13 }
 0x2a3   : > { %v4888_v61 = vadd.f32 %v4887_v18, %v4886_v59  ;;  %v4956_v30 = vrot.slane %v4955_v25, 2 }
 0x2a5   : > { %v4889_v45 = vrot.slane %v4888_v61, 1  ;;  %v4957_v40 = vadd.f32 %v4956_v30, %v4955_v25 }
 0x2a7   : > { %v4958_v51 = vrot.slane %v4957_v40, 1  ;;  %v4890_v14 = vadd.f32 %v4889_v45, %v4888_v61 }
 0x2a9   : > { %v4959_v57 = vadd.f32 %v4958_v51, %v4957_v40 }
 0x2ab   : > { %v4961_v22 = vsel %vm4960_vm8, %v4890_v14, %v4959_v57 }
 0x2ac   : > { %v4963_v36 = vadd.f32 %v4962_v15, %v4961_v22 }
 0x2ae   : > { %4964 = vst [vmem:[%s8546_s19] sm:$0x3] %v4963_v36 }
 0x2af   : > { %6591 = shalt.err (!%p6588_p5)
}
 0x2b0   : > { %s6592_s4 = scalar_lea.hbm %s8584_s3, 32  ;;  %s6596_s15 = scalar_lea.hbm %s8636_s2, 64 }
 0x2b1   : > { %p6593_p9 = scmp.ne.s32.totalorder %s8584_s3, %s6592_s4  ;;  %p6597_p3 = scmp.lt.u32.totalorder %s8584_s3, %s8636_s2 }
 0x2b2   : > { %p6598_p7 = scmp.lt.u32.totalorder %s6596_s15, %s6592_s4  ;;  %p6600_p4 = scmp.lt.u32.totalorder %s6592_s4, %s8584_s3 }
 0x2b3   : > { %p6594_p1 = pnand %p6593_p9, %p6782_p10 }
 0x2b4   : > { %p6599_p11 = por %p6598_p7, %p6597_p3 }
 0x2b5   : > { %p6595_p2 = pneg %p6594_p1 }
 0x2b6   : > { %p6601_p6 = por %p6600_p4, %p6599_p11 }
 0x2b8   : > { %p6602_p8 = pnand %p6601_p6, %p6595_p2 }
 0x2ba   : > { %6605 = shalt.err (!%p6602_p8)
}
 0x2bb   : > { %6347 = dma.vmem_to_hbm [thread:$0]  (%p6782_p10), %s8586_s6, 32, %s8584_s3, %s4966_s5  }
 0x2bc PF: > { %s4991_s23 = sand.u32 1, %s6644_s9   ;;  %p8739_p12 = scmp.ne.s32.totalorder %s8663_s20, 0 }
 0x2bd   : > { %p8740_p13 = scmp.ge.s32.totalorder %s6664_s14, 2  ;;  %s4992_s17 = scalar_lea.sflag [#allocation4], %s4991_s23 }
 0x2bf   : > { %p6358_p0 = pnand %p8740_p13, %p8739_p12 }
 0x2c1   : > { %6639 = dma.done.wait (!%p6358_p0), %s4992_s17, 32  }
 0x2c2   : > { %6641 = vsyncadd (!%p6358_p0), %s4992_s17, 4294967264  ;;  %s19_s14 = sadd.s32 1, %s6664_s14   ;;  %s8741_s9 = smov %s6648_s10 }
 0x2c3   : > { %p16_p5 = scmp.ge.s32.totalorder %s19_s14, 4   ;;  %s8742_s10 = smov %s6652_s11 }
 0x2c4   : > { %s8743_s11 = smov %s6791_s28  ;;  %s8744_s12 = smov %s6660_s13 }
 0x2c5   : > { %s8745_s13 = smov %s8747_s25  ;;  %18 = sbr.rel (!%p16_p5) target bundleno = 7 (0x7), region = 91 }
 0x2cc   :  { %4997 = vsyncpa [#allocation3], 1 }
 0x2cd   :  { %4999 = vsyncpa [#allocation3 + $0x1], 1 }
 0x2ce   :  { %5000 = vsyncpa [#allocation6], 1 }
 0x2cf   :  { %5001 = vsyncpa [#allocation4], 1 }
 0x2d0   :  { %5003 = vsyncpa [#allocation4 + $0x1], 1 }

</bundles_post_ra>
